<compile_context>
chip_gen: v5e
topology: v5e:2x2
jax: 0.10.0
libtpu: 0.0.40
codegen_flags: <defaults>
</compile_context>

<pallas_src>
import functools
import math

import jax
import jax.numpy as jnp
from jax.experimental import pallas as pl
from jax.experimental.pallas import tpu as pltpu


def _round_up(x, m):
    return (x + m - 1) // m * m


# --------------------------- generation config ------------------------------

def _tpu_config():
    """Tile caps / VMEM limits gated on the TPU generation."""
    kind = ""
    try:
        kind = jax.devices()[0].device_kind.lower()
    except Exception:
        pass
    if "v5 lite" in kind or "v5e" in kind or "v5litepod" in kind:
        # 128 MiB VMEM, 128-wide MXU, single TensorCore.
        return dict(tm_max=1024, tn_wide=128, vmem_limit=64 << 20, two_cores=False)
    if "v6" in kind:
        # 128 MiB VMEM, 256x256 MXU, single TensorCore.
        return dict(tm_max=1024, tn_wide=256, vmem_limit=64 << 20, two_cores=False)
    # Default is v7x-safe: 64 MiB VMEM / TC, 256x256 MXU, 2 TensorCores -> make
    # sure parallel grid axes have >= 2 tiles.  (Also fine for v4/v5p.)
    return dict(tm_max=512, tn_wide=256, vmem_limit=40 << 20, two_cores=True)


def _pick_tm(M, tm_max, want_tiles=1):
    """Pick an M tile that minimizes padding (and gives >=want_tiles tiles)."""
    cands = [t for t in (2048, 1024, 512, 256, 128, 64, 32, 16, 8) if t <= tm_max]
    if not cands:
        cands = [8]
    best_t, best_mp, best_key = None, None, None
    for t in cands:
        mp = _round_up(M, t)
        key = (0 if mp // t >= want_tiles else 1, mp - M, -t)
        if best_key is None or key < best_key:
            best_t, best_mp, best_key = t, mp, key
    return best_t, best_mp


# ------------------------------ MXU kernels ---------------------------------

def _mm_single_kernel(*refs, has_res, epilogue):
    """Single-K-block matmul: z = a@b + bias (+ fused tanh/res/clamp)."""
    if has_res:
        a_ref, b_ref, bias_ref, r_ref, o_ref = refs
    else:
        a_ref, b_ref, bias_ref, o_ref = refs
        r_ref = None
    z = jnp.dot(a_ref[...], b_ref[...], preferred_element_type=jnp.float32)
    z = z + bias_ref[...]
    if epilogue == "tanh_res_clamp" and r_ref is not None:
        z = jnp.clip(2.0 * jnp.tanh(z) + r_ref[...], -1.0, 1.0)
    o_ref[...] = z.astype(o_ref.dtype)


def _mm_multi_kernel(*refs, has_res, epilogue):
    """K-tiled matmul with a VMEM f32 accumulator (fallback for K > 2048)."""
    if has_res:
        a_ref, b_ref, bias_ref, r_ref, o_ref, acc_ref = refs
    else:
        a_ref, b_ref, bias_ref, o_ref, acc_ref = refs
        r_ref = None

    @pl.when(pl.program_id(2) == 0)
    def _init():
        acc_ref[...] = jnp.zeros_like(acc_ref)

    acc_ref[...] += jnp.dot(a_ref[...], b_ref[...],
                            preferred_element_type=jnp.float32)

    @pl.when(pl.program_id(2) == pl.num_programs(2) - 1)
    def _finish():
        z = acc_ref[...] + bias_ref[...]
        if epilogue == "tanh_res_clamp" and r_ref is not None:
            z = jnp.clip(2.0 * jnp.tanh(z) + r_ref[...], -1.0, 1.0)
        o_ref[...] = z.astype(o_ref.dtype)


def pallas_matmul_bias(a, b, bias, cfg, residual=None, epilogue=None):
    """out = a @ b + bias[N] (+ optional fused clamp(2*tanh(.)+res) epilogue).

    a/b are already in the MXU dtype; accumulation is f32.  K and N are padded
    to multiples of 128 (only the small weight/bias/residual get padded); the
    output is sliced back to (M, N).
    """
    M, K = a.shape
    Kb, N = b.shape
    assert K == Kb
    if residual is None:
        epilogue = None
    has_res = epilogue == "tanh_res_clamp"

    # --- K: pad to 128 (aligned lane loads for the A tile / sublanes for B).
    Kp = _round_up(K, 128)
    if Kp != K:
        a = jnp.pad(a, ((0, 0), (0, Kp - K)))
        b = jnp.pad(b, ((0, Kp - K), (0, 0)))

    # --- N: pad to 128 so the output stores are lane-dense (no vst.msk).
    Np = _round_up(N, 128)
    tn = 256 if (cfg["tn_wide"] >= 256 and Np % 256 == 0 and Np >= 256) else 128
    tn = min(tn, Np)
    if Np != N:
        b = jnp.pad(b, ((0, 0), (0, Np - N)))
        bias = jnp.pad(bias, (0, Np - N))
    bias2 = bias.astype(jnp.float32).reshape(1, Np)
    if has_res:
        residual = residual.astype(jnp.float32)
        if Np != N:
            residual = jnp.pad(residual, ((0, 0), (0, Np - N)))

    # --- K tiling: single resident block for every GNet layer (K <= 640).
    if Kp <= 2048:
        tk = Kp
    else:
        tk = 1024
        Kp2 = _round_up(Kp, tk)
        if Kp2 != Kp:
            a = jnp.pad(a, ((0, 0), (0, Kp2 - Kp)))
            b = jnp.pad(b, ((0, Kp2 - Kp), (0, 0)))
        Kp = Kp2
    nk = Kp // tk

    # --- M tiling: minimize padding; on 2-TC parts make sure >=2 parallel tiles.
    n_other = Np // tn
    want = 2 if (cfg["two_cores"] and n_other < 2) else 1
    tm, Mp = _pick_tm(M, cfg["tm_max"], want)
    if Mp != M:
        a = jnp.pad(a, ((0, Mp - M), (0, 0)))
        if has_res:
            residual = jnp.pad(residual, ((0, Mp - M), (0, 0)))

    cost = pl.CostEstimate(
        flops=int(2 * Mp * Kp * Np),
        transcendentals=int(Mp * Np) if has_res else 0,
        bytes_accessed=int(Mp * Kp * a.dtype.itemsize + Kp * Np * b.dtype.itemsize
                           + Mp * Np * 4))

    if nk == 1:
        grid = (Mp // tm, Np // tn)
        in_specs = [pl.BlockSpec((tm, tk), lambda i, j: (i, 0)),
                    pl.BlockSpec((tk, tn), lambda i, j: (0, j)),
                    pl.BlockSpec((1, tn), lambda i, j: (0, j))]
        args = [a, b, bias2]
        if has_res:
            in_specs.append(pl.BlockSpec((tm, tn), lambda i, j: (i, j)))
            args.append(residual)
        out = pl.pallas_call(
            functools.partial(_mm_single_kernel, has_res=has_res, epilogue=epilogue),
            out_shape=jax.ShapeDtypeStruct((Mp, Np), jnp.float32),
            grid=grid,
            in_specs=in_specs,
            out_specs=pl.BlockSpec((tm, tn), lambda i, j: (i, j)),
            compiler_params=pltpu.CompilerParams(
                dimension_semantics=("parallel", "parallel"),
                vmem_limit_bytes=cfg["vmem_limit"]),
            cost_estimate=cost,
        )(*args)
    else:
        grid = (Mp // tm, Np // tn, nk)
        in_specs = [pl.BlockSpec((tm, tk), lambda i, j, kk: (i, kk)),
                    pl.BlockSpec((tk, tn), lambda i, j, kk: (kk, j)),
                    pl.BlockSpec((1, tn), lambda i, j, kk: (0, j))]
        args = [a, b, bias2]
        if has_res:
            in_specs.append(pl.BlockSpec((tm, tn), lambda i, j, kk: (i, j)))
            args.append(residual)
        out = pl.pallas_call(
            functools.partial(_mm_multi_kernel, has_res=has_res, epilogue=epilogue),
            out_shape=jax.ShapeDtypeStruct((Mp, Np), jnp.float32),
            grid=grid,
            in_specs=in_specs,
            out_specs=pl.BlockSpec((tm, tn), lambda i, j, kk: (i, j)),
            scratch_shapes=[pltpu.VMEM((tm, tn), jnp.float32)],
            compiler_params=pltpu.CompilerParams(
                dimension_semantics=("parallel", "parallel", "arbitrary"),
                vmem_limit_bytes=cfg["vmem_limit"]),
            cost_estimate=cost,
        )(*args)

    if (Mp, Np) != (M, N):
        out = out[:M, :N]
    return out


# --------------------- fused conv-matmul + InstanceNorm ---------------------

def _conv_instnorm_kernel(a_ref, b_ref, bias_ref, o_ref, *, relu, eps):
    z = jnp.dot(a_ref[...], b_ref[...], preferred_element_type=jnp.float32)
    z = z + bias_ref[...]
    mean = jnp.mean(z, axis=0, keepdims=True)
    var = jnp.maximum(jnp.mean(z * z, axis=0, keepdims=True) - mean * mean, 0.0)
    y = (z - mean) * jax.lax.rsqrt(var + eps)
    if relu:
        y = jnp.maximum(y, 0.0)
    o_ref[...] = y


def _conv_instnorm_res_kernel(a_ref, b_ref, bias_ref, r_ref, o_ref, *, eps):
    z = jnp.dot(a_ref[...], b_ref[...], preferred_element_type=jnp.float32)
    z = z + bias_ref[...]
    mean = jnp.mean(z, axis=0, keepdims=True)
    var = jnp.maximum(jnp.mean(z * z, axis=0, keepdims=True) - mean * mean, 0.0)
    o_ref[...] = (z - mean) * jax.lax.rsqrt(var + eps) + r_ref[...]


def pallas_conv_instnorm(patches, w_mat, bias, NB, HW, *, relu, residual, tn,
                         cfg, eps=1e-5):
    """Per-image fused conv-matmul + InstanceNorm(+ReLU / +residual).

    patches: (NB*HW, Kp), w_mat: (Kp, Np), bias: (Np,), residual: (NB,HW,Np)|None.
    Grid = (batch, N tiles); one M tile covers the whole image so the stats are
    computed on the resident accumulator before a single HBM writeback.
    """
    Kp = patches.shape[1]
    Np = w_mat.shape[1]
    a3 = patches.reshape(NB, HW, Kp)
    bias2 = bias.reshape(1, Np)
    grid = (NB, Np // tn)
    in_specs = [pl.BlockSpec((None, HW, Kp), lambda n, j: (n, 0, 0)),
                pl.BlockSpec((Kp, tn), lambda n, j: (0, j)),
                pl.BlockSpec((1, tn), lambda n, j: (0, j))]
    args = [a3, w_mat, bias2]
    if residual is not None:
        in_specs.append(pl.BlockSpec((None, HW, tn), lambda n, j: (n, 0, j)))
        args.append(residual.astype(jnp.float32))
        kern = functools.partial(_conv_instnorm_res_kernel, eps=eps)
    else:
        kern = functools.partial(_conv_instnorm_kernel, relu=relu, eps=eps)
    cost = pl.CostEstimate(
        flops=int(2 * NB * HW * Kp * Np + 8 * NB * HW * Np),
        transcendentals=int(NB * Np),
        bytes_accessed=int(NB * HW * Kp * patches.dtype.itemsize
                           + Kp * Np * w_mat.dtype.itemsize + NB * HW * Np * 4))
    return pl.pallas_call(
        kern,
        out_shape=jax.ShapeDtypeStruct((NB, HW, Np), jnp.float32),
        grid=grid,
        in_specs=in_specs,
        out_specs=pl.BlockSpec((None, HW, tn), lambda n, j: (n, 0, j)),
        compiler_params=pltpu.CompilerParams(
            dimension_semantics=("parallel", "parallel"),
            vmem_limit_bytes=cfg["vmem_limit"]),
        cost_estimate=cost,
    )(*args)


def _fused_fits(HW, Kp, Np, tn, has_res, cfg, itemsize):
    per_buf = (HW * Kp * itemsize + Kp * tn * itemsize + tn * 4
               + HW * tn * 4 + (HW * tn * 4 if has_res else 0))
    return 2 * per_buf < int(cfg["vmem_limit"] * 0.6)


# --------------------- standalone InstanceNorm (VPU) kernels ----------------

def _instnorm_kernel(x_ref, o_ref, *, relu, eps):
    x = x_ref[...]                                    # (HW, C) f32
    mean = jnp.mean(x, axis=0, keepdims=True)
    var = jnp.maximum(jnp.mean(x * x, axis=0, keepdims=True) - mean * mean, 0.0)
    y = (x - mean) * jax.lax.rsqrt(var + eps)
    if relu:
        y = jnp.maximum(y, 0.0)
    o_ref[...] = y


def _instnorm_res_kernel(x_ref, r_ref, o_ref, *, eps):
    x = x_ref[...]
    mean = jnp.mean(x, axis=0, keepdims=True)
    var = jnp.maximum(jnp.mean(x * x, axis=0, keepdims=True) - mean * mean, 0.0)
    o_ref[...] = (x - mean) * jax.lax.rsqrt(var + eps) + r_ref[...]


def pallas_instance_norm(x_nlc, relu, cfg, eps=1e-5):
    """InstanceNorm2d(affine=False)(+ReLU) on (N, H*W, C) rows."""
    N, HW, C = x_nlc.shape
    # TODO(synk): spatially tile HW with a two-pass (stats, normalize) reduction
    # when a full (HW, C) f32 block no longer fits the scoped-VMEM budget.
    return pl.pallas_call(
        functools.partial(_instnorm_kernel, relu=relu, eps=eps),
        out_shape=jax.ShapeDtypeStruct((N, HW, C), jnp.float32),
        grid=(N,),
        in_specs=[pl.BlockSpec((None, HW, C), lambda n: (n, 0, 0))],
        out_specs=pl.BlockSpec((None, HW, C), lambda n: (n, 0, 0)),
        compiler_params=pltpu.CompilerParams(
            dimension_semantics=("parallel",),
            vmem_limit_bytes=cfg["vmem_limit"]),
    )(x_nlc)


def pallas_instance_norm_residual(x_nlc, res_nlc, cfg, eps=1e-5):
    N, HW, C = x_nlc.shape
    return pl.pallas_call(
        functools.partial(_instnorm_res_kernel, eps=eps),
        out_shape=jax.ShapeDtypeStruct((N, HW, C), jnp.float32),
        grid=(N,),
        in_specs=[pl.BlockSpec((None, HW, C), lambda n: (n, 0, 0))] * 2,
        out_specs=pl.BlockSpec((None, HW, C), lambda n: (n, 0, 0)),
        compiler_params=pltpu.CompilerParams(
            dimension_semantics=("parallel",),
            vmem_limit_bytes=cfg["vmem_limit"]),
    )(x_nlc, res_nlc.astype(jnp.float32))


# --------------------------- conv glue (NHWC) --------------------------------

def _im2col_nhwc(x, k, stride):
    """(N, Hp, Wp, C) -> (N*OH*OW, Kp) patches, feature order (kh, kw, c),
    with K padded to a multiple of 128 at construction time."""
    N, Hp, Wp, C = x.shape
    OH = (Hp - k) // stride + 1
    OW = (Wp - k) // stride + 1
    cols = []
    for kh in range(k):
        for kw in range(k):
            cols.append(x[:, kh:kh + stride * (OH - 1) + 1:stride,
                          kw:kw + stride * (OW - 1) + 1:stride, :])
    K = k * k * C
    Kp = _round_up(K, 128)
    if Kp != K:
        cols.append(jnp.zeros((N, OH, OW, Kp - K), x.dtype))
    p = jnp.concatenate(cols, axis=-1)                # (N, OH, OW, Kp)
    return p.reshape(N * OH * OW, Kp), OH, OW, K, Kp


def conv_in_block(x_img, w, b, *, stride, refl, relu, mxu_dtype, cfg,
                  residual=None, eps=1e-5):
    """reflect-pad -> Conv2d -> InstanceNorm (+ReLU or +residual-add).

    Returns the lane-padded (NB, OH*OW, Np) slab (valid channels = Cout) plus
    (OH, OW, Cout, Np).  Padded channels are exactly zero.
    """
    NB = x_img.shape[0]
    cout, _, k, _ = w.shape
    if refl:
        x_img = jnp.pad(x_img, ((0, 0), (refl, refl), (refl, refl), (0, 0)),
                        mode="reflect")
    # bf16 BEFORE im2col: halves the k^2-expanded patch traffic in HBM.
    patches, OH, OW, K, Kp = _im2col_nhwc(x_img.astype(mxu_dtype), k, stride)
    HW = OH * OW
    Np = _round_up(cout, 128)
    w_mat = jnp.transpose(w, (2, 3, 1, 0)).reshape(K, cout)
    w_mat = jnp.pad(w_mat, ((0, Kp - K), (0, Np - cout))).astype(mxu_dtype)
    bias = jnp.pad(b.astype(jnp.float32), (0, Np - cout))
    tn = 256 if (cfg["tn_wide"] >= 256 and Np % 256 == 0 and Np >= 256) else 128
    tn = min(tn, Np)

    if _fused_fits(HW, Kp, Np, tn, residual is not None, cfg,
                   jnp.dtype(mxu_dtype).itemsize):
        slab = pallas_conv_instnorm(patches, w_mat, bias, NB, HW, relu=relu,
                                    residual=residual, tn=tn, cfg=cfg, eps=eps)
    else:
        # TODO(synk): spatially-tiled two-pass InstanceNorm for very large HW.
        z = pallas_matmul_bias(patches, w_mat, bias, cfg).reshape(NB, HW, Np)
        if residual is not None:
            slab = pallas_instance_norm_residual(z, residual, cfg, eps=eps)
        else:
            slab = pallas_instance_norm(z, relu=relu, cfg=cfg, eps=eps)
    return slab, OH, OW, cout, Np


def conv_plain_block(x_img, w, b, *, stride, refl, mxu_dtype, cfg):
    """reflect-pad -> Conv2d (no norm); returns the (NB, OH, OW, Cout) image."""
    NB = x_img.shape[0]
    cout, _, k, _ = w.shape
    if refl:
        x_img = jnp.pad(x_img, ((0, 0), (refl, refl), (refl, refl), (0, 0)),
                        mode="reflect")
    patches, OH, OW, K, Kp = _im2col_nhwc(x_img.astype(mxu_dtype), k, stride)
    w_mat = jnp.transpose(w, (2, 3, 1, 0)).reshape(K, cout)
    w_mat = jnp.pad(w_mat, ((0, Kp - K), (0, 0))).astype(mxu_dtype)
    z = pallas_matmul_bias(patches, w_mat, b.astype(jnp.float32), cfg)
    return z.reshape(NB, OH, OW, cout)


def _col2im_overlap_add(z, stride, padding, output_padding):
    """Scatter-free overlap-add: z (N, H, W, k, k, C) -> (N, Hout, Wout, C)."""
    N, H, W, k, _, C = z.shape
    Hf = (H - 1) * stride + k
    Wf = (W - 1) * stride + k
    Hout = (H - 1) * stride - 2 * padding + k + output_padding
    Wout = (W - 1) * stride - 2 * padding + k + output_padding

    def oa(t, in_axis, tap_axis, full):
        t = jnp.moveaxis(t, (in_axis, tap_axis), (0, 1))   # (H, k, ...)
        Hn, kn = t.shape[0], t.shape[1]
        rest = t.shape[2:]
        glen = -(-full // stride)
        groups = []
        for r in range(stride):
            acc = jnp.zeros((glen,) + tuple(rest), t.dtype)
            for kh in range(r, kn, stride):
                off = (kh - r) // stride
                pads = [(off, glen - off - Hn)] + [(0, 0)] * len(rest)
                acc = acc + jnp.pad(t[:, kh], pads)
            groups.append(acc)
        out = jnp.stack(groups, axis=1).reshape((glen * stride,) + tuple(rest))
        out = out[:full]
        return jnp.moveaxis(out, 0, in_axis)

    z = oa(z, in_axis=1, tap_axis=3, full=Hf)   # fold kh -> (N, Hf, W, k, C)
    z = oa(z, in_axis=2, tap_axis=3, full=Wf)   # fold kw -> (N, Hf, Wf, C)
    end_h, end_w = padding + Hout, padding + Wout
    if end_h > Hf or end_w > Wf:
        z = jnp.pad(z, ((0, 0), (0, max(0, end_h - Hf)),
                        (0, max(0, end_w - Wf)), (0, 0)))
    return z[:, padding:end_h, padding:end_w, :]


def conv_transpose2d_nhwc(x_img, w_t, stride, padding, output_padding,
                          mxu_dtype, cfg):
    """PyTorch ConvTranspose2d (bias=False), w_t: (Cin, Cout, k, k).

    rows @ (Cin, k*k*Cout) on the MXU, then a scatter-free col2im overlap-add.
    """
    NB, H, W, Cin = x_img.shape
    Cout, k = w_t.shape[1], w_t.shape[2]
    w_mat = jnp.transpose(w_t, (0, 2, 3, 1)).reshape(Cin, k * k * Cout)
    rows = x_img.reshape(NB * H * W, Cin).astype(mxu_dtype)
    z = pallas_matmul_bias(rows, w_mat.astype(mxu_dtype),
                           jnp.zeros((k * k * Cout,), jnp.float32), cfg)
    z = z.reshape(NB, H, W, k, k, Cout)
    return _col2im_overlap_add(z, stride, padding, output_padding)


# --------------------------- parameters & forward ---------------------------

def init_params(key):
    ks = jax.random.split(key, 8)

    def conv_w(k_, shape):  # GNet._initialize_weights for nn.Conv2d
        cout, _, kh, kw = shape
        std = math.sqrt(2.0 / (kh * kw * cout))
        return std * jax.random.normal(k_, shape, jnp.float32)

    return dict(
        conv1_w=conv_w(ks[0], (32, 3, 7, 7)), conv1_b=jnp.zeros((32,), jnp.float32),
        conv2_w=conv_w(ks[1], (64, 32, 3, 3)), conv2_b=jnp.zeros((64,), jnp.float32),
        conv3_1_w=conv_w(ks[2], (64, 64, 3, 3)), conv3_1_b=jnp.zeros((64,), jnp.float32),
        conv3_2_w=conv_w(ks[3], (64, 64, 3, 3)), conv3_2_b=jnp.zeros((64,), jnp.float32),
        # ConvTranspose2d weights (shapes per nn module), synthetic init.
        deconv1_w=0.05 * jax.random.normal(ks[4], (64, 128, 3, 3), jnp.float32),
        deconv2_w=0.05 * jax.random.normal(ks[5], (128, 3, 3, 3), jnp.float32),
        conv_out_w=conv_w(ks[6], (3, 3, 7, 7)), conv_out_b=jnp.zeros((3,), jnp.float32),
    )


def gnet_forward(x_nchw, p, mxu_dtype=jnp.bfloat16):
    cfg = _tpu_config()
    NB, _, H, W = x_nchw.shape
    x = jnp.transpose(x_nchw, (0, 2, 3, 1))           # NHWC, module boundary only

    # y1 = relu(in1(conv1(reflpad3(x))))     [fused matmul + IN + ReLU]
    y1_slab, h1, w1, c1, _ = conv_in_block(x, p["conv1_w"], p["conv1_b"],
                                           stride=2, refl=3, relu=True,
                                           mxu_dtype=mxu_dtype, cfg=cfg)
    y1 = y1_slab[..., :c1].reshape(NB, h1, w1, c1)

    # y2 = relu(in2(conv2(reflpad1(y1))))    [fused matmul + IN + ReLU]
    y2_slab, h2, w2, c2, _ = conv_in_block(y1, p["conv2_w"], p["conv2_b"],
                                           stride=2, refl=1, relu=True,
                                           mxu_dtype=mxu_dtype, cfg=cfg)
    y2 = y2_slab[..., :c2].reshape(NB, h2, w2, c2)

    # y3 = in3(con3_2(pad(con3_1(pad(y2)))));  y2 + y3 fused into the norm epilogue
    t = conv_plain_block(y2, p["conv3_1_w"], p["conv3_1_b"], stride=1, refl=1,
                         mxu_dtype=mxu_dtype, cfg=cfg)
    d_slab, _, _, _, _ = conv_in_block(t, p["conv3_2_w"], p["conv3_2_b"],
                                       stride=1, refl=1, relu=False,
                                       mxu_dtype=mxu_dtype, cfg=cfg,
                                       residual=y2_slab)
    d = d_slab[..., :c2].reshape(NB, h2, w2, c2)

    # deconv: ConvT(64,128,3,2,1,1) -> IN -> ReLU -> ConvT(128,3,3,2,1,1)
    u = conv_transpose2d_nhwc(d, p["deconv1_w"], 2, 1, 1, mxu_dtype, cfg)
    hd, wd, cd = u.shape[1], u.shape[2], u.shape[3]
    u = pallas_instance_norm(u.reshape(NB, hd * wd, cd), relu=True, cfg=cfg)
    u = u.reshape(NB, hd, wd, cd)
    v = conv_transpose2d_nhwc(u, p["deconv2_w"], 2, 1, 1, mxu_dtype, cfg)

    # ReflPad(3) -> Conv(3,3,7) -> Tanh; output = clamp(2*tanh(.) + x, -1, 1)
    # all fused into a single matmul epilogue (residual padded to 128 lanes).
    v_pad = jnp.pad(v, ((0, 0), (3, 3), (3, 3), (0, 0)),
                    mode="reflect").astype(mxu_dtype)
    patches, oh, ow, K, Kp = _im2col_nhwc(v_pad, 7, 1)
    w_mat = jnp.transpose(p["conv_out_w"], (2, 3, 1, 0)).reshape(K, 3)
    w_mat = jnp.pad(w_mat, ((0, Kp - K), (0, 0))).astype(mxu_dtype)
    x_rows = x.reshape(NB * H * W, 3)
    out_rows = pallas_matmul_bias(patches, w_mat,
                                  p["conv_out_b"].astype(jnp.float32), cfg,
                                  residual=x_rows, epilogue="tanh_res_clamp")
    out = out_rows.reshape(NB, oh, ow, 3)
    return jnp.transpose(out, (0, 3, 1, 2))           # back to NCHW


# --------------------------- pure-JAX reference -----------------------------

def ref_forward(x, p, mxu_dtype=jnp.float32):
    """Reference GNet; mxu_dtype=bfloat16 mirrors the MXU input precision."""
    def conv(x_, w, b, stride, refl):
        if refl:
            x_ = jnp.pad(x_, ((0, 0), (0, 0), (refl,) * 2, (refl,) * 2), mode="reflect")
        y = jax.lax.conv_general_dilated(
            x_.astype(mxu_dtype), w.astype(mxu_dtype), (stride, stride), "VALID",
            dimension_numbers=("NCHW", "OIHW", "NCHW"),
            preferred_element_type=jnp.float32)
        return y + b[None, :, None, None]

    def convT(x_, w_t, stride, pad, opad):
        k = w_t.shape[2]
        w_eq = jnp.transpose(w_t[:, :, ::-1, ::-1], (1, 0, 2, 3))
        return jax.lax.conv_general_dilated(
            x_.astype(mxu_dtype), w_eq.astype(mxu_dtype), (1, 1),
            padding=[(k - 1 - pad, k - 1 - pad + opad)] * 2,
            lhs_dilation=(stride, stride),
            dimension_numbers=("NCHW", "OIHW", "NCHW"),
            preferred_element_type=jnp.float32)

    def inorm(x_):
        m = x_.mean(axis=(2, 3), keepdims=True)
        v = jnp.square(x_ - m).mean(axis=(2, 3), keepdims=True)
        return (x_ - m) / jnp.sqrt(v + 1e-5)

    y1 = jax.nn.relu(inorm(conv(x, p["conv1_w"], p["conv1_b"], 2, 3)))
    y2 = jax.nn.relu(inorm(conv(y1, p["conv2_w"], p["conv2_b"], 2, 1)))
    t = conv(y2, p["conv3_1_w"], p["conv3_1_b"], 1, 1)
    t = conv(t, p["conv3_2_w"], p["conv3_2_b"], 1, 1)
    d = y2 + inorm(t)
    d = jax.nn.relu(inorm(convT(d, p["deconv1_w"], 2, 1, 1)))
    d = convT(d, p["deconv2_w"], 2, 1, 1)
    d = conv(d, p["conv_out_w"], p["conv_out_b"], 1, 3)
    return jnp.clip(2.0 * jnp.tanh(d) + x, -1.0, 1.0)


# ------------------------------------ main -----------------------------------

if __name__ == "__main__":
    key = jax.random.PRNGKey(0)
    k_x, k_p = jax.random.split(key)
    x = jax.random.uniform(k_x, (2, 3, 16, 16), jnp.float32, minval=-1.0, maxval=1.0)
    params = init_params(k_p)

    fwd_bf16 = jax.jit(lambda xx, pp: gnet_forward(xx, pp, jnp.bfloat16))
    fwd_f32 = jax.jit(lambda xx, pp: gnet_forward(xx, pp, jnp.float32))

    out = jax.block_until_ready(fwd_bf16(x, params))      # production (bf16 MXU) path
    out_f32 = jax.block_until_ready(fwd_f32(x, params))   # f32 path for strict check

    ref_f32 = jax.block_until_ready(ref_forward(x, params, jnp.float32))
    ref_bf16 = jax.block_until_ready(ref_forward(x, params, jnp.bfloat16))

    assert out.shape == x.shape and out.dtype == jnp.float32
    # Strict semantic check: f32 kernel pipeline vs f32 reference.
    err_strict = float(jnp.max(jnp.abs(out_f32 - ref_f32)))
    assert err_strict < 1e-3, f"f32 path mismatch: {err_strict}"
    # bf16-MXU path checked against a precision-matched (bf16-input) reference.
    err_matched = float(jnp.max(jnp.abs(out - ref_bf16)))
    assert err_matched < 1e-2, f"bf16 path mismatch: {err_matched}"

    print("KERNEL_OK")
</pallas_src>

<mosaic_0001>
module attributes {stable_mosaic.version = 11 : i64} {
  func.func @_conv_instnorm_kernel(%arg0: i32, %arg1: i32, %arg2: memref<1x64x256xbf16, #tpu.memory_space<vmem>>, %arg3: memref<256x128xbf16, #tpu.memory_space<vmem>>, %arg4: memref<1x128xf32, #tpu.memory_space<vmem>>, %arg5: memref<1x64x128xf32, #tpu.memory_space<vmem>>) attributes {dimension_semantics = [#tpu.dimension_semantics<parallel>, #tpu.dimension_semantics<parallel>], iteration_bounds = array<i64: 2, 1>, scalar_prefetch = 0 : i64, scratch_operands = 0 : i64, tpu.core_type = #tpu.core_type<tc>, window_params = [{transform_indices = @transform_0, window_bounds = array<i64: 1, 64, 256>}, {transform_indices = @transform_1, window_bounds = array<i64: 256, 128>}, {transform_indices = @transform_2, window_bounds = array<i64: 1, 128>}, {transform_indices = @transform_3, window_bounds = array<i64: 1, 64, 128>}]} {
    %c0 = arith.constant 0 : index
    %c0_0 = arith.constant 0 : index
    %c0_1 = arith.constant 0 : index
    %0 = vector.load %arg2[%c0, %c0_0, %c0_1] : memref<1x64x256xbf16, #tpu.memory_space<vmem>>, vector<1x64x256xbf16>
    %1 = vector.shape_cast %0 : vector<1x64x256xbf16> to vector<64x256xbf16>
    %c0_2 = arith.constant 0 : index
    %c0_3 = arith.constant 0 : index
    %2 = vector.load %arg3[%c0_2, %c0_3] : memref<256x128xbf16, #tpu.memory_space<vmem>>, vector<256x128xbf16>
    %cst = arith.constant dense<0.000000e+00> : vector<64x128xf32>
    %3 = tpu.matmul %1, %2, %cst {dimension_numbers = #tpu.dot_dimension_numbers<[1], [0], [0], [1], [0, 0, 1, 1], [], []>} : vector<64x256xbf16>, vector<256x128xbf16>, vector<64x128xf32> -> vector<64x128xf32>
    %c0_4 = arith.constant 0 : index
    %c0_5 = arith.constant 0 : index
    %4 = vector.load %arg4[%c0_4, %c0_5] : memref<1x128xf32, #tpu.memory_space<vmem>>, vector<1x128xf32>
    %5 = vector.broadcast %4 : vector<1x128xf32> to vector<64x128xf32>
    %6 = arith.addf %3, %5 : vector<64x128xf32>
    %cst_6 = arith.constant dense<0.000000e+00> : vector<128xf32>
    %7 = vector.multi_reduction <add>, %6, %cst_6 [0] : vector<64x128xf32> to vector<128xf32>
    %8 = vector.shape_cast %7 : vector<128xf32> to vector<1x128xf32>
    %cst_7 = arith.constant 6.400000e+01 : f32
    %9 = vector.broadcast %cst_7 : f32 to vector<1x128xf32>
    %10 = arith.divf %8, %9 : vector<1x128xf32>
    %11 = arith.mulf %6, %6 : vector<64x128xf32>
    %cst_8 = arith.constant dense<0.000000e+00> : vector<128xf32>
    %12 = vector.multi_reduction <add>, %11, %cst_8 [0] : vector<64x128xf32> to vector<128xf32>
    %13 = vector.shape_cast %12 : vector<128xf32> to vector<1x128xf32>
    %cst_9 = arith.constant 6.400000e+01 : f32
    %14 = vector.broadcast %cst_9 : f32 to vector<1x128xf32>
    %15 = arith.divf %13, %14 : vector<1x128xf32>
    %16 = arith.mulf %10, %10 : vector<1x128xf32>
    %17 = arith.subf %15, %16 : vector<1x128xf32>
    %cst_10 = arith.constant 0.000000e+00 : f32
    %18 = vector.broadcast %cst_10 : f32 to vector<1x128xf32>
    %19 = arith.maximumf %17, %18 : vector<1x128xf32>
    %20 = vector.broadcast %10 : vector<1x128xf32> to vector<64x128xf32>
    %21 = arith.subf %6, %20 : vector<64x128xf32>
    %cst_11 = arith.constant 9.99999974E-6 : f32
    %22 = vector.broadcast %cst_11 : f32 to vector<1x128xf32>
    %23 = arith.addf %19, %22 : vector<1x128xf32>
    %24 = math.rsqrt %23 : vector<1x128xf32>
    %25 = vector.broadcast %24 : vector<1x128xf32> to vector<64x128xf32>
    %26 = arith.mulf %21, %25 : vector<64x128xf32>
    %cst_12 = arith.constant 0.000000e+00 : f32
    %27 = vector.broadcast %cst_12 : f32 to vector<64x128xf32>
    %28 = arith.maximumf %26, %27 : vector<64x128xf32>
    %c0_13 = arith.constant 0 : index
    %c0_14 = arith.constant 0 : index
    %c0_15 = arith.constant 0 : index
    %29 = vector.load %arg5[%c0_13, %c0_14, %c0_15] : memref<1x64x128xf32, #tpu.memory_space<vmem>>, vector<1x64x128xf32>
    %30 = vector.shape_cast %29 : vector<1x64x128xf32> to vector<64x128xf32>
    %31 = vector.shape_cast %28 : vector<64x128xf32> to vector<1x64x128xf32>
    tpu.vector_store %arg5[%c0_13, %c0_14, %c0_15], %31 {strides = array<i32>} : memref<1x64x128xf32, #tpu.memory_space<vmem>>, vector<1x64x128xf32>,
    return
  }
  func.func @transform_0(%arg0: i32, %arg1: i32) -> (i32, i32, i32) {
    %c0_i32 = arith.constant 0 : i32
    %c0_i32_0 = arith.constant 0 : i32
    %c0_i32_1 = arith.constant 0 : i32
    return %arg0, %c0_i32, %c0_i32_0 : i32, i32, i32
  }
  func.func @transform_1(%arg0: i32, %arg1: i32) -> (i32, i32) {
    %c0_i32 = arith.constant 0 : i32
    %c0_i32_0 = arith.constant 0 : i32
    return %c0_i32, %arg1 : i32, i32
  }
  func.func @transform_2(%arg0: i32, %arg1: i32) -> (i32, i32) {
    %c0_i32 = arith.constant 0 : i32
    %c0_i32_0 = arith.constant 0 : i32
    return %c0_i32, %arg1 : i32, i32
  }
  func.func @transform_3(%arg0: i32, %arg1: i32) -> (i32, i32, i32) {
    %c0_i32 = arith.constant 0 : i32
    %c0_i32_0 = arith.constant 0 : i32
    return %arg0, %c0_i32, %arg1 : i32, i32, i32
  }
}

module attributes {stable_mosaic.version = 11 : i64} {
  func.func @_conv_instnorm_kernel(%arg0: i32, %arg1: i32, %arg2: memref<1x16x384xbf16, #tpu.memory_space<vmem>>, %arg3: memref<384x128xbf16, #tpu.memory_space<vmem>>, %arg4: memref<1x128xf32, #tpu.memory_space<vmem>>, %arg5: memref<1x16x128xf32, #tpu.memory_space<vmem>>) attributes {dimension_semantics = [#tpu.dimension_semantics<parallel>, #tpu.dimension_semantics<parallel>], iteration_bounds = array<i64: 2, 1>, scalar_prefetch = 0 : i64, scratch_operands = 0 : i64, tpu.core_type = #tpu.core_type<tc>, window_params = [{transform_indices = @transform_0, window_bounds = array<i64: 1, 16, 384>}, {transform_indices = @transform_1, window_bounds = array<i64: 384, 128>}, {transform_indices = @transform_2, window_bounds = array<i64: 1, 128>}, {transform_indices = @transform_3, window_bounds = array<i64: 1, 16, 128>}]} {
    %c0 = arith.constant 0 : index
    %c0_0 = arith.constant 0 : index
    %c0_1 = arith.constant 0 : index
    %0 = vector.load %arg2[%c0, %c0_0, %c0_1] : memref<1x16x384xbf16, #tpu.memory_space<vmem>>, vector<1x16x384xbf16>
    %1 = vector.shape_cast %0 : vector<1x16x384xbf16> to vector<16x384xbf16>
    %c0_2 = arith.constant 0 : index
    %c0_3 = arith.constant 0 : index
    %2 = vector.load %arg3[%c0_2, %c0_3] : memref<384x128xbf16, #tpu.memory_space<vmem>>, vector<384x128xbf16>
    %cst = arith.constant dense<0.000000e+00> : vector<16x128xf32>
    %3 = tpu.matmul %1, %2, %cst {dimension_numbers = #tpu.dot_dimension_numbers<[1], [0], [0], [1], [0, 0, 1, 1], [], []>} : vector<16x384xbf16>, vector<384x128xbf16>, vector<16x128xf32> -> vector<16x128xf32>
    %c0_4 = arith.constant 0 : index
    %c0_5 = arith.constant 0 : index
    %4 = vector.load %arg4[%c0_4, %c0_5] : memref<1x128xf32, #tpu.memory_space<vmem>>, vector<1x128xf32>
    %5 = vector.broadcast %4 : vector<1x128xf32> to vector<16x128xf32>
    %6 = arith.addf %3, %5 : vector<16x128xf32>
    %cst_6 = arith.constant dense<0.000000e+00> : vector<128xf32>
    %7 = vector.multi_reduction <add>, %6, %cst_6 [0] : vector<16x128xf32> to vector<128xf32>
    %8 = vector.shape_cast %7 : vector<128xf32> to vector<1x128xf32>
    %cst_7 = arith.constant 1.600000e+01 : f32
    %9 = vector.broadcast %cst_7 : f32 to vector<1x128xf32>
    %10 = arith.divf %8, %9 : vector<1x128xf32>
    %11 = arith.mulf %6, %6 : vector<16x128xf32>
    %cst_8 = arith.constant dense<0.000000e+00> : vector<128xf32>
    %12 = vector.multi_reduction <add>, %11, %cst_8 [0] : vector<16x128xf32> to vector<128xf32>
    %13 = vector.shape_cast %12 : vector<128xf32> to vector<1x128xf32>
    %cst_9 = arith.constant 1.600000e+01 : f32
    %14 = vector.broadcast %cst_9 : f32 to vector<1x128xf32>
    %15 = arith.divf %13, %14 : vector<1x128xf32>
    %16 = arith.mulf %10, %10 : vector<1x128xf32>
    %17 = arith.subf %15, %16 : vector<1x128xf32>
    %cst_10 = arith.constant 0.000000e+00 : f32
    %18 = vector.broadcast %cst_10 : f32 to vector<1x128xf32>
    %19 = arith.maximumf %17, %18 : vector<1x128xf32>
    %20 = vector.broadcast %10 : vector<1x128xf32> to vector<16x128xf32>
    %21 = arith.subf %6, %20 : vector<16x128xf32>
    %cst_11 = arith.constant 9.99999974E-6 : f32
    %22 = vector.broadcast %cst_11 : f32 to vector<1x128xf32>
    %23 = arith.addf %19, %22 : vector<1x128xf32>
    %24 = math.rsqrt %23 : vector<1x128xf32>
    %25 = vector.broadcast %24 : vector<1x128xf32> to vector<16x128xf32>
    %26 = arith.mulf %21, %25 : vector<16x128xf32>
    %cst_12 = arith.constant 0.000000e+00 : f32
    %27 = vector.broadcast %cst_12 : f32 to vector<16x128xf32>
    %28 = arith.maximumf %26, %27 : vector<16x128xf32>
    %c0_13 = arith.constant 0 : index
    %c0_14 = arith.constant 0 : index
    %c0_15 = arith.constant 0 : index
    %29 = vector.load %arg5[%c0_13, %c0_14, %c0_15] : memref<1x16x128xf32, #tpu.memory_space<vmem>>, vector<1x16x128xf32>
    %30 = vector.shape_cast %29 : vector<1x16x128xf32> to vector<16x128xf32>
    %31 = vector.shape_cast %28 : vector<16x128xf32> to vector<1x16x128xf32>
    tpu.vector_store %arg5[%c0_13, %c0_14, %c0_15], %31 {strides = array<i32>} : memref<1x16x128xf32, #tpu.memory_space<vmem>>, vector<1x16x128xf32>,
    return
  }
  func.func @transform_0(%arg0: i32, %arg1: i32) -> (i32, i32, i32) {
    %c0_i32 = arith.constant 0 : i32
    %c0_i32_0 = arith.constant 0 : i32
    %c0_i32_1 = arith.constant 0 : i32
    return %arg0, %c0_i32, %c0_i32_0 : i32, i32, i32
  }
  func.func @transform_1(%arg0: i32, %arg1: i32) -> (i32, i32) {
    %c0_i32 = arith.constant 0 : i32
    %c0_i32_0 = arith.constant 0 : i32
    return %c0_i32, %arg1 : i32, i32
  }
  func.func @transform_2(%arg0: i32, %arg1: i32) -> (i32, i32) {
    %c0_i32 = arith.constant 0 : i32
    %c0_i32_0 = arith.constant 0 : i32
    return %c0_i32, %arg1 : i32, i32
  }
  func.func @transform_3(%arg0: i32, %arg1: i32) -> (i32, i32, i32) {
    %c0_i32 = arith.constant 0 : i32
    %c0_i32_0 = arith.constant 0 : i32
    return %arg0, %c0_i32, %arg1 : i32, i32, i32
  }
}

module attributes {stable_mosaic.version = 11 : i64} {
  func.func @_mm_single_kernel(%arg0: i32, %arg1: i32, %arg2: memref<16x640xbf16, #tpu.memory_space<vmem>>, %arg3: memref<640x128xbf16, #tpu.memory_space<vmem>>, %arg4: memref<1x128xf32, #tpu.memory_space<vmem>>, %arg5: memref<16x128xf32, #tpu.memory_space<vmem>>) attributes {dimension_semantics = [#tpu.dimension_semantics<parallel>, #tpu.dimension_semantics<parallel>], iteration_bounds = array<i64: 2, 1>, scalar_prefetch = 0 : i64, scratch_operands = 0 : i64, tpu.core_type = #tpu.core_type<tc>, window_params = [{transform_indices = @transform_0, window_bounds = array<i64: 16, 640>}, {transform_indices = @transform_1, window_bounds = array<i64: 640, 128>}, {transform_indices = @transform_2, window_bounds = array<i64: 1, 128>}, {transform_indices = @transform_3, window_bounds = array<i64: 16, 128>}]} {
    %c0 = arith.constant 0 : index
    %c0_0 = arith.constant 0 : index
    %0 = vector.load %arg2[%c0, %c0_0] : memref<16x640xbf16, #tpu.memory_space<vmem>>, vector<16x640xbf16>
    %c0_1 = arith.constant 0 : index
    %c0_2 = arith.constant 0 : index
    %1 = vector.load %arg3[%c0_1, %c0_2] : memref<640x128xbf16, #tpu.memory_space<vmem>>, vector<640x128xbf16>
    %cst = arith.constant dense<0.000000e+00> : vector<16x128xf32>
    %2 = tpu.matmul %0, %1, %cst {dimension_numbers = #tpu.dot_dimension_numbers<[1], [0], [0], [1], [0, 0, 1, 1], [], []>} : vector<16x640xbf16>, vector<640x128xbf16>, vector<16x128xf32> -> vector<16x128xf32>
    %c0_3 = arith.constant 0 : index
    %c0_4 = arith.constant 0 : index
    %3 = vector.load %arg4[%c0_3, %c0_4] : memref<1x128xf32, #tpu.memory_space<vmem>>, vector<1x128xf32>
    %4 = vector.broadcast %3 : vector<1x128xf32> to vector<16x128xf32>
    %5 = arith.addf %2, %4 : vector<16x128xf32>
    %c0_5 = arith.constant 0 : index
    %c0_6 = arith.constant 0 : index
    %6 = vector.load %arg5[%c0_5, %c0_6] : memref<16x128xf32, #tpu.memory_space<vmem>>, vector<16x128xf32>
    tpu.vector_store %arg5[%c0_5, %c0_6], %5 {strides = array<i32>} : memref<16x128xf32, #tpu.memory_space<vmem>>, vector<16x128xf32>,
    return
  }
  func.func @transform_0(%arg0: i32, %arg1: i32) -> (i32, i32) {
    %c0_i32 = arith.constant 0 : i32
    %c0_i32_0 = arith.constant 0 : i32
    return %arg0, %c0_i32 : i32, i32
  }
  func.func @transform_1(%arg0: i32, %arg1: i32) -> (i32, i32) {
    %c0_i32 = arith.constant 0 : i32
    %c0_i32_0 = arith.constant 0 : i32
    return %c0_i32, %arg1 : i32, i32
  }
  func.func @transform_2(%arg0: i32, %arg1: i32) -> (i32, i32) {
    %c0_i32 = arith.constant 0 : i32
    %c0_i32_0 = arith.constant 0 : i32
    return %c0_i32, %arg1 : i32, i32
  }
  func.func @transform_3(%arg0: i32, %arg1: i32) -> (i32, i32) {
    %c0_i32 = arith.constant 0 : i32
    return %arg0, %arg1 : i32, i32
  }
}

module attributes {stable_mosaic.version = 11 : i64} {
  func.func @_conv_instnorm_res_kernel(%arg0: i32, %arg1: i32, %arg2: memref<1x16x640xbf16, #tpu.memory_space<vmem>>, %arg3: memref<640x128xbf16, #tpu.memory_space<vmem>>, %arg4: memref<1x128xf32, #tpu.memory_space<vmem>>, %arg5: memref<1x16x128xf32, #tpu.memory_space<vmem>>, %arg6: memref<1x16x128xf32, #tpu.memory_space<vmem>>) attributes {dimension_semantics = [#tpu.dimension_semantics<parallel>, #tpu.dimension_semantics<parallel>], iteration_bounds = array<i64: 2, 1>, scalar_prefetch = 0 : i64, scratch_operands = 0 : i64, tpu.core_type = #tpu.core_type<tc>, window_params = [{transform_indices = @transform_0, window_bounds = array<i64: 1, 16, 640>}, {transform_indices = @transform_1, window_bounds = array<i64: 640, 128>}, {transform_indices = @transform_2, window_bounds = array<i64: 1, 128>}, {transform_indices = @transform_3, window_bounds = array<i64: 1, 16, 128>}, {transform_indices = @transform_4, window_bounds = array<i64: 1, 16, 128>}]} {
    %c0 = arith.constant 0 : index
    %c0_0 = arith.constant 0 : index
    %c0_1 = arith.constant 0 : index
    %0 = vector.load %arg2[%c0, %c0_0, %c0_1] : memref<1x16x640xbf16, #tpu.memory_space<vmem>>, vector<1x16x640xbf16>
    %1 = vector.shape_cast %0 : vector<1x16x640xbf16> to vector<16x640xbf16>
    %c0_2 = arith.constant 0 : index
    %c0_3 = arith.constant 0 : index
    %2 = vector.load %arg3[%c0_2, %c0_3] : memref<640x128xbf16, #tpu.memory_space<vmem>>, vector<640x128xbf16>
    %cst = arith.constant dense<0.000000e+00> : vector<16x128xf32>
    %3 = tpu.matmul %1, %2, %cst {dimension_numbers = #tpu.dot_dimension_numbers<[1], [0], [0], [1], [0, 0, 1, 1], [], []>} : vector<16x640xbf16>, vector<640x128xbf16>, vector<16x128xf32> -> vector<16x128xf32>
    %c0_4 = arith.constant 0 : index
    %c0_5 = arith.constant 0 : index
    %4 = vector.load %arg4[%c0_4, %c0_5] : memref<1x128xf32, #tpu.memory_space<vmem>>, vector<1x128xf32>
    %5 = vector.broadcast %4 : vector<1x128xf32> to vector<16x128xf32>
    %6 = arith.addf %3, %5 : vector<16x128xf32>
    %cst_6 = arith.constant dense<0.000000e+00> : vector<128xf32>
    %7 = vector.multi_reduction <add>, %6, %cst_6 [0] : vector<16x128xf32> to vector<128xf32>
    %8 = vector.shape_cast %7 : vector<128xf32> to vector<1x128xf32>
    %cst_7 = arith.constant 1.600000e+01 : f32
    %9 = vector.broadcast %cst_7 : f32 to vector<1x128xf32>
    %10 = arith.divf %8, %9 : vector<1x128xf32>
    %11 = arith.mulf %6, %6 : vector<16x128xf32>
    %cst_8 = arith.constant dense<0.000000e+00> : vector<128xf32>
    %12 = vector.multi_reduction <add>, %11, %cst_8 [0] : vector<16x128xf32> to vector<128xf32>
    %13 = vector.shape_cast %12 : vector<128xf32> to vector<1x128xf32>
    %cst_9 = arith.constant 1.600000e+01 : f32
    %14 = vector.broadcast %cst_9 : f32 to vector<1x128xf32>
    %15 = arith.divf %13, %14 : vector<1x128xf32>
    %16 = arith.mulf %10, %10 : vector<1x128xf32>
    %17 = arith.subf %15, %16 : vector<1x128xf32>
    %cst_10 = arith.constant 0.000000e+00 : f32
    %18 = vector.broadcast %cst_10 : f32 to vector<1x128xf32>
    %19 = arith.maximumf %17, %18 : vector<1x128xf32>
    %20 = vector.broadcast %10 : vector<1x128xf32> to vector<16x128xf32>
    %21 = arith.subf %6, %20 : vector<16x128xf32>
    %cst_11 = arith.constant 9.99999974E-6 : f32
    %22 = vector.broadcast %cst_11 : f32 to vector<1x128xf32>
    %23 = arith.addf %19, %22 : vector<1x128xf32>
    %24 = math.rsqrt %23 : vector<1x128xf32>
    %25 = vector.broadcast %24 : vector<1x128xf32> to vector<16x128xf32>
    %26 = arith.mulf %21, %25 : vector<16x128xf32>
    %c0_12 = arith.constant 0 : index
    %c0_13 = arith.constant 0 : index
    %c0_14 = arith.constant 0 : index
    %27 = vector.load %arg5[%c0_12, %c0_13, %c0_14] : memref<1x16x128xf32, #tpu.memory_space<vmem>>, vector<1x16x128xf32>
    %28 = vector.shape_cast %27 : vector<1x16x128xf32> to vector<16x128xf32>
    %29 = arith.addf %26, %28 : vector<16x128xf32>
    %c0_15 = arith.constant 0 : index
    %c0_16 = arith.constant 0 : index
    %c0_17 = arith.constant 0 : index
    %30 = vector.load %arg6[%c0_15, %c0_16, %c0_17] : memref<1x16x128xf32, #tpu.memory_space<vmem>>, vector<1x16x128xf32>
    %31 = vector.shape_cast %30 : vector<1x16x128xf32> to vector<16x128xf32>
    %32 = vector.shape_cast %29 : vector<16x128xf32> to vector<1x16x128xf32>
    tpu.vector_store %arg6[%c0_15, %c0_16, %c0_17], %32 {strides = array<i32>} : memref<1x16x128xf32, #tpu.memory_space<vmem>>, vector<1x16x128xf32>,
    return
  }
  func.func @transform_0(%arg0: i32, %arg1: i32) -> (i32, i32, i32) {
    %c0_i32 = arith.constant 0 : i32
    %c0_i32_0 = arith.constant 0 : i32
    %c0_i32_1 = arith.constant 0 : i32
    return %arg0, %c0_i32, %c0_i32_0 : i32, i32, i32
  }
  func.func @transform_1(%arg0: i32, %arg1: i32) -> (i32, i32) {
    %c0_i32 = arith.constant 0 : i32
    %c0_i32_0 = arith.constant 0 : i32
    return %c0_i32, %arg1 : i32, i32
  }
  func.func @transform_2(%arg0: i32, %arg1: i32) -> (i32, i32) {
    %c0_i32 = arith.constant 0 : i32
    %c0_i32_0 = arith.constant 0 : i32
    return %c0_i32, %arg1 : i32, i32
  }
  func.func @transform_3(%arg0: i32, %arg1: i32) -> (i32, i32, i32) {
    %c0_i32 = arith.constant 0 : i32
    %c0_i32_0 = arith.constant 0 : i32
    return %arg0, %c0_i32, %arg1 : i32, i32, i32
  }
  func.func @transform_4(%arg0: i32, %arg1: i32) -> (i32, i32, i32) {
    %c0_i32 = arith.constant 0 : i32
    %c0_i32_0 = arith.constant 0 : i32
    return %arg0, %c0_i32, %arg1 : i32, i32, i32
  }
}

module attributes {stable_mosaic.version = 11 : i64} {
  func.func @_mm_single_kernel(%arg0: i32, %arg1: i32, %arg2: memref<32x128xbf16, #tpu.memory_space<vmem>>, %arg3: memref<128x128xbf16, #tpu.memory_space<vmem>>, %arg4: memref<1x128xf32, #tpu.memory_space<vmem>>, %arg5: memref<32x128xf32, #tpu.memory_space<vmem>>) attributes {dimension_semantics = [#tpu.dimension_semantics<parallel>, #tpu.dimension_semantics<parallel>], iteration_bounds = array<i64: 1, 9>, scalar_prefetch = 0 : i64, scratch_operands = 0 : i64, tpu.core_type = #tpu.core_type<tc>, window_params = [{transform_indices = @transform_0, window_bounds = array<i64: 32, 128>}, {transform_indices = @transform_1, window_bounds = array<i64: 128, 128>}, {transform_indices = @transform_2, window_bounds = array<i64: 1, 128>}, {transform_indices = @transform_3, window_bounds = array<i64: 32, 128>}]} {
    %c0 = arith.constant 0 : index
    %c0_0 = arith.constant 0 : index
    %0 = vector.load %arg2[%c0, %c0_0] : memref<32x128xbf16, #tpu.memory_space<vmem>>, vector<32x128xbf16>
    %c0_1 = arith.constant 0 : index
    %c0_2 = arith.constant 0 : index
    %1 = vector.load %arg3[%c0_1, %c0_2] : memref<128x128xbf16, #tpu.memory_space<vmem>>, vector<128x128xbf16>
    %cst = arith.constant dense<0.000000e+00> : vector<32x128xf32>
    %2 = tpu.matmul %0, %1, %cst {dimension_numbers = #tpu.dot_dimension_numbers<[1], [0], [0], [1], [0, 0, 1, 1], [], []>} : vector<32x128xbf16>, vector<128x128xbf16>, vector<32x128xf32> -> vector<32x128xf32>
    %c0_3 = arith.constant 0 : index
    %c0_4 = arith.constant 0 : index
    %3 = vector.load %arg4[%c0_3, %c0_4] : memref<1x128xf32, #tpu.memory_space<vmem>>, vector<1x128xf32>
    %4 = vector.broadcast %3 : vector<1x128xf32> to vector<32x128xf32>
    %5 = arith.addf %2, %4 : vector<32x128xf32>
    %c0_5 = arith.constant 0 : index
    %c0_6 = arith.constant 0 : index
    %6 = vector.load %arg5[%c0_5, %c0_6] : memref<32x128xf32, #tpu.memory_space<vmem>>, vector<32x128xf32>
    tpu.vector_store %arg5[%c0_5, %c0_6], %5 {strides = array<i32>} : memref<32x128xf32, #tpu.memory_space<vmem>>, vector<32x128xf32>,
    return
  }
  func.func @transform_0(%arg0: i32, %arg1: i32) -> (i32, i32) {
    %c0_i32 = arith.constant 0 : i32
    %c0_i32_0 = arith.constant 0 : i32
    return %arg0, %c0_i32 : i32, i32
  }
  func.func @transform_1(%arg0: i32, %arg1: i32) -> (i32, i32) {
    %c0_i32 = arith.constant 0 : i32
    %c0_i32_0 = arith.constant 0 : i32
    return %c0_i32, %arg1 : i32, i32
  }
  func.func @transform_2(%arg0: i32, %arg1: i32) -> (i32, i32) {
    %c0_i32 = arith.constant 0 : i32
    %c0_i32_0 = arith.constant 0 : i32
    return %c0_i32, %arg1 : i32, i32
  }
  func.func @transform_3(%arg0: i32, %arg1: i32) -> (i32, i32) {
    %c0_i32 = arith.constant 0 : i32
    return %arg0, %arg1 : i32, i32
  }
}

module attributes {stable_mosaic.version = 11 : i64} {
  func.func @_instnorm_kernel(%arg0: i32, %arg1: memref<1x64x128xf32, #tpu.memory_space<vmem>>, %arg2: memref<1x64x128xf32, #tpu.memory_space<vmem>>) attributes {dimension_semantics = [#tpu.dimension_semantics<parallel>], iteration_bounds = array<i64: 2>, scalar_prefetch = 0 : i64, scratch_operands = 0 : i64, tpu.core_type = #tpu.core_type<tc>, window_params = [{transform_indices = @transform_0, window_bounds = array<i64: 1, 64, 128>}, {transform_indices = @transform_1, window_bounds = array<i64: 1, 64, 128>}]} {
    %c0 = arith.constant 0 : index
    %c0_0 = arith.constant 0 : index
    %c0_1 = arith.constant 0 : index
    %0 = vector.load %arg1[%c0, %c0_0, %c0_1] : memref<1x64x128xf32, #tpu.memory_space<vmem>>, vector<1x64x128xf32>
    %1 = vector.shape_cast %0 : vector<1x64x128xf32> to vector<64x128xf32>
    %cst = arith.constant dense<0.000000e+00> : vector<128xf32>
    %2 = vector.multi_reduction <add>, %1, %cst [0] : vector<64x128xf32> to vector<128xf32>
    %3 = vector.shape_cast %2 : vector<128xf32> to vector<1x128xf32>
    %cst_2 = arith.constant 6.400000e+01 : f32
    %4 = vector.broadcast %cst_2 : f32 to vector<1x128xf32>
    %5 = arith.divf %3, %4 : vector<1x128xf32>
    %6 = arith.mulf %1, %1 : vector<64x128xf32>
    %cst_3 = arith.constant dense<0.000000e+00> : vector<128xf32>
    %7 = vector.multi_reduction <add>, %6, %cst_3 [0] : vector<64x128xf32> to vector<128xf32>
    %8 = vector.shape_cast %7 : vector<128xf32> to vector<1x128xf32>
    %cst_4 = arith.constant 6.400000e+01 : f32
    %9 = vector.broadcast %cst_4 : f32 to vector<1x128xf32>
    %10 = arith.divf %8, %9 : vector<1x128xf32>
    %11 = arith.mulf %5, %5 : vector<1x128xf32>
    %12 = arith.subf %10, %11 : vector<1x128xf32>
    %cst_5 = arith.constant 0.000000e+00 : f32
    %13 = vector.broadcast %cst_5 : f32 to vector<1x128xf32>
    %14 = arith.maximumf %12, %13 : vector<1x128xf32>
    %15 = vector.broadcast %5 : vector<1x128xf32> to vector<64x128xf32>
    %16 = arith.subf %1, %15 : vector<64x128xf32>
    %cst_6 = arith.constant 9.99999974E-6 : f32
    %17 = vector.broadcast %cst_6 : f32 to vector<1x128xf32>
    %18 = arith.addf %14, %17 : vector<1x128xf32>
    %19 = math.rsqrt %18 : vector<1x128xf32>
    %20 = vector.broadcast %19 : vector<1x128xf32> to vector<64x128xf32>
    %21 = arith.mulf %16, %20 : vector<64x128xf32>
    %cst_7 = arith.constant 0.000000e+00 : f32
    %22 = vector.broadcast %cst_7 : f32 to vector<64x128xf32>
    %23 = arith.maximumf %21, %22 : vector<64x128xf32>
    %c0_8 = arith.constant 0 : index
    %c0_9 = arith.constant 0 : index
    %c0_10 = arith.constant 0 : index
    %24 = vector.load %arg2[%c0_8, %c0_9, %c0_10] : memref<1x64x128xf32, #tpu.memory_space<vmem>>, vector<1x64x128xf32>
    %25 = vector.shape_cast %24 : vector<1x64x128xf32> to vector<64x128xf32>
    %26 = vector.shape_cast %23 : vector<64x128xf32> to vector<1x64x128xf32>
    tpu.vector_store %arg2[%c0_8, %c0_9, %c0_10], %26 {strides = array<i32>} : memref<1x64x128xf32, #tpu.memory_space<vmem>>, vector<1x64x128xf32>,
    return
  }
  func.func @transform_0(%arg0: i32) -> (i32, i32, i32) {
    %c0_i32 = arith.constant 0 : i32
    %c0_i32_0 = arith.constant 0 : i32
    %c0_i32_1 = arith.constant 0 : i32
    return %arg0, %c0_i32, %c0_i32_0 : i32, i32, i32
  }
  func.func @transform_1(%arg0: i32) -> (i32, i32, i32) {
    %c0_i32 = arith.constant 0 : i32
    %c0_i32_0 = arith.constant 0 : i32
    %c0_i32_1 = arith.constant 0 : i32
    return %arg0, %c0_i32, %c0_i32_0 : i32, i32, i32
  }
}

module attributes {stable_mosaic.version = 11 : i64} {
  func.func @_mm_single_kernel(%arg0: i32, %arg1: i32, %arg2: memref<64x128xbf16, #tpu.memory_space<vmem>>, %arg3: memref<128x128xbf16, #tpu.memory_space<vmem>>, %arg4: memref<1x128xf32, #tpu.memory_space<vmem>>, %arg5: memref<64x128xf32, #tpu.memory_space<vmem>>) attributes {dimension_semantics = [#tpu.dimension_semantics<parallel>, #tpu.dimension_semantics<parallel>], iteration_bounds = array<i64: 2, 1>, scalar_prefetch = 0 : i64, scratch_operands = 0 : i64, tpu.core_type = #tpu.core_type<tc>, window_params = [{transform_indices = @transform_0, window_bounds = array<i64: 64, 128>}, {transform_indices = @transform_1, window_bounds = array<i64: 128, 128>}, {transform_indices = @transform_2, window_bounds = array<i64: 1, 128>}, {transform_indices = @transform_3, window_bounds = array<i64: 64, 128>}]} {
    %c0 = arith.constant 0 : index
    %c0_0 = arith.constant 0 : index
    %0 = vector.load %arg2[%c0, %c0_0] : memref<64x128xbf16, #tpu.memory_space<vmem>>, vector<64x128xbf16>
    %c0_1 = arith.constant 0 : index
    %c0_2 = arith.constant 0 : index
    %1 = vector.load %arg3[%c0_1, %c0_2] : memref<128x128xbf16, #tpu.memory_space<vmem>>, vector<128x128xbf16>
    %cst = arith.constant dense<0.000000e+00> : vector<64x128xf32>
    %2 = tpu.matmul %0, %1, %cst {dimension_numbers = #tpu.dot_dimension_numbers<[1], [0], [0], [1], [0, 0, 1, 1], [], []>} : vector<64x128xbf16>, vector<128x128xbf16>, vector<64x128xf32> -> vector<64x128xf32>
    %c0_3 = arith.constant 0 : index
    %c0_4 = arith.constant 0 : index
    %3 = vector.load %arg4[%c0_3, %c0_4] : memref<1x128xf32, #tpu.memory_space<vmem>>, vector<1x128xf32>
    %4 = vector.broadcast %3 : vector<1x128xf32> to vector<64x128xf32>
    %5 = arith.addf %2, %4 : vector<64x128xf32>
    %c0_5 = arith.constant 0 : index
    %c0_6 = arith.constant 0 : index
    %6 = vector.load %arg5[%c0_5, %c0_6] : memref<64x128xf32, #tpu.memory_space<vmem>>, vector<64x128xf32>
    tpu.vector_store %arg5[%c0_5, %c0_6], %5 {strides = array<i32>} : memref<64x128xf32, #tpu.memory_space<vmem>>, vector<64x128xf32>,
    return
  }
  func.func @transform_0(%arg0: i32, %arg1: i32) -> (i32, i32) {
    %c0_i32 = arith.constant 0 : i32
    %c0_i32_0 = arith.constant 0 : i32
    return %arg0, %c0_i32 : i32, i32
  }
  func.func @transform_1(%arg0: i32, %arg1: i32) -> (i32, i32) {
    %c0_i32 = arith.constant 0 : i32
    %c0_i32_0 = arith.constant 0 : i32
    return %c0_i32, %arg1 : i32, i32
  }
  func.func @transform_2(%arg0: i32, %arg1: i32) -> (i32, i32) {
    %c0_i32 = arith.constant 0 : i32
    %c0_i32_0 = arith.constant 0 : i32
    return %c0_i32, %arg1 : i32, i32
  }
  func.func @transform_3(%arg0: i32, %arg1: i32) -> (i32, i32) {
    %c0_i32 = arith.constant 0 : i32
    return %arg0, %arg1 : i32, i32
  }
}

module attributes {stable_mosaic.version = 11 : i64} {
  func.func @_mm_single_kernel(%arg0: i32, %arg1: i32, %arg2: memref<256x256xbf16, #tpu.memory_space<vmem>>, %arg3: memref<256x128xbf16, #tpu.memory_space<vmem>>, %arg4: memref<1x128xf32, #tpu.memory_space<vmem>>, %arg5: memref<256x128xf32, #tpu.memory_space<vmem>>, %arg6: memref<256x128xf32, #tpu.memory_space<vmem>>) attributes {dimension_semantics = [#tpu.dimension_semantics<parallel>, #tpu.dimension_semantics<parallel>], iteration_bounds = array<i64: 2, 1>, scalar_prefetch = 0 : i64, scratch_operands = 0 : i64, tpu.core_type = #tpu.core_type<tc>, window_params = [{transform_indices = @transform_0, window_bounds = array<i64: 256, 256>}, {transform_indices = @transform_1, window_bounds = array<i64: 256, 128>}, {transform_indices = @transform_2, window_bounds = array<i64: 1, 128>}, {transform_indices = @transform_3, window_bounds = array<i64: 256, 128>}, {transform_indices = @transform_4, window_bounds = array<i64: 256, 128>}]} {
    %c0 = arith.constant 0 : index
    %c0_0 = arith.constant 0 : index
    %0 = vector.load %arg2[%c0, %c0_0] : memref<256x256xbf16, #tpu.memory_space<vmem>>, vector<256x256xbf16>
    %c0_1 = arith.constant 0 : index
    %c0_2 = arith.constant 0 : index
    %1 = vector.load %arg3[%c0_1, %c0_2] : memref<256x128xbf16, #tpu.memory_space<vmem>>, vector<256x128xbf16>
    %cst = arith.constant dense<0.000000e+00> : vector<256x128xf32>
    %2 = tpu.matmul %0, %1, %cst {dimension_numbers = #tpu.dot_dimension_numbers<[1], [0], [0], [1], [0, 0, 1, 1], [], []>} : vector<256x256xbf16>, vector<256x128xbf16>, vector<256x128xf32> -> vector<256x128xf32>
    %c0_3 = arith.constant 0 : index
    %c0_4 = arith.constant 0 : index
    %3 = vector.load %arg4[%c0_3, %c0_4] : memref<1x128xf32, #tpu.memory_space<vmem>>, vector<1x128xf32>
    %4 = vector.broadcast %3 : vector<1x128xf32> to vector<256x128xf32>
    %5 = arith.addf %2, %4 : vector<256x128xf32>
    %6 = math.tanh %5 : vector<256x128xf32>
    %cst_5 = arith.constant 2.000000e+00 : f32
    %7 = vector.broadcast %cst_5 : f32 to vector<256x128xf32>
    %8 = arith.mulf %7, %6 : vector<256x128xf32>
    %c0_6 = arith.constant 0 : index
    %c0_7 = arith.constant 0 : index
    %9 = vector.load %arg5[%c0_6, %c0_7] : memref<256x128xf32, #tpu.memory_space<vmem>>, vector<256x128xf32>
    %10 = arith.addf %8, %9 : vector<256x128xf32>
    %cst_8 = arith.constant -1.000000e+00 : f32
    %cst_9 = arith.constant 1.000000e+00 : f32
    %11 = vector.broadcast %cst_8 : f32 to vector<256x128xf32>
    %12 = arith.maximumf %11, %10 : vector<256x128xf32>
    %13 = vector.broadcast %cst_9 : f32 to vector<256x128xf32>
    %14 = arith.minimumf %13, %12 : vector<256x128xf32>
    %c0_10 = arith.constant 0 : index
    %c0_11 = arith.constant 0 : index
    %15 = vector.load %arg6[%c0_10, %c0_11] : memref<256x128xf32, #tpu.memory_space<vmem>>, vector<256x128xf32>
    tpu.vector_store %arg6[%c0_10, %c0_11], %14 {strides = array<i32>} : memref<256x128xf32, #tpu.memory_space<vmem>>, vector<256x128xf32>,
    return
  }
  func.func @transform_0(%arg0: i32, %arg1: i32) -> (i32, i32) {
    %c0_i32 = arith.constant 0 : i32
    %c0_i32_0 = arith.constant 0 : i32
    return %arg0, %c0_i32 : i32, i32
  }
  func.func @transform_1(%arg0: i32, %arg1: i32) -> (i32, i32) {
    %c0_i32 = arith.constant 0 : i32
    %c0_i32_0 = arith.constant 0 : i32
    return %c0_i32, %arg1 : i32, i32
  }
  func.func @transform_2(%arg0: i32, %arg1: i32) -> (i32, i32) {
    %c0_i32 = arith.constant 0 : i32
    %c0_i32_0 = arith.constant 0 : i32
    return %c0_i32, %arg1 : i32, i32
  }
  func.func @transform_3(%arg0: i32, %arg1: i32) -> (i32, i32) {
    %c0_i32 = arith.constant 0 : i32
    return %arg0, %arg1 : i32, i32
  }
  func.func @transform_4(%arg0: i32, %arg1: i32) -> (i32, i32) {
    %c0_i32 = arith.constant 0 : i32
    return %arg0, %arg1 : i32, i32
  }
}

</mosaic_0001>

<bundles_post_ra>
// kernel: _lambda_.8
= control target key start
LH: loop header
LB: loop body
LE: loop exit
PB: predicated region body
PF: predicated region fallthrough
CT: control target
= control target key end

     0   :  { %s880_s12 = smov 0   ;;  %s882_s13 = smov 0   ;;  %s1041_s0 = inlined_call_operand.vmem [shape: bf16[2,64,256], index: 0, kind: input, shape index: {}]   ;;  %s1042_s1 = inlined_call_operand.vmem [shape: bf16[256,128], index: 1, kind: input, shape index: {}]   ;;  %s1043_s2 = inlined_call_operand.vmem [shape: f32[1,128], index: 2, kind: input, shape index: {}]   ;;  %s1044_s3 = inlined_call_operand.vmem [shape: f32[2,64,128], index: 3, kind: output, shape index: {}]  }
   0x1   :  { %s884_s14 = smov 0  }
   0x2 LB: > { %s25_s15 = sadd.s32 1, %s853_s13  ;;  %p660_p0 = scmp.ge.s32.totalorder %s857_s14, 1  ;;  %s857_s14 = sphi %s884_s14, %s13_s14   ;;  %s853_s13 = sphi %s882_s13, %s1046_s13   ;;  %s849_s12 = sphi %s880_s12, %s1045_s12  }
   0x3   : > { %p27_p1 = scmp.ge.s32.totalorder %s25_s15, 2  ;;  %p168_p2 = scmp.lt.s32.totalorder %s857_s14, 3 }
   0x5   : > { %s1048_s15 = smov (%p27_p1, %s25_s15), 0  ;;  %p169_p3 = pnand %p660_p0, %p168_p2 }
   0x6   : > { %p202_p4 = scmp.lt.s32.totalorder (!%p169_p3), %s849_s12, 1 }
   0x7   : > { %172 = sbr.rel (%p169_p3) target bundleno = 260 (0x104), region = 32 }
   0xc   : > { %v780_v0 = vld [vmem:[%s1042_s1 + $0x38] sm:$0xff]  ;;  %v779_v2 = vld [vmem:[%s1042_s1 + $0x30] sm:$0xff]  ;;  %v778_v4 = vld [vmem:[%s1042_s1 + $0x28] sm:$0xff]  ;;  %s1050_s12 = smov (!%p202_p4, %s849_s12), 1  ;;  %v859_v61 = vmov 64.0  }
   0xd   : > { %v788_v1 = vld [vmem:[%s1042_s1 + $0x78] sm:$0xff]  ;;  %402 = vmatpush.bf16.msra.mxu0 %v780_v0  ;;  %789 = vmatpush.bf16.msra.mxu2 %v780_v0  ;;  %v787_v3 = vld [vmem:[%s1042_s1 + $0x70] sm:$0xff]  ;;  %v786_v5 = vld [vmem:[%s1042_s1 + $0x68] sm:$0xff]  ;;  %s763_s17 = sshll.u32 %s1050_s12, 6  ;;  %831 = vrcp.f32 %v859_v61 }
   0xe   : > { %431 = vmatpush.bf16.msra.mxu1 %v788_v1  ;;  %797 = vmatpush.bf16.msra.mxu3 %v788_v1  ;;  %v777_v6 = vld [vmem:[%s1042_s1 + $0x20] sm:$0xff]  ;;  %v776_v8 = vld [vmem:[%s1042_s1 + $0x18] sm:$0xff]  ;;  %v775_v10 = vld [vmem:[%s1042_s1 + $0x10] sm:$0xff]  ;;  %s949_s22 = scalar_lea.vmem %s1041_s0, %s763_s17  ;;  %s221_s6 = scalar_lea.vmem %s1044_s3, %s763_s17 }
   0xf   : > { %v785_v7 = vld [vmem:[%s1042_s1 + $0x60] sm:$0xff]  ;;  %v784_v9 = vld [vmem:[%s1042_s1 + $0x58] sm:$0xff]  ;;  %v783_v11 = vld [vmem:[%s1042_s1 + $0x50] sm:$0xff] }
  0x10   : > { %v774_v12 = vld [vmem:[%s1042_s1 + $0x8] sm:$0xff]  ;;  %v773_v14 = vld [vmem:[%s1042_s1] sm:$0xff]  ;;  %v675_v28 = vld [vmem:[%s949_s22 + $0x10] sm:$0xf] }
  0x11   : > { %403 = vmatpush.bf16.msra.mxu0 %v779_v2  ;;  %790 = vmatpush.bf16.msra.mxu2 %v779_v2  ;;  %v782_v13 = vld [vmem:[%s1042_s1 + $0x48] sm:$0xff]  ;;  %v781_v15 = vld [vmem:[%s1042_s1 + $0x40] sm:$0xff]  ;;  %v768_v29 = vld [vmem:[%s949_s22 + $0x14] sm:$0xf0] }
  0x12   : > { %432 = vmatpush.bf16.msra.mxu1 %v787_v3  ;;  %798 = vmatpush.bf16.msra.mxu3 %v787_v3  ;;  %v667_v16 = vld [vmem:[%s949_s22] sm:$0xf]  ;;  %v766_v17 = vld [vmem:[%s949_s22 + $0x4] sm:$0xf0]  ;;  %v765_v20 = vld [vmem:[%s949_s22 + $0x4] sm:$0xf]  ;;  %v676_v36 = vor.u32 %v768_v29, %v675_v28 }
  0x13   : > { %v683_v18 = vld [vmem:[%s949_s22 + $0x20] sm:$0xf]  ;;  %v770_v19 = vld [vmem:[%s949_s22 + $0x24] sm:$0xf0]  ;;  %v669_v21 = vld [vmem:[%s949_s22 + $0x8] sm:$0xf0]  ;;  %v668_v24 = vor.u32 %v766_v17, %v667_v16 }
  0x14   : > { %v769_v22 = vld [vmem:[%s949_s22 + $0x24] sm:$0xf]  ;;  %v685_v23 = vld [vmem:[%s949_s22 + $0x28] sm:$0xf0]  ;;  %v684_v25 = vor.u32 %v770_v19, %v683_v18  ;;  %v672_v26 = vor.u32 %v765_v20, %v669_v21  ;;  %v691_v30 = vld [vmem:[%s949_s22 + $0x30] sm:$0xf] }
  0x15   : > { %404 = vmatpush.bf16.msra.mxu0 %v778_v4  ;;  %791 = vmatpush.bf16.msra.mxu2 %v778_v4  ;;  %v688_v27 = vor.u32 %v769_v22, %v685_v23  ;;  %v772_v31 = vld [vmem:[%s949_s22 + $0x34] sm:$0xf0]  ;;  %v767_v32 = vld [vmem:[%s949_s22 + $0x14] sm:$0xf]  ;;  %v677_v33 = vld [vmem:[%s949_s22 + $0x18] sm:$0xf0] }
  0x16   : > { %433 = vmatpush.bf16.msra.mxu1 %v786_v5  ;;  %799 = vmatpush.bf16.msra.mxu3 %v786_v5  ;;  %v771_v34 = vld [vmem:[%s949_s22 + $0x34] sm:$0xf]  ;;  %v693_v35 = vld [vmem:[%s949_s22 + $0x38] sm:$0xf0]  ;;  %v692_v37 = vor.u32 %v772_v31, %v691_v30  ;;  %v680_v38 = vor.u32 %v767_v32, %v677_v33  ;;  %v830_v46 = vld [vmem:[%s1043_s2] ss:$0 sm:$0xff] }
  0x17   : > { %v696_v39 = vor.u32 %v771_v34, %v693_v35 }
  0x19   : > { %405 = vmatpush.bf16.msra.mxu0 %v777_v6  ;;  %792 = vmatpush.bf16.msra.mxu2 %v777_v6 }
  0x1a   : > { %434 = vmatpush.bf16.msra.mxu1 %v785_v7  ;;  %800 = vmatpush.bf16.msra.mxu3 %v785_v7 }
  0x1d   : > { %406 = vmatpush.bf16.msra.mxu0 %v776_v8  ;;  %793 = vmatpush.bf16.msra.mxu2 %v776_v8 }
  0x1e   : > { %435 = vmatpush.bf16.msra.mxu1 %v784_v9  ;;  %801 = vmatpush.bf16.msra.mxu3 %v784_v9 }
  0x21   : > { %407 = vmatpush.bf16.msra.mxu0 %v775_v10  ;;  %794 = vmatpush.bf16.msra.mxu2 %v775_v10  ;;  %v832_v10 = vpop.eup %831 }
  0x22   : > { %436 = vmatpush.bf16.msra.mxu1 %v783_v11  ;;  %802 = vmatpush.bf16.msra.mxu3 %v783_v11  ;;  %v474_v22 = vmul.f32 64.0, %v832_v10  ;;  %vm478_vm0 = vweird.f32 %v832_v10 }
  0x24   : > { %v475_v30 = vsub.f32 1.0, %v474_v22 }
  0x25   : > { %408 = vmatpush.bf16.msra.mxu0 %v774_v12  ;;  %795 = vmatpush.bf16.msra.mxu2 %v774_v12 }
  0x26   : > { %437 = vmatpush.bf16.msra.mxu1 %v782_v13  ;;  %803 = vmatpush.bf16.msra.mxu3 %v782_v13 }
  0x29   : > { %409 = vmatpush.bf16.msra.mxu0 %v773_v14  ;;  %796 = vmatpush.bf16.msra.mxu2 %v773_v14 }
  0x2a   : > { %438 = vmatpush.bf16.msra.mxu1 %v781_v15  ;;  %804 = vmatpush.bf16.msra.mxu3 %v781_v15 }
  0x2c   : > { %410 = vmatmul.bf16.vlgmr.msra.gmra.mxu0 %v668_v24  ;;  %420 = vmatmul.bf16.vlgmr.msra.gmra.mxu2 %v684_v25 }
  0x2d   : > { %439 = vmatmul.bf16.vlgmr.msra.gmra.mxu1 %v672_v26  ;;  %449 = vmatmul.bf16.vlgmr.msra.gmra.mxu3 %v688_v27 }
  0x3c   : > { %415 = vmatmul.bf16.gmra.mxu0 %v676_v36  ;;  %425 = vmatmul.bf16.gmra.mxu2 %v692_v37  ;;  %v476_v36 = vmul.f32 %v832_v10, %v475_v30 }
  0x3d   : > { %444 = vmatmul.bf16.gmra.mxu1 %v680_v38  ;;  %454 = vmatmul.bf16.gmra.mxu3 %v696_v39 }
  0xa9   : > { %v411_v40 = vpop.f32.mrf.mxu0 }
  0xaa   : > { %v440_v41 = vpop.f32.mrf.mxu1  ;;  %v412_v50 = vadd.f32 %v830_v46, %v411_v40 }
  0xac   : > { %v981_v55 = vadd.f32 %v440_v41, %v412_v50  ;;  %v477_v41 = vadd.f32 %v832_v10, %v476_v36 }
  0xae   : > { %v481_v62 = vmul.f32 %v981_v55, %v981_v55 }
  0xaf   : > { %v421_v42 = vpop.f32.mrf.mxu2 }
  0xb0   : > { %v450_v43 = vpop.f32.mrf.mxu3  ;;  %v422_v57 = vadd.f32 %v830_v46, %v421_v42 }
  0xb1   : > { %v413_v44 = vpop.f32.mrf.mxu0 }
  0xb2   : > { %v442_v45 = vpop.f32.mrf.mxu1  ;;  %v414_v48 = vadd.f32 %v830_v46, %v413_v44  ;;  %v993_v4 = vadd.f32 %v450_v43, %v422_v57 }
  0xb4   : > { %v979_v54 = vadd.f32 %v442_v45, %v414_v48  ;;  %v485_v15 = vmul.f32 %v993_v4, %v993_v4 }
  0xb6   : > { %v482_v59 = vmul.f32 %v979_v54, %v979_v54  ;;  %v460_v0 = vadd.f32 %v979_v54, %v981_v55 }
  0xb7   : > { %v423_v47 = vpop.f32.mrf.mxu2 }
  0xb8   : > { %v452_v49 = vpop.f32.mrf.mxu3  ;;  %v424_v1 = vadd.f32 %v830_v46, %v423_v47  ;;  %v489_v6 = vadd.f32 %v482_v59, %v481_v62 }
  0xb9   : > { %v416_v51 = vpop.f32.mrf.mxu0 }
  0xba   : > { %v417_v52 = vadd.f32 %v830_v46, %v416_v51  ;;  %v445_v53 = vpop.f32.mrf.mxu1  ;;  %v998_v11 = vadd.f32 %v452_v49, %v424_v1 }
  0xbc   : > { %v983_v56 = vadd.f32 %v445_v53, %v417_v52  ;;  %v486_v23 = vmul.f32 %v998_v11, %v998_v11 }
  0xbe   : > { %v483_v2 = vmul.f32 %v983_v56, %v983_v56  ;;  %v461_v7 = vadd.f32 %v460_v0, %v983_v56 }
  0xbf   : > { %v426_v58 = vpop.f32.mrf.mxu2 }
  0xc0   : > { %v455_v60 = vpop.f32.mrf.mxu3  ;;  %v427_v8 = vadd.f32 %v830_v46, %v426_v58  ;;  %v490_v12 = vadd.f32 %v489_v6, %v483_v2 }
  0xc1   : > { %v418_v63 = vpop.f32.mrf.mxu0 }
  0xc2   : > { %v419_v3 = vadd.f32 %v830_v46, %v418_v63  ;;  %v447_v5 = vpop.f32.mrf.mxu1  ;;  %v1005_v17 = vadd.f32 %v455_v60, %v427_v8 }
  0xc4   : > { %v996_v9 = vadd.f32 %v447_v5, %v419_v3  ;;  %v487_v27 = vmul.f32 %v1005_v17, %v1005_v17 }
  0xc6   : > { %v462_v13 = vadd.f32 %v461_v7, %v996_v9  ;;  %v484_v14 = vmul.f32 %v996_v9, %v996_v9 }
  0xc7   : > { %v428_v16 = vpop.f32.mrf.mxu2 }
  0xc8   : > { %v463_v18 = vadd.f32 %v462_v13, %v993_v4  ;;  %v491_v19 = vadd.f32 %v490_v12, %v484_v14  ;;  %v429_v20 = vadd.f32 %v830_v46, %v428_v16  ;;  %v457_v21 = vpop.f32.mrf.mxu3  ;;  %v479_v46 = vsel %vm478_vm0, %v832_v10, %v477_v41 }
  0xca   : > { %v492_v24 = vadd.f32 %v491_v19, %v485_v15  ;;  %v1010_v25 = vadd.f32 %v457_v21, %v429_v20  ;;  %v464_v26 = vadd.f32 %v463_v18, %v998_v11 }
  0xcc   : > { %v465_v28 = vadd.f32 %v464_v26, %v1005_v17  ;;  %v493_v29 = vadd.f32 %v492_v24, %v486_v23  ;;  %v488_v32 = vmul.f32 %v1010_v25, %v1010_v25 }
  0xce   : > { %v466_v31 = vadd.f32 %v465_v28, %v1010_v25  ;;  %v494_v33 = vadd.f32 %v493_v29, %v487_v27 }
  0xd0   : > { %v467_v34 = vrot.slane %v466_v31, 4  ;;  %v495_v35 = vadd.f32 %v494_v33, %v488_v32 }
  0xd2   : > { %v468_v37 = vadd.f32 %v467_v34, %v466_v31  ;;  %v496_v38 = vrot.slane %v495_v35, 4 }
  0xd4   : > { %v469_v39 = vrot.slane %v468_v37, 2  ;;  %v497_v40 = vadd.f32 %v496_v38, %v495_v35 }
  0xd6   : > { %v470_v42 = vadd.f32 %v469_v39, %v468_v37  ;;  %v498_v43 = vrot.slane %v497_v40, 2 }
  0xd8   : > { %v471_v44 = vrot.slane %v470_v42, 1  ;;  %v499_v45 = vadd.f32 %v498_v43, %v497_v40 }
  0xda   : > { %v472_v47 = vadd.f32 %v471_v44, %v470_v42  ;;  %v500_v48 = vrot.slane %v499_v45, 1 }
  0xdc   : > { %v480_v49 = vmul.f32 %v479_v46, %v472_v47  ;;  %v501_v50 = vadd.f32 %v500_v48, %v499_v45 }
  0xde   : > { %v502_v51 = vmul.f32 %v501_v50, %v479_v46  ;;  %v503_v52 = vmul.f32 %v480_v49, %v480_v49  ;;  %v506_v1 = vsub.f32 %v981_v55, %v480_v49  ;;  %v507_v2 = vsub.f32 %v979_v54, %v480_v49 }
  0xdf   : > { %v508_v3 = vsub.f32 %v983_v56, %v480_v49  ;;  %v509_v5 = vsub.f32 %v996_v9, %v480_v49  ;;  %v510_v6 = vsub.f32 %v993_v4, %v480_v49  ;;  %v511_v7 = vsub.f32 %v998_v11, %v480_v49 }
  0xe0   : > { %v504_v53 = vsub.f32 %v502_v51, %v503_v52  ;;  %v512_v8 = vsub.f32 %v1005_v17, %v480_v49  ;;  %v513_v54 = vsub.f32 %v1010_v25, %v480_v49 }
  0xe2   : > { %v505_v57 = vmax.f32 %v504_v53, 0.0 }
  0xe4   : > { %v514_v58 = vadd.f32 1e-05, %v505_v57 }
  0xe6   : > { %833 = vrsqrt.f32 %v514_v58  ;;  %vm521_vm2 = vweird.f32 %v514_v58 }
  0xec   : > { %v834_v59 = vpop.eup %833 }
  0xed   : > { %v516_v60 = vmul.f32 %v834_v59, %v514_v58  ;;  %vm522_vm1 = vweird.f32 %v834_v59 }
  0xee   : > { %vm523_vm3 = vmor %vm521_vm2, %vm522_vm1 }
  0xef   : > { %v517_v61 = vmul.f32 %v834_v59, %v516_v60 }
  0xf1   : > { %v518_v62 = vmul.f32 0.5, %v517_v61 }
  0xf3   : > { %v519_v63 = vsub.f32 1.5, %v518_v62 }
  0xf5   : > { %v520_v0 = vmul.f32 %v834_v59, %v519_v63 }
  0xf7   : > { %v524_v10 = vsel %vm523_vm3, %v834_v59, %v520_v0 }
  0xf8   : > { %v525_v12 = vmul.f32 %v524_v10, %v506_v1  ;;  %v526_v13 = vmul.f32 %v524_v10, %v507_v2  ;;  %v527_v14 = vmul.f32 %v524_v10, %v508_v3  ;;  %v528_v15 = vmul.f32 %v524_v10, %v509_v5 }
  0xf9   : > { %v529_v55 = vmul.f32 %v524_v10, %v510_v6  ;;  %v530_v56 = vmul.f32 %v524_v10, %v511_v7  ;;  %v531_v9 = vmul.f32 %v524_v10, %v512_v8  ;;  %v532_v18 = vmul.f32 %v524_v10, %v513_v54 }
  0xfa   : > { %v533_v4 = vmax.f32 %v525_v12, 0.0  ;;  %v534_v16 = vmax.f32 %v526_v13, 0.0  ;;  %v535_v11 = vmax.f32 %v527_v14, 0.0  ;;  %v536_v17 = vmax.f32 %v528_v15, 0.0 }
  0xfb   : > { %v537_v19 = vmax.f32 %v529_v55, 0.0  ;;  %v538_v20 = vmax.f32 %v530_v56, 0.0  ;;  %v539_v21 = vmax.f32 %v531_v9, 0.0  ;;  %v540_v22 = vmax.f32 %v532_v18, 0.0 }
  0xfc   : > { %541 = vst [vmem:[%s221_s6] sm:$0xff] %v533_v4 }
  0xfd   : > { %542 = vst [vmem:[%s221_s6 + $0x8] sm:$0xff] %v534_v16 }
  0xfe   : > { %543 = vst [vmem:[%s221_s6 + $0x10] sm:$0xff] %v535_v11 }
  0xff   : > { %544 = vst [vmem:[%s221_s6 + $0x18] sm:$0xff] %v536_v17 }
 0x100   : > { %545 = vst [vmem:[%s221_s6 + $0x20] sm:$0xff] %v537_v19 }
 0x101   : > { %546 = vst [vmem:[%s221_s6 + $0x28] sm:$0xff] %v538_v20 }
 0x102   : > { %547 = vst [vmem:[%s221_s6 + $0x30] sm:$0xff] %v539_v21 }
 0x103   : > { %548 = vst [vmem:[%s221_s6 + $0x38] sm:$0xff] %v540_v22 }
 0x104 PF: > { %s13_s14 = sadd.s32 1, %s857_s14   ;;  %s1045_s12 = smov %s853_s13 }
 0x105   : > { %p10_p5 = scmp.ge.s32.totalorder %s13_s14, 4   ;;  %s1046_s13 = smov %s1048_s15 }
 0x107   :  { %12 = sbr.rel (!%p10_p5) target bundleno = 2 (0x2), region = 68 }

// kernel: _lambda_.9
= control target key start
LH: loop header
LB: loop body
LE: loop exit
PB: predicated region body
PF: predicated region fallthrough
CT: control target
= control target key end

     0   :  { %s856_s12 = smov 0   ;;  %s858_s13 = smov 0   ;;  %s972_s0 = inlined_call_operand.vmem [shape: bf16[2,16,384], index: 0, kind: input, shape index: {}]   ;;  %s973_s1 = inlined_call_operand.vmem [shape: bf16[384,128], index: 1, kind: input, shape index: {}]   ;;  %s974_s2 = inlined_call_operand.vmem [shape: f32[1,128], index: 2, kind: input, shape index: {}]   ;;  %s975_s3 = inlined_call_operand.vmem [shape: f32[2,16,128], index: 3, kind: output, shape index: {}]  }
   0x1   :  { %s860_s14 = smov 0  }
   0x2 LB: > { %s25_s15 = sadd.s32 1, %s829_s13  ;;  %p638_p0 = scmp.ge.s32.totalorder %s833_s14, 1  ;;  %s833_s14 = sphi %s860_s14, %s13_s14   ;;  %s829_s13 = sphi %s858_s13, %s977_s13   ;;  %s825_s12 = sphi %s856_s12, %s976_s12  }
   0x3   : > { %p27_p1 = scmp.ge.s32.totalorder %s25_s15, 2  ;;  %p168_p2 = scmp.lt.s32.totalorder %s833_s14, 3 }
   0x5   : > { %s979_s15 = smov (%p27_p1, %s25_s15), 0  ;;  %p169_p3 = pnand %p638_p0, %p168_p2 }
   0x6   : > { %p202_p4 = scmp.lt.s32.totalorder (!%p169_p3), %s825_s12, 1 }
   0x7   : > { %172 = sbr.rel (%p169_p3) target bundleno = 236 (0xec), region = 32 }
   0xc   : > { %v763_v0 = vld [vmem:[%s973_s1 + $0x38] sm:$0xff]  ;;  %v762_v3 = vld [vmem:[%s973_s1 + $0x30] sm:$0xff]  ;;  %v761_v6 = vld [vmem:[%s973_s1 + $0x28] sm:$0xff]  ;;  %s981_s12 = smov (!%p202_p4, %s825_s12), 1  ;;  %v835_v36 = vmov 16.0  }
   0xd   : > { %v771_v1 = vld [vmem:[%s973_s1 + $0x78] sm:$0xff]  ;;  %438 = vmatpush.bf16.msra.mxu0 %v763_v0  ;;  %v770_v4 = vld [vmem:[%s973_s1 + $0x70] sm:$0xff]  ;;  %v769_v7 = vld [vmem:[%s973_s1 + $0x68] sm:$0xff]  ;;  %s780_s27 = smul.u32 24, %s981_s12  ;;  %807 = vrcp.f32 %v835_v36  ;;  %s752_s24 = sshll.u32 %s981_s12, 4 }
   0xe   : > { %v779_v2 = vld [vmem:[%s973_s1 + $0xb8] sm:$0xff]  ;;  %452 = vmatpush.bf16.msra.mxu1 %v771_v1  ;;  %v778_v5 = vld [vmem:[%s973_s1 + $0xb0] sm:$0xff]  ;;  %v777_v8 = vld [vmem:[%s973_s1 + $0xa8] sm:$0xff] }
   0xf   : > { %466 = vmatpush.bf16.msra.mxu2 %v779_v2  ;;  %v760_v9 = vld [vmem:[%s973_s1 + $0x20] sm:$0xff]  ;;  %v759_v12 = vld [vmem:[%s973_s1 + $0x18] sm:$0xff]  ;;  %v758_v15 = vld [vmem:[%s973_s1 + $0x10] sm:$0xff]  ;;  %s206_s9 = scalar_lea.vmem %s972_s0, %s780_s27  ;;  %s221_s27 = scalar_lea.vmem %s975_s3, %s752_s24 }
  0x10   : > { %v768_v10 = vld [vmem:[%s973_s1 + $0x60] sm:$0xff]  ;;  %v767_v13 = vld [vmem:[%s973_s1 + $0x58] sm:$0xff]  ;;  %v766_v16 = vld [vmem:[%s973_s1 + $0x50] sm:$0xff] }
  0x11   : > { %439 = vmatpush.bf16.msra.mxu0 %v762_v3  ;;  %v776_v11 = vld [vmem:[%s973_s1 + $0xa0] sm:$0xff]  ;;  %v775_v14 = vld [vmem:[%s973_s1 + $0x98] sm:$0xff]  ;;  %v774_v17 = vld [vmem:[%s973_s1 + $0x90] sm:$0xff] }
  0x12   : > { %453 = vmatpush.bf16.msra.mxu1 %v770_v4  ;;  %v757_v18 = vld [vmem:[%s973_s1 + $0x8] sm:$0xff]  ;;  %v756_v21 = vld [vmem:[%s973_s1] sm:$0xff]  ;;  %v646_v26 = vld [vmem:[%s206_s9 + $0xc] sm:$0xf0] }
  0x13   : > { %467 = vmatpush.bf16.msra.mxu2 %v778_v5  ;;  %v765_v19 = vld [vmem:[%s973_s1 + $0x48] sm:$0xff]  ;;  %v764_v22 = vld [vmem:[%s973_s1 + $0x40] sm:$0xff]  ;;  %v755_v29 = vld [vmem:[%s206_s9 + $0x10] sm:$0xf0]  ;;  %v808_v40 = vpop.eup %807 }
  0x14   : > { %v773_v20 = vld [vmem:[%s973_s1 + $0x88] sm:$0xff]  ;;  %v644_v23 = vld [vmem:[%s206_s9] sm:$0xf]  ;;  %v753_v25 = vld [vmem:[%s206_s9 + $0x4] sm:$0xf]  ;;  %v488_v44 = vmul.f32 16.0, %v808_v40  ;;  %vm492_vm0 = vweird.f32 %v808_v40 }
  0x15   : > { %440 = vmatpush.bf16.msra.mxu0 %v761_v6  ;;  %v754_v24 = vld [vmem:[%s206_s9 + $0x8] sm:$0xf0]  ;;  %v772_v27 = vld [vmem:[%s973_s1 + $0x80] sm:$0xff]  ;;  %v652_v28 = vld [vmem:[%s206_s9 + $0x8] sm:$0xf]  ;;  %v649_v31 = vor.u32 %v753_v25, %v646_v26 }
  0x16   : > { %454 = vmatpush.bf16.msra.mxu1 %v769_v7  ;;  %v645_v30 = vor.u32 %v754_v24, %v644_v23  ;;  %v653_v32 = vor.u32 %v755_v29, %v652_v28  ;;  %v806_v34 = vld [vmem:[%s974_s2] ss:$0 sm:$0xff]  ;;  %v489_v49 = vsub.f32 1.0, %v488_v44 }
  0x17   : > { %468 = vmatpush.bf16.msra.mxu2 %v777_v8 }
  0x18   : > { %v490_v55 = vmul.f32 %v808_v40, %v489_v49 }
  0x19   : > { %441 = vmatpush.bf16.msra.mxu0 %v760_v9 }
  0x1a   : > { %455 = vmatpush.bf16.msra.mxu1 %v768_v10  ;;  %v491_v60 = vadd.f32 %v808_v40, %v490_v55 }
  0x1b   : > { %469 = vmatpush.bf16.msra.mxu2 %v776_v11 }
  0x1c   : > { %v493_v1 = vsel %vm492_vm0, %v808_v40, %v491_v60 }
  0x1d   : > { %442 = vmatpush.bf16.msra.mxu0 %v759_v12 }
  0x1e   : > { %456 = vmatpush.bf16.msra.mxu1 %v767_v13 }
  0x1f   : > { %470 = vmatpush.bf16.msra.mxu2 %v775_v14 }
  0x21   : > { %443 = vmatpush.bf16.msra.mxu0 %v758_v15 }
  0x22   : > { %457 = vmatpush.bf16.msra.mxu1 %v766_v16 }
  0x23   : > { %471 = vmatpush.bf16.msra.mxu2 %v774_v17 }
  0x25   : > { %444 = vmatpush.bf16.msra.mxu0 %v757_v18 }
  0x26   : > { %458 = vmatpush.bf16.msra.mxu1 %v765_v19 }
  0x27   : > { %472 = vmatpush.bf16.msra.mxu2 %v773_v20 }
  0x29   : > { %445 = vmatpush.bf16.msra.mxu0 %v756_v21 }
  0x2a   : > { %459 = vmatpush.bf16.msra.mxu1 %v764_v22 }
  0x2b   : > { %473 = vmatpush.bf16.msra.mxu2 %v772_v27 }
  0x2c   : > { %446 = vmatmul.bf16.vlgmr.msra.gmra.mxu0 %v645_v30 }
  0x2d   : > { %460 = vmatmul.bf16.vlgmr.msra.gmra.mxu1 %v649_v31 }
  0x2e   : > { %474 = vmatmul.bf16.vlgmr.msra.gmra.mxu2 %v653_v32 }
  0xa9   : > { %v447_v33 = vpop.f32.mrf.mxu0 }
  0xaa   : > { %v461_v35 = vpop.f32.mrf.mxu1  ;;  %v448_v37 = vadd.f32 %v806_v34, %v447_v33 }
  0xac   : > { %v462_v41 = vadd.f32 %v461_v35, %v448_v37 }
  0xb1   : > { %v475_v38 = vpop.f32.mrf.mxu2  ;;  %v449_v39 = vpop.f32.mrf.mxu0 }
  0xb2   : > { %v450_v42 = vadd.f32 %v806_v34, %v449_v39  ;;  %v463_v43 = vpop.f32.mrf.mxu1  ;;  %v476_v45 = vadd.f32 %v475_v38, %v462_v41 }
  0xb4   : > { %v464_v46 = vadd.f32 %v463_v43, %v450_v42  ;;  %v495_v50 = vmul.f32 %v476_v45, %v476_v45 }
  0xb9   : > { %v477_v47 = vpop.f32.mrf.mxu2 }
  0xba   : > { %v478_v48 = vadd.f32 %v477_v47, %v464_v46 }
  0xbc   : > { %v480_v51 = vadd.f32 %v478_v48, %v476_v45  ;;  %v496_v52 = vmul.f32 %v478_v48, %v478_v48 }
  0xbe   : > { %v481_v53 = vrot.slane %v480_v51, 4  ;;  %v497_v54 = vadd.f32 %v496_v52, %v495_v50 }
  0xc0   : > { %v482_v56 = vadd.f32 %v481_v53, %v480_v51  ;;  %v498_v57 = vrot.slane %v497_v54, 4 }
  0xc2   : > { %v483_v58 = vrot.slane %v482_v56, 2  ;;  %v499_v59 = vadd.f32 %v498_v57, %v497_v54 }
  0xc4   : > { %v484_v61 = vadd.f32 %v483_v58, %v482_v56  ;;  %v500_v62 = vrot.slane %v499_v59, 2 }
  0xc6   : > { %v485_v63 = vrot.slane %v484_v61, 1  ;;  %v501_v0 = vadd.f32 %v500_v62, %v499_v59 }
  0xc8   : > { %v486_v2 = vadd.f32 %v485_v63, %v484_v61  ;;  %v502_v3 = vrot.slane %v501_v0, 1 }
  0xca   : > { %v494_v4 = vmul.f32 %v493_v1, %v486_v2  ;;  %v503_v5 = vadd.f32 %v502_v3, %v501_v0 }
  0xcc   : > { %v504_v6 = vmul.f32 %v503_v5, %v493_v1  ;;  %v505_v7 = vmul.f32 %v494_v4, %v494_v4  ;;  %v508_v17 = vsub.f32 %v476_v45, %v494_v4  ;;  %v509_v18 = vsub.f32 %v478_v48, %v494_v4 }
  0xce   : > { %v506_v8 = vsub.f32 %v504_v6, %v505_v7 }
  0xd0   : > { %v507_v9 = vmax.f32 %v506_v8, 0.0 }
  0xd2   : > { %v510_v10 = vadd.f32 1e-05, %v507_v9 }
  0xd4   : > { %809 = vrsqrt.f32 %v510_v10  ;;  %vm517_vm2 = vweird.f32 %v510_v10 }
  0xda   : > { %v810_v11 = vpop.eup %809 }
  0xdb   : > { %v512_v12 = vmul.f32 %v810_v11, %v510_v10  ;;  %vm518_vm1 = vweird.f32 %v810_v11 }
  0xdc   : > { %vm519_vm3 = vmor %vm517_vm2, %vm518_vm1 }
  0xdd   : > { %v513_v13 = vmul.f32 %v810_v11, %v512_v12 }
  0xdf   : > { %v514_v14 = vmul.f32 0.5, %v513_v13 }
  0xe1   : > { %v515_v15 = vsub.f32 1.5, %v514_v14 }
  0xe3   : > { %v516_v16 = vmul.f32 %v810_v11, %v515_v15 }
  0xe5   : > { %v520_v19 = vsel %vm519_vm3, %v810_v11, %v516_v16 }
  0xe6   : > { %v521_v20 = vmul.f32 %v520_v19, %v508_v17  ;;  %v522_v21 = vmul.f32 %v520_v19, %v509_v18 }
  0xe8   : > { %v523_v22 = vmax.f32 %v521_v20, 0.0  ;;  %v524_v23 = vmax.f32 %v522_v21, 0.0 }
  0xea   : > { %525 = vst [vmem:[%s221_s27] sm:$0xff] %v523_v22 }
  0xeb   : > { %526 = vst [vmem:[%s221_s27 + $0x8] sm:$0xff] %v524_v23 }
  0xec PF: > { %s13_s14 = sadd.s32 1, %s833_s14   ;;  %s976_s12 = smov %s829_s13 }
  0xed   : > { %p10_p5 = scmp.ge.s32.totalorder %s13_s14, 4   ;;  %s977_s13 = smov %s979_s15 }
  0xef   :  { %12 = sbr.rel (!%p10_p5) target bundleno = 2 (0x2), region = 68 }

// kernel: _lambda_.10
= control target key start
LH: loop header
LB: loop body
LE: loop exit
PB: predicated region body
PF: predicated region fallthrough
CT: control target
= control target key end

     0   :  { %s1066_s12 = smov 0   ;;  %s1068_s13 = smov 0   ;;  %s1241_s0 = inlined_call_operand.vmem [shape: bf16[32,640], index: 0, kind: input, shape index: {}]   ;;  %s1242_s1 = inlined_call_operand.vmem [shape: bf16[640,128], index: 1, kind: input, shape index: {}]   ;;  %s1243_s2 = inlined_call_operand.vmem [shape: f32[1,128], index: 2, kind: input, shape index: {}]   ;;  %s1244_s3 = inlined_call_operand.vmem [shape: f32[32,128], index: 3, kind: output, shape index: {}]  }
   0x1   :  { %s1070_s14 = smov 0  }
   0x2 LB: > { %s25_s15 = sadd.s32 1, %s1040_s13  ;;  %p764_p0 = scmp.ge.s32.totalorder %s1044_s14, 1  ;;  %s1044_s14 = sphi %s1070_s14, %s13_s14   ;;  %s1040_s13 = sphi %s1068_s13, %s1246_s13   ;;  %s1036_s12 = sphi %s1066_s12, %s1245_s12  }
   0x3   : > { %p27_p1 = scmp.ge.s32.totalorder %s25_s15, 2  ;;  %p170_p2 = scmp.lt.s32.totalorder %s1044_s14, 3 }
   0x5   : > { %s1248_s15 = smov (%p27_p1, %s25_s15), 0  ;;  %p171_p3 = pnand %p764_p0, %p170_p2 }
   0x6   : > { %s765_s17 = sshll.u32 (!%p171_p3), %s1036_s12, 1 }
   0x7   : > { %174 = sbr.rel (%p171_p3) target bundleno = 213 (0xd5), region = 32  ;;  %p206_p4 = scmp.lt.s32.totalorder (!%p171_p3), %s765_s17, 3 }
   0xc   : > { %v963_v0 = vld [vmem:[%s1242_s1 + $0x38] sm:$0xff]  ;;  %v962_v4 = vld [vmem:[%s1242_s1 + $0x30] sm:$0xff]  ;;  %v961_v8 = vld [vmem:[%s1242_s1 + $0x28] sm:$0xff]  ;;  %s1250_s17 = smov (!%p206_p4, %s765_s17), 3 }
   0xd   : > { %v979_v1 = vld [vmem:[%s1242_s1 + $0xb8] sm:$0xff]  ;;  %584 = vmatpush.bf16.msra.mxu0 %v963_v0  ;;  %v978_v5 = vld [vmem:[%s1242_s1 + $0xb0] sm:$0xff]  ;;  %v977_v9 = vld [vmem:[%s1242_s1 + $0xa8] sm:$0xff]  ;;  %s996_s10 = smul.u32 20, %s1250_s17  ;;  %s768_s7 = sshll.u32 %s1250_s17, 3 }
   0xe   : > { %v987_v2 = vld [vmem:[%s1242_s1 + $0xf8] sm:$0xff]  ;;  %612 = vmatpush.bf16.msra.mxu2 %v979_v1  ;;  %v986_v6 = vld [vmem:[%s1242_s1 + $0xf0] sm:$0xff]  ;;  %v985_v10 = vld [vmem:[%s1242_s1 + $0xe8] sm:$0xff]  ;;  %s226_s9 = scalar_lea.vmem %s1244_s3, %s768_s7 }
   0xf   : > { %v971_v3 = vld [vmem:[%s1242_s1 + $0x78] sm:$0xff]  ;;  %626 = vmatpush.bf16.msra.mxu3 %v987_v2  ;;  %v970_v7 = vld [vmem:[%s1242_s1 + $0x70] sm:$0xff]  ;;  %v969_v11 = vld [vmem:[%s1242_s1 + $0x68] sm:$0xff]  ;;  %s1171_s12 = scalar_lea.vmem %s1241_s0, %s996_s10 }
  0x10   : > { %598 = vmatpush.bf16.msra.mxu1 %v971_v3  ;;  %v960_v12 = vld [vmem:[%s1242_s1 + $0x20] sm:$0xff]  ;;  %v959_v16 = vld [vmem:[%s1242_s1 + $0x18] sm:$0xff]  ;;  %v958_v20 = vld [vmem:[%s1242_s1 + $0x10] sm:$0xff] }
  0x11   : > { %585 = vmatpush.bf16.msra.mxu0 %v962_v4  ;;  %v976_v13 = vld [vmem:[%s1242_s1 + $0xa0] sm:$0xff]  ;;  %v975_v17 = vld [vmem:[%s1242_s1 + $0x98] sm:$0xff]  ;;  %v974_v21 = vld [vmem:[%s1242_s1 + $0x90] sm:$0xff] }
  0x12   : > { %613 = vmatpush.bf16.msra.mxu2 %v978_v5  ;;  %v984_v14 = vld [vmem:[%s1242_s1 + $0xe0] sm:$0xff]  ;;  %v983_v18 = vld [vmem:[%s1242_s1 + $0xd8] sm:$0xff]  ;;  %v982_v22 = vld [vmem:[%s1242_s1 + $0xd0] sm:$0xff] }
  0x13   : > { %627 = vmatpush.bf16.msra.mxu3 %v986_v6  ;;  %v968_v15 = vld [vmem:[%s1242_s1 + $0x60] sm:$0xff]  ;;  %v967_v19 = vld [vmem:[%s1242_s1 + $0x58] sm:$0xff]  ;;  %v966_v23 = vld [vmem:[%s1242_s1 + $0x50] sm:$0xff] }
  0x14   : > { %599 = vmatpush.bf16.msra.mxu1 %v970_v7  ;;  %v957_v24 = vld [vmem:[%s1242_s1 + $0x8] sm:$0xff]  ;;  %v956_v28 = vld [vmem:[%s1242_s1] sm:$0xff]  ;;  %v995_v29 = vld [vmem:[%s1242_s1 + $0x138] sm:$0xff] }
  0x15   : > { %586 = vmatpush.bf16.msra.mxu0 %v961_v8  ;;  %v973_v25 = vld [vmem:[%s1242_s1 + $0x88] sm:$0xff]  ;;  %v972_v30 = vld [vmem:[%s1242_s1 + $0x80] sm:$0xff]  ;;  %v954_v32 = vld [vmem:[%s1171_s12 + $0x18] sm:$0xf0] }
  0x16   : > { %614 = vmatpush.bf16.msra.mxu2 %v977_v9  ;;  %v981_v26 = vld [vmem:[%s1242_s1 + $0xc8] sm:$0xff]  ;;  %v771_v33 = vld [vmem:[%s1171_s12] sm:$0xf]  ;;  %v953_v34 = vld [vmem:[%s1171_s12 + $0x10] sm:$0xf0] }
  0x17   : > { %628 = vmatpush.bf16.msra.mxu3 %v985_v10  ;;  %v965_v27 = vld [vmem:[%s1242_s1 + $0x48] sm:$0xff]  ;;  %v980_v35 = vld [vmem:[%s1242_s1 + $0xc0] sm:$0xff]  ;;  %v773_v40 = vld [vmem:[%s1171_s12 + $0x14] sm:$0xf0]  ;;  %v772_v42 = vor.u32 %v953_v34, %v771_v33 }
  0x18   : > { %600 = vmatpush.bf16.msra.mxu1 %v969_v11  ;;  %v779_v31 = vld [vmem:[%s1171_s12 + $0x8] sm:$0xf]  ;;  %v952_v36 = vld [vmem:[%s1171_s12 + $0xc] sm:$0xf]  ;;  %v781_v37 = vld [vmem:[%s1171_s12 + $0x1c] sm:$0xf0] }
  0x19   : > { %587 = vmatpush.bf16.msra.mxu0 %v960_v12  ;;  %v964_v38 = vld [vmem:[%s1242_s1 + $0x40] sm:$0xff]  ;;  %v780_v41 = vor.u32 %v954_v32, %v779_v31  ;;  %v784_v43 = vor.u32 %v952_v36, %v781_v37  ;;  %v994_v44 = vld [vmem:[%s1242_s1 + $0x130] sm:$0xff]  ;;  %v993_v46 = vld [vmem:[%s1242_s1 + $0x128] sm:$0xff] }
  0x1a   : > { %615 = vmatpush.bf16.msra.mxu2 %v976_v13  ;;  %v951_v39 = vld [vmem:[%s1171_s12 + $0x4] sm:$0xf]  ;;  %v991_v48 = vld [vmem:[%s1242_s1 + $0x118] sm:$0xff]  ;;  %v990_v49 = vld [vmem:[%s1242_s1 + $0x110] sm:$0xff] }
  0x1b   : > { %629 = vmatpush.bf16.msra.mxu3 %v984_v14  ;;  %v776_v45 = vor.u32 %v951_v39, %v773_v40  ;;  %v992_v47 = vld [vmem:[%s1242_s1 + $0x120] sm:$0xff]  ;;  %v989_v50 = vld [vmem:[%s1242_s1 + $0x108] sm:$0xff]  ;;  %v787_v52 = vld [vmem:[%s1171_s12 + $0x10] sm:$0xf] }
  0x1c   : > { %601 = vmatpush.bf16.msra.mxu1 %v968_v15  ;;  %v988_v51 = vld [vmem:[%s1242_s1 + $0x100] sm:$0xff] }
  0x1d   : > { %588 = vmatpush.bf16.msra.mxu0 %v959_v16  ;;  %v955_v53 = vld [vmem:[%s1171_s12 + $0x20] sm:$0xf0]  ;;  %v1021_v56 = vld [vmem:[%s1243_s2] ss:$0 sm:$0xff] }
  0x1e   : > { %616 = vmatpush.bf16.msra.mxu2 %v975_v17  ;;  %v788_v54 = vor.u32 %v955_v53, %v787_v52 }
  0x1f   : > { %630 = vmatpush.bf16.msra.mxu3 %v983_v18 }
  0x20   : > { %602 = vmatpush.bf16.msra.mxu1 %v967_v19 }
  0x21   : > { %589 = vmatpush.bf16.msra.mxu0 %v958_v20 }
  0x22   : > { %617 = vmatpush.bf16.msra.mxu2 %v974_v21 }
  0x23   : > { %631 = vmatpush.bf16.msra.mxu3 %v982_v22 }
  0x24   : > { %603 = vmatpush.bf16.msra.mxu1 %v966_v23 }
  0x25   : > { %590 = vmatpush.bf16.msra.mxu0 %v957_v24 }
  0x26   : > { %618 = vmatpush.bf16.msra.mxu2 %v973_v25 }
  0x27   : > { %632 = vmatpush.bf16.msra.mxu3 %v981_v26 }
  0x28   : > { %604 = vmatpush.bf16.msra.mxu1 %v965_v27 }
  0x29   : > { %591 = vmatpush.bf16.msra.mxu0 %v956_v28 }
  0x2a   : > { %619 = vmatpush.bf16.msra.mxu2 %v972_v30 }
  0x2b   : > { %633 = vmatpush.bf16.msra.mxu3 %v980_v35 }
  0x2c   : > { %605 = vmatpush.bf16.msra.mxu1 %v964_v38  ;;  %592 = vmatmul.bf16.vlgmr.msra.gmra.mxu0 %v772_v42 }
  0x2d   : > { %640 = vmatpush.bf16.msrb.mxu0 %v995_v29  ;;  %620 = vmatmul.bf16.vlgmr.msra.gmra.mxu2 %v780_v41 }
  0x2e   : > { %634 = vmatmul.bf16.vlgmr.msra.gmra.mxu3 %v784_v43 }
  0x2f   : > { %606 = vmatmul.bf16.vlgmr.msra.gmra.mxu1 %v776_v45 }
  0x31   : > { %641 = vmatpush.bf16.msrb.mxu0 %v994_v44 }
  0x35   : > { %642 = vmatpush.bf16.msrb.mxu0 %v993_v46 }
  0x39   : > { %643 = vmatpush.bf16.msrb.mxu0 %v992_v47 }
  0x3d   : > { %644 = vmatpush.bf16.msrb.mxu0 %v991_v48 }
  0x41   : > { %645 = vmatpush.bf16.msrb.mxu0 %v990_v49 }
  0x45   : > { %646 = vmatpush.bf16.msrb.mxu0 %v989_v50 }
  0x49   : > { %647 = vmatpush.bf16.msrb.mxu0 %v988_v51 }
  0x4c   : > { %648 = vmatmul.bf16.vlgmr.msrb.gmra.mxu0 %v788_v54 }
  0xa9   : > { %v593_v55 = vpop.f32.mrf.mxu0 }
  0xaa   : > { %v594_v58 = vadd.f32 %v1021_v56, %v593_v55 }
  0xac   : > { %v607_v57 = vpop.f32.mrf.mxu1 }
  0xad   : > { %v608_v60 = vadd.f32 %v607_v57, %v594_v58 }
  0xb0   : > { %v621_v59 = vpop.f32.mrf.mxu2 }
  0xb1   : > { %v595_v61 = vpop.f32.mrf.mxu0  ;;  %v635_v62 = vpop.f32.mrf.mxu3  ;;  %v622_v63 = vadd.f32 %v621_v59, %v608_v60 }
  0xb2   : > { %v596_v0 = vadd.f32 %v1021_v56, %v595_v61 }
  0xb3   : > { %v636_v2 = vadd.f32 %v635_v62, %v622_v63 }
  0xb4   : > { %v609_v1 = vpop.f32.mrf.mxu1 }
  0xb5   : > { %v610_v3 = vadd.f32 %v609_v1, %v596_v0 }
  0xb8   : > { %v623_v4 = vpop.f32.mrf.mxu2 }
  0xb9   : > { %v624_v7 = vadd.f32 %v623_v4, %v610_v3  ;;  %v637_v8 = vpop.f32.mrf.mxu3 }
  0xbb   : > { %v638_v9 = vadd.f32 %v637_v8, %v624_v7 }
  0xc9   : > { %v649_v5 = vpop.f32.mrf.mxu0 }
  0xca   : > { %v650_v6 = vadd.f32 %v649_v5, %v636_v2 }
  0xcc   : > { %654 = vst [vmem:[%s226_s9] sm:$0xff] %v650_v6 }
  0xd1   : > { %v651_v10 = vpop.f32.mrf.mxu0 }
  0xd2   : > { %v652_v11 = vadd.f32 %v651_v10, %v638_v9 }
  0xd4   : > { %655 = vst [vmem:[%s226_s9 + $0x8] sm:$0xff] %v652_v11 }
  0xd5 PF: > { %s13_s14 = sadd.s32 1, %s1044_s14   ;;  %s1245_s12 = smov %s1040_s13 }
  0xd6   : > { %p10_p5 = scmp.ge.s32.totalorder %s13_s14, 4   ;;  %s1246_s13 = smov %s1248_s15 }
  0xd8   :  { %12 = sbr.rel (!%p10_p5) target bundleno = 2 (0x2), region = 68 }

// kernel: _lambda_.11
= control target key start
LH: loop header
LB: loop body
LE: loop exit
PB: predicated region body
PF: predicated region fallthrough
CT: control target
= control target key end

     0   :  { %s1200_s15 = smov 0   ;;  %s1202_s16 = smov 0   ;;  %s1379_s0 = inlined_call_operand.vmem [shape: bf16[2,16,640], index: 0, kind: input, shape index: {}]   ;;  %s1380_s1 = inlined_call_operand.vmem [shape: bf16[640,128], index: 1, kind: input, shape index: {}]   ;;  %s1381_s2 = inlined_call_operand.vmem [shape: f32[1,128], index: 2, kind: input, shape index: {}]   ;;  %s1382_s3 = inlined_call_operand.vmem [shape: f32[2,16,128], index: 3, kind: input, shape index: {}]   ;;  %s1383_s4 = inlined_call_operand.vmem [shape: f32[2,16,128], index: 4, kind: output, shape index: {}]  }
   0x1   :  { %s1204_s17 = smov 0  }
   0x2 LB: > { %s26_s18 = sadd.s32 1, %s1168_s16  ;;  %p884_p0 = scmp.ge.s32.totalorder %s1172_s17, 1  ;;  %s1172_s17 = sphi %s1204_s17, %s14_s17   ;;  %s1168_s16 = sphi %s1202_s16, %s1385_s16   ;;  %s1164_s15 = sphi %s1200_s15, %s1384_s15  }
   0x3   : > { %p28_p1 = scmp.ge.s32.totalorder %s26_s18, 2  ;;  %p208_p2 = scmp.lt.s32.totalorder %s1172_s17, 3 }
   0x5   : > { %s1387_s18 = smov (%p28_p1, %s26_s18), 0  ;;  %p209_p3 = pnand %p884_p0, %p208_p2 }
   0x6   : > { %p252_p4 = scmp.lt.s32.totalorder (!%p209_p3), %s1164_s15, 1 }
   0x7   : > { %212 = sbr.rel (%p209_p3) target bundleno = 260 (0x104), region = 36 }
   0xc   : > { %v1086_v0 = vld [vmem:[%s1380_s1 + $0x38] sm:$0xff]  ;;  %v1085_v4 = vld [vmem:[%s1380_s1 + $0x30] sm:$0xff]  ;;  %v1084_v8 = vld [vmem:[%s1380_s1 + $0x28] sm:$0xff]  ;;  %s1389_s15 = smov (!%p252_p4, %s1164_s15), 1 }
   0xd   : > { %v1102_v1 = vld [vmem:[%s1380_s1 + $0xb8] sm:$0xff]  ;;  %636 = vmatpush.bf16.msra.mxu0 %v1086_v0  ;;  %v1101_v5 = vld [vmem:[%s1380_s1 + $0xb0] sm:$0xff]  ;;  %v1100_v9 = vld [vmem:[%s1380_s1 + $0xa8] sm:$0xff]  ;;  %s1119_s19 = smul.u32 40, %s1389_s15 }
   0xe   : > { %v1110_v2 = vld [vmem:[%s1380_s1 + $0xf8] sm:$0xff]  ;;  %664 = vmatpush.bf16.msra.mxu2 %v1102_v1  ;;  %v1109_v6 = vld [vmem:[%s1380_s1 + $0xf0] sm:$0xff]  ;;  %v1108_v10 = vld [vmem:[%s1380_s1 + $0xe8] sm:$0xff]  ;;  %v1174_v1 = vmov 16.0  }
   0xf   : > { %v1094_v3 = vld [vmem:[%s1380_s1 + $0x78] sm:$0xff]  ;;  %678 = vmatpush.bf16.msra.mxu3 %v1110_v2  ;;  %v1093_v7 = vld [vmem:[%s1380_s1 + $0x70] sm:$0xff]  ;;  %v1092_v11 = vld [vmem:[%s1380_s1 + $0x68] sm:$0xff]  ;;  %s1306_s30 = scalar_lea.vmem %s1379_s0, %s1119_s19  ;;  %1146 = vrcp.f32 %v1174_v1 }
  0x10   : > { %650 = vmatpush.bf16.msra.mxu1 %v1094_v3  ;;  %v1083_v12 = vld [vmem:[%s1380_s1 + $0x20] sm:$0xff]  ;;  %v1082_v16 = vld [vmem:[%s1380_s1 + $0x18] sm:$0xff]  ;;  %v1081_v20 = vld [vmem:[%s1380_s1 + $0x10] sm:$0xff] }
  0x11   : > { %637 = vmatpush.bf16.msra.mxu0 %v1085_v4  ;;  %v1099_v13 = vld [vmem:[%s1380_s1 + $0xa0] sm:$0xff]  ;;  %v1098_v17 = vld [vmem:[%s1380_s1 + $0x98] sm:$0xff]  ;;  %v1097_v21 = vld [vmem:[%s1380_s1 + $0x90] sm:$0xff] }
  0x12   : > { %665 = vmatpush.bf16.msra.mxu2 %v1101_v5  ;;  %v1107_v14 = vld [vmem:[%s1380_s1 + $0xe0] sm:$0xff]  ;;  %v1106_v18 = vld [vmem:[%s1380_s1 + $0xd8] sm:$0xff]  ;;  %v1105_v22 = vld [vmem:[%s1380_s1 + $0xd0] sm:$0xff] }
  0x13   : > { %679 = vmatpush.bf16.msra.mxu3 %v1109_v6  ;;  %v1091_v15 = vld [vmem:[%s1380_s1 + $0x60] sm:$0xff]  ;;  %v1090_v19 = vld [vmem:[%s1380_s1 + $0x58] sm:$0xff]  ;;  %v1089_v23 = vld [vmem:[%s1380_s1 + $0x50] sm:$0xff] }
  0x14   : > { %651 = vmatpush.bf16.msra.mxu1 %v1093_v7  ;;  %v1080_v24 = vld [vmem:[%s1380_s1 + $0x8] sm:$0xff]  ;;  %v1079_v28 = vld [vmem:[%s1380_s1] sm:$0xff]  ;;  %v1118_v29 = vld [vmem:[%s1380_s1 + $0x138] sm:$0xff] }
  0x15   : > { %638 = vmatpush.bf16.msra.mxu0 %v1084_v8  ;;  %v1096_v25 = vld [vmem:[%s1380_s1 + $0x88] sm:$0xff]  ;;  %v1095_v30 = vld [vmem:[%s1380_s1 + $0x80] sm:$0xff]  ;;  %v1077_v32 = vld [vmem:[%s1306_s30 + $0x18] sm:$0xf0]  ;;  %v1147_v6 = vpop.eup %1146 }
  0x16   : > { %666 = vmatpush.bf16.msra.mxu2 %v1100_v9  ;;  %v1104_v26 = vld [vmem:[%s1380_s1 + $0xc8] sm:$0xff]  ;;  %v892_v33 = vld [vmem:[%s1306_s30] sm:$0xf]  ;;  %v1076_v34 = vld [vmem:[%s1306_s30 + $0x10] sm:$0xf0]  ;;  %vm718_vm0 = vweird.f32 %v1147_v6 }
  0x17   : > { %680 = vmatpush.bf16.msra.mxu3 %v1108_v10  ;;  %v1088_v27 = vld [vmem:[%s1380_s1 + $0x48] sm:$0xff]  ;;  %v1103_v35 = vld [vmem:[%s1380_s1 + $0xc0] sm:$0xff]  ;;  %v894_v40 = vld [vmem:[%s1306_s30 + $0x14] sm:$0xf0]  ;;  %v893_v42 = vor.u32 %v1076_v34, %v892_v33  ;;  %v714_v10 = vmul.f32 16.0, %v1147_v6 }
  0x18   : > { %652 = vmatpush.bf16.msra.mxu1 %v1092_v11  ;;  %v900_v31 = vld [vmem:[%s1306_s30 + $0x8] sm:$0xf]  ;;  %v1075_v36 = vld [vmem:[%s1306_s30 + $0xc] sm:$0xf]  ;;  %v902_v37 = vld [vmem:[%s1306_s30 + $0x1c] sm:$0xf0] }
  0x19   : > { %639 = vmatpush.bf16.msra.mxu0 %v1083_v12  ;;  %v1087_v38 = vld [vmem:[%s1380_s1 + $0x40] sm:$0xff]  ;;  %v901_v41 = vor.u32 %v1077_v32, %v900_v31  ;;  %v905_v43 = vor.u32 %v1075_v36, %v902_v37  ;;  %v1117_v44 = vld [vmem:[%s1380_s1 + $0x130] sm:$0xff]  ;;  %v1116_v46 = vld [vmem:[%s1380_s1 + $0x128] sm:$0xff] }
  0x1a   : > { %667 = vmatpush.bf16.msra.mxu2 %v1099_v13  ;;  %v1074_v39 = vld [vmem:[%s1306_s30 + $0x4] sm:$0xf]  ;;  %v1114_v48 = vld [vmem:[%s1380_s1 + $0x118] sm:$0xff]  ;;  %v1113_v49 = vld [vmem:[%s1380_s1 + $0x110] sm:$0xff] }
  0x1b   : > { %681 = vmatpush.bf16.msra.mxu3 %v1107_v14  ;;  %v897_v45 = vor.u32 %v1074_v39, %v894_v40  ;;  %v1115_v47 = vld [vmem:[%s1380_s1 + $0x120] sm:$0xff]  ;;  %v1112_v50 = vld [vmem:[%s1380_s1 + $0x108] sm:$0xff]  ;;  %v908_v52 = vld [vmem:[%s1306_s30 + $0x10] sm:$0xf] }
  0x1c   : > { %653 = vmatpush.bf16.msra.mxu1 %v1091_v15  ;;  %v1111_v51 = vld [vmem:[%s1380_s1 + $0x100] sm:$0xff]  ;;  %v715_v15 = vsub.f32 1.0, %v714_v10 }
  0x1d   : > { %640 = vmatpush.bf16.msra.mxu0 %v1082_v16  ;;  %v1078_v53 = vld [vmem:[%s1306_s30 + $0x20] sm:$0xf0]  ;;  %v1145_v57 = vld [vmem:[%s1381_s2] ss:$0 sm:$0xff]  ;;  %s1072_s30 = sshll.u32 %s1389_s15, 4 }
  0x1e   : > { %668 = vmatpush.bf16.msra.mxu2 %v1098_v17  ;;  %v909_v54 = vor.u32 %v1078_v53, %v908_v52  ;;  %s271_s20 = scalar_lea.vmem %s1382_s3, %s1072_s30  ;;  %s279_s15 = scalar_lea.vmem %s1383_s4, %s1072_s30 }
  0x1f   : > { %682 = vmatpush.bf16.msra.mxu3 %v1106_v18 }
  0x20   : > { %654 = vmatpush.bf16.msra.mxu1 %v1090_v19 }
  0x21   : > { %641 = vmatpush.bf16.msra.mxu0 %v1081_v20 }
  0x22   : > { %669 = vmatpush.bf16.msra.mxu2 %v1097_v21  ;;  %v716_v21 = vmul.f32 %v1147_v6, %v715_v15 }
  0x23   : > { %683 = vmatpush.bf16.msra.mxu3 %v1105_v22 }
  0x24   : > { %655 = vmatpush.bf16.msra.mxu1 %v1089_v23 }
  0x25   : > { %642 = vmatpush.bf16.msra.mxu0 %v1080_v24 }
  0x26   : > { %670 = vmatpush.bf16.msra.mxu2 %v1096_v25 }
  0x27   : > { %684 = vmatpush.bf16.msra.mxu3 %v1104_v26  ;;  %v717_v26 = vadd.f32 %v1147_v6, %v716_v21 }
  0x28   : > { %656 = vmatpush.bf16.msra.mxu1 %v1088_v27 }
  0x29   : > { %643 = vmatpush.bf16.msra.mxu0 %v1079_v28  ;;  %v719_v31 = vsel %vm718_vm0, %v1147_v6, %v717_v26 }
  0x2a   : > { %671 = vmatpush.bf16.msra.mxu2 %v1095_v30 }
  0x2b   : > { %685 = vmatpush.bf16.msra.mxu3 %v1103_v35 }
  0x2c   : > { %657 = vmatpush.bf16.msra.mxu1 %v1087_v38  ;;  %644 = vmatmul.bf16.vlgmr.msra.gmra.mxu0 %v893_v42 }
  0x2d   : > { %692 = vmatpush.bf16.msrb.mxu0 %v1118_v29  ;;  %672 = vmatmul.bf16.vlgmr.msra.gmra.mxu2 %v901_v41 }
  0x2e   : > { %686 = vmatmul.bf16.vlgmr.msra.gmra.mxu3 %v905_v43 }
  0x2f   : > { %658 = vmatmul.bf16.vlgmr.msra.gmra.mxu1 %v897_v45 }
  0x31   : > { %693 = vmatpush.bf16.msrb.mxu0 %v1117_v44 }
  0x35   : > { %694 = vmatpush.bf16.msrb.mxu0 %v1116_v46 }
  0x39   : > { %695 = vmatpush.bf16.msrb.mxu0 %v1115_v47 }
  0x3d   : > { %696 = vmatpush.bf16.msrb.mxu0 %v1114_v48 }
  0x41   : > { %697 = vmatpush.bf16.msrb.mxu0 %v1113_v49 }
  0x45   : > { %698 = vmatpush.bf16.msrb.mxu0 %v1112_v50  ;;  %v749_v50 = vld [vmem:[%s271_s20] sm:$0xff] }
  0x49   : > { %699 = vmatpush.bf16.msrb.mxu0 %v1111_v51  ;;  %v750_v51 = vld [vmem:[%s271_s20 + $0x8] sm:$0xff] }
  0x4c   : > { %700 = vmatmul.bf16.vlgmr.msrb.gmra.mxu0 %v909_v54 }
  0xa9   : > { %v645_v55 = vpop.f32.mrf.mxu0 }
  0xaa   : > { %v646_v60 = vadd.f32 %v1145_v57, %v645_v55 }
  0xac   : > { %v659_v56 = vpop.f32.mrf.mxu1 }
  0xad   : > { %v660_v0 = vadd.f32 %v659_v56, %v646_v60 }
  0xb0   : > { %v673_v58 = vpop.f32.mrf.mxu2 }
  0xb1   : > { %v647_v59 = vpop.f32.mrf.mxu0  ;;  %v687_v61 = vpop.f32.mrf.mxu3  ;;  %v674_v5 = vadd.f32 %v673_v58, %v660_v0 }
  0xb2   : > { %v648_v62 = vadd.f32 %v1145_v57, %v647_v59 }
  0xb3   : > { %v688_v9 = vadd.f32 %v687_v61, %v674_v5 }
  0xb4   : > { %v661_v63 = vpop.f32.mrf.mxu1 }
  0xb5   : > { %v662_v2 = vadd.f32 %v661_v63, %v648_v62 }
  0xb8   : > { %v675_v3 = vpop.f32.mrf.mxu2 }
  0xb9   : > { %v676_v7 = vadd.f32 %v675_v3, %v662_v2  ;;  %v689_v8 = vpop.f32.mrf.mxu3 }
  0xbb   : > { %v690_v11 = vadd.f32 %v689_v8, %v676_v7 }
  0xc9   : > { %v701_v4 = vpop.f32.mrf.mxu0 }
  0xca   : > { %v702_v12 = vadd.f32 %v701_v4, %v688_v9 }
  0xcc   : > { %v721_v16 = vmul.f32 %v702_v12, %v702_v12 }
  0xd1   : > { %v703_v13 = vpop.f32.mrf.mxu0 }
  0xd2   : > { %v704_v14 = vadd.f32 %v703_v13, %v690_v11 }
  0xd4   : > { %v706_v17 = vadd.f32 %v704_v14, %v702_v12  ;;  %v722_v18 = vmul.f32 %v704_v14, %v704_v14 }
  0xd6   : > { %v707_v19 = vrot.slane %v706_v17, 4  ;;  %v723_v20 = vadd.f32 %v722_v18, %v721_v16 }
  0xd8   : > { %v708_v22 = vadd.f32 %v707_v19, %v706_v17  ;;  %v724_v23 = vrot.slane %v723_v20, 4 }
  0xda   : > { %v709_v24 = vrot.slane %v708_v22, 2  ;;  %v725_v25 = vadd.f32 %v724_v23, %v723_v20 }
  0xdc   : > { %v710_v27 = vadd.f32 %v709_v24, %v708_v22  ;;  %v726_v28 = vrot.slane %v725_v25, 2 }
  0xde   : > { %v711_v29 = vrot.slane %v710_v27, 1  ;;  %v727_v30 = vadd.f32 %v726_v28, %v725_v25 }
  0xe0   : > { %v712_v32 = vadd.f32 %v711_v29, %v710_v27  ;;  %v728_v33 = vrot.slane %v727_v30, 1 }
  0xe2   : > { %v720_v34 = vmul.f32 %v719_v31, %v712_v32  ;;  %v729_v35 = vadd.f32 %v728_v33, %v727_v30 }
  0xe4   : > { %v730_v36 = vmul.f32 %v729_v35, %v719_v31  ;;  %v731_v37 = vmul.f32 %v720_v34, %v720_v34  ;;  %v734_v47 = vsub.f32 %v702_v12, %v720_v34  ;;  %v735_v48 = vsub.f32 %v704_v14, %v720_v34 }
  0xe6   : > { %v732_v38 = vsub.f32 %v730_v36, %v731_v37 }
  0xe8   : > { %v733_v39 = vmax.f32 %v732_v38, 0.0 }
  0xea   : > { %v736_v40 = vadd.f32 1e-05, %v733_v39 }
  0xec   : > { %1148 = vrsqrt.f32 %v736_v40  ;;  %vm743_vm2 = vweird.f32 %v736_v40 }
  0xf2   : > { %v1149_v41 = vpop.eup %1148 }
  0xf3   : > { %v738_v42 = vmul.f32 %v1149_v41, %v736_v40  ;;  %vm744_vm1 = vweird.f32 %v1149_v41 }
  0xf4   : > { %vm745_vm3 = vmor %vm743_vm2, %vm744_vm1 }
  0xf5   : > { %v739_v43 = vmul.f32 %v1149_v41, %v738_v42 }
  0xf7   : > { %v740_v44 = vmul.f32 0.5, %v739_v43 }
  0xf9   : > { %v741_v45 = vsub.f32 1.5, %v740_v44 }
  0xfb   : > { %v742_v46 = vmul.f32 %v1149_v41, %v741_v45 }
  0xfd   : > { %v746_v49 = vsel %vm745_vm3, %v1149_v41, %v742_v46 }
  0xfe   : > { %v747_v52 = vmul.f32 %v746_v49, %v734_v47  ;;  %v748_v53 = vmul.f32 %v746_v49, %v735_v48 }
 0x100   : > { %v751_v54 = vadd.f32 %v749_v50, %v747_v52  ;;  %v752_v55 = vadd.f32 %v750_v51, %v748_v53 }
 0x102   : > { %753 = vst [vmem:[%s279_s15] sm:$0xff] %v751_v54 }
 0x103   : > { %754 = vst [vmem:[%s279_s15 + $0x8] sm:$0xff] %v752_v55 }
 0x104 PF: > { %s14_s17 = sadd.s32 1, %s1172_s17   ;;  %s1384_s15 = smov %s1168_s16 }
 0x105   : > { %p11_p5 = scmp.ge.s32.totalorder %s14_s17, 4   ;;  %s1385_s16 = smov %s1387_s18 }
 0x107   :  { %13 = sbr.rel (!%p11_p5) target bundleno = 2 (0x2), region = 75 }

// kernel: _lambda_.12
= control target key start
LH: loop header
LB: loop body
LE: loop exit
PB: predicated region body
PF: predicated region fallthrough
CT: control target
= control target key end

     0   :  { %s747_s12 = smov 0   ;;  %s749_s13 = smov 0   ;;  %s855_s0 = inlined_call_operand.vmem [shape: bf16[32,128], index: 0, kind: input, shape index: {}]   ;;  %s856_s1 = inlined_call_operand.vmem [shape: bf16[128,1152], index: 1, kind: input, shape index: {}]   ;;  %s857_s2 = inlined_call_operand.vmem [shape: f32[1,1152], index: 2, kind: input, shape index: {}]   ;;  %s858_s3 = inlined_call_operand.vmem [shape: f32[32,1152], index: 3, kind: output, shape index: {}]  }
   0x1   :  { %s751_s14 = smov 0   ;;  %s753_s15 = smov 0  }
   0x2   :  { %s755_s16 = smov 0  }
   0x3 LB: > { %s22_s17 = sadd.s32 1, %s721_s15  ;;  %s574_s18 = sadd.s32 4294967295, %s725_s16   ;;  %s725_s16 = sphi %s755_s16, %s13_s16   ;;  %s721_s15 = sphi %s753_s15, %s863_s15   ;;  %s717_s14 = sphi %s751_s14, %s862_s14   ;;  %s713_s13 = sphi %s749_s13, %s861_s13   ;;  %s709_s12 = sphi %s747_s12, %s860_s12  }
   0x4   : > { %p23_p0 = scmp.ge.s32.totalorder %s22_s17, 9  ;;  %p65_p1 = scmp.ne.s32.totalorder %s713_s13, %s709_s12 }
   0x5   : > { %p66_p2 = scmp.eq.s32.totalorder %s725_s16, 0  ;;  %p123_p4 = scmp.eq.s32.totalorder %s574_s18, 8 }
   0x6   : > { %s865_s17 = smov (%p23_p0, %s22_s17), 0  ;;  %s58_s20 = sadd.s32 1, %s713_s13 }
   0x7   : > { %p67_p3 = por %p66_p2, %p65_p1  ;;  %s55_s19 = ssub.s32 %s721_s15, %s865_s17 }
   0x8   : > { %p56_p5 = scmp.eq.s32.totalorder %s55_s19, 0  ;;  %p782_p6 = por %p123_p4, %p65_p1 }
   0x9   : > { %p578_p7 = scmp.ge.s32.totalorder %s725_s16, 9 }
   0xa   : > { %s787_s22 = scalar_select %p56_p5, %s713_s13, %s58_s20  }
   0xb   : > { %154 = sbr.rel (%p578_p7) target bundleno = 36 (0x24), region = 20 }
  0x10   : > { %157 = sbr.rel (!%p67_p3) target bundleno = 36 (0x24), region = 24  ;;  %s159_s23 = sand.u32 (%p67_p3), 1, %s713_s13  }
  0x11   : > { %s580_s24 = sshll.u32 (%p67_p3), %s721_s15, 2  ;;  %s579_s25 = sshll.u32 (%p67_p3), %s159_s23, 6 }
  0x12   : > { %s795_s28 = scalar_lea.vmem (%p67_p3), %s856_s1, %s580_s24  ;;  %s161_s29 = scalar_lea.vmem (%p67_p3), [#allocation2], %s579_s25 }
  0x13   : > { %v180_v0 = vld [vmem:[%s795_s28] sm:$0xf] (%p67_p3)  ;;  %v182_v1 = vld [vmem:[%s795_s28 + $0x24] sm:$0xf] (%p67_p3)  ;;  %v184_v2 = vld [vmem:[%s795_s28 + $0x48] sm:$0xf] (%p67_p3) }
  0x14   : > { %181 = vst [vmem:[%s161_s29] sm:$0xf] (%p67_p3), %v180_v0  ;;  %v186_v3 = vld [vmem:[%s795_s28 + $0x6c] sm:$0xf] (%p67_p3)  ;;  %v188_v4 = vld [vmem:[%s795_s28 + $0x90] sm:$0xf] (%p67_p3) }
  0x15   : > { %183 = vst [vmem:[%s161_s29 + $0x4] sm:$0xf] %v182_v1  ;;  %v190_v5 = vld [vmem:[%s795_s28 + $0xb4] sm:$0xf]  ;;  %v192_v6 = vld [vmem:[%s795_s28 + $0xd8] sm:$0xf] }
  0x16   : > { %185 = vst [vmem:[%s161_s29 + $0x8] sm:$0xf] %v184_v2  ;;  %v194_v7 = vld [vmem:[%s795_s28 + $0xfc] sm:$0xf]  ;;  %v196_v8 = vld [vmem:[%s795_s28 + $0x120] sm:$0xf] }
  0x17   : > { %187 = vst [vmem:[%s161_s29 + $0xc] sm:$0xf] %v186_v3  ;;  %v198_v9 = vld [vmem:[%s795_s28 + $0x144] sm:$0xf]  ;;  %v200_v10 = vld [vmem:[%s795_s28 + $0x168] sm:$0xf] }
  0x18   : > { %189 = vst [vmem:[%s161_s29 + $0x10] sm:$0xf] %v188_v4  ;;  %v202_v11 = vld [vmem:[%s795_s28 + $0x18c] sm:$0xf]  ;;  %v204_v12 = vld [vmem:[%s795_s28 + $0x1b0] sm:$0xf] }
  0x19   : > { %191 = vst [vmem:[%s161_s29 + $0x14] sm:$0xf] %v190_v5  ;;  %v206_v13 = vld [vmem:[%s795_s28 + $0x1d4] sm:$0xf]  ;;  %v208_v14 = vld [vmem:[%s795_s28 + $0x1f8] sm:$0xf] }
  0x1a   : > { %193 = vst [vmem:[%s161_s29 + $0x18] sm:$0xf] %v192_v6  ;;  %v210_v15 = vld [vmem:[%s795_s28 + $0x21c] sm:$0xf] }
  0x1b   : > { %195 = vst [vmem:[%s161_s29 + $0x1c] sm:$0xf] %v194_v7 }
  0x1c   : > { %197 = vst [vmem:[%s161_s29 + $0x20] sm:$0xf] %v196_v8 }
  0x1d   : > { %199 = vst [vmem:[%s161_s29 + $0x24] sm:$0xf] %v198_v9 }
  0x1e   : > { %201 = vst [vmem:[%s161_s29 + $0x28] sm:$0xf] %v200_v10 }
  0x1f   : > { %203 = vst [vmem:[%s161_s29 + $0x2c] sm:$0xf] %v202_v11 }
  0x20   : > { %205 = vst [vmem:[%s161_s29 + $0x30] sm:$0xf] %v204_v12 }
  0x21   : > { %207 = vst [vmem:[%s161_s29 + $0x34] sm:$0xf] %v206_v13 }
  0x22   : > { %209 = vst [vmem:[%s161_s29 + $0x38] sm:$0xf] %v208_v14 }
  0x23   : > { %211 = vst [vmem:[%s161_s29 + $0x3c] sm:$0xf] %v210_v15 }
  0x24 PF: > { %p581_p8 = scmp.ge.s32.totalorder %s725_s16, 1  ;;  %p272_p9 = scmp.lt.s32.totalorder %s725_s16, 10 }
  0x26   : > { %p273_p10 = pnand %p581_p8, %p272_p9 }
  0x27   : > { %s279_s30 = sand.u32 (!%p273_p10), 1, %s709_s12   ;;  %p315_p11 = scmp.lt.s32.totalorder (!%p273_p10), %s717_s14, 8 }
  0x28   : > { %276 = sbr.rel (%p273_p10) target bundleno = 223 (0xdf), region = 69  ;;  %s582_s4 = sshll.u32 (!%p273_p10), %s279_s30, 6 }
  0x29   : > { %s281_s5 = scalar_lea.vmem (!%p273_p10), [#allocation2], %s582_s4  ;;  %s583_s20 = sshll.u32 (!%p273_p10), %s279_s30, 5 }
  0x2a   : > { %s308_s23 = scalar_lea.vmem (!%p273_p10), [#allocation3], %s583_s20 }
  0x2d   : > { %v637_v16 = vld [vmem:[%s281_s5 + $0x38] sm:$0xff]  ;;  %s820_s6 = scalar_select %p315_p11, %s717_s14, 8  ;;  %v636_v17 = vld [vmem:[%s281_s5 + $0x30] sm:$0xff]  ;;  %v635_v18 = vld [vmem:[%s281_s5 + $0x28] sm:$0xff] }
  0x2e   : > { %403 = vmatpush.bf16.msra.mxu0 %v637_v16  ;;  %638 = vmatpush.bf16.msra.mxu1 %v637_v16  ;;  %v634_v19 = vld [vmem:[%s281_s5 + $0x20] sm:$0xff]  ;;  %v633_v20 = vld [vmem:[%s281_s5 + $0x18] sm:$0xff]  ;;  %v632_v21 = vld [vmem:[%s281_s5 + $0x10] sm:$0xff]  ;;  %s625_s12 = sshll.u32 (%p782_p6), %s717_s14, 3 }
  0x2f   : > { %s317_s9 = scalar_lea.vmem %s857_s2, %s820_s6  ;;  %v631_v22 = vld [vmem:[%s281_s5 + $0x8] sm:$0xff]  ;;  %v630_v23 = vld [vmem:[%s281_s5] sm:$0xff]  ;;  %s437_s26 = scalar_lea.vmem (%p782_p6), %s858_s3, %s625_s12 }
  0x30   : > { %v628_v24 = vld [vmem:[%s855_s0] sm:$0xff]  ;;  %v629_v25 = vld [vmem:[%s855_s0 + $0x8] sm:$0xff] }
  0x31   : > { %v686_v26 = vld [vmem:[%s317_s9] ss:$0 sm:$0xff] }
  0x32   : > { %404 = vmatpush.bf16.msra.mxu0 %v636_v17  ;;  %639 = vmatpush.bf16.msra.mxu1 %v636_v17 }
  0x36   : > { %405 = vmatpush.bf16.msra.mxu0 %v635_v18  ;;  %640 = vmatpush.bf16.msra.mxu1 %v635_v18 }
  0x3a   : > { %406 = vmatpush.bf16.msra.mxu0 %v634_v19  ;;  %641 = vmatpush.bf16.msra.mxu1 %v634_v19 }
  0x3e   : > { %407 = vmatpush.bf16.msra.mxu0 %v633_v20  ;;  %642 = vmatpush.bf16.msra.mxu1 %v633_v20 }
  0x42   : > { %408 = vmatpush.bf16.msra.mxu0 %v632_v21  ;;  %643 = vmatpush.bf16.msra.mxu1 %v632_v21 }
  0x46   : > { %409 = vmatpush.bf16.msra.mxu0 %v631_v22  ;;  %644 = vmatpush.bf16.msra.mxu1 %v631_v22 }
  0x4a   : > { %410 = vmatpush.bf16.msra.mxu0 %v630_v23  ;;  %645 = vmatpush.bf16.msra.mxu1 %v630_v23 }
  0x4d   : > { %411 = vmatmul.bf16.vlgmr.msra.gmra.mxu0 %v628_v24  ;;  %416 = vmatmul.bf16.vlgmr.msra.gmra.mxu1 %v629_v25 }
  0xca   : > { %v412_v27 = vpop.f32.mrf.mxu0  ;;  %v417_v28 = vpop.f32.mrf.mxu1 }
  0xcb   : > { %v413_v29 = vadd.f32 %v686_v26, %v412_v27  ;;  %v418_v30 = vadd.f32 %v686_v26, %v417_v28 }
  0xcd   : > { %422 = vst [vmem:[%s308_s23] sm:$0xff] %v413_v29 }
  0xce   : > { %424 = vst [vmem:[%s308_s23 + $0x10] sm:$0xff] %v418_v30 }
  0xd2   : > { %v414_v31 = vpop.f32.mrf.mxu0  ;;  %v419_v32 = vpop.f32.mrf.mxu1  ;;  %432 = sbr.rel (!%p782_p6) target bundleno = 223 (0xdf), region = 77 }
  0xd3   : > { %v415_v33 = vadd.f32 %v686_v26, %v414_v31  ;;  %v420_v34 = vadd.f32 %v686_v26, %v419_v32 }
  0xd4   : > { %v472_v35 = vld [vmem:[%s308_s23] sm:$0xff] (%p782_p6) }
  0xd5   : > { %423 = vst [vmem:[%s308_s23 + $0x8] sm:$0xff] %v415_v33  ;;  %v476_v37 = vld [vmem:[%s308_s23 + $0x10] sm:$0xff] (%p782_p6) }
  0xd6   : > { %425 = vst [vmem:[%s308_s23 + $0x18] sm:$0xff] %v420_v34 }
  0xd7   : > { %473 = vst [vmem:[%s437_s26] sm:$0xff] %v472_v35 }
  0xd8   : > { %477 = vst [vmem:[%s437_s26 + $0x90] sm:$0xff] %v476_v37 }
  0xdc   : > { %v474_v36 = vld [vmem:[%s308_s23 + $0x8] sm:$0xff] }
  0xdd   : > { %v478_v38 = vld [vmem:[%s308_s23 + $0x18] sm:$0xff]  ;;  %475 = vst [vmem:[%s437_s26 + $0x48] sm:$0xff] %v474_v36 }
  0xde   : > { %479 = vst [vmem:[%s437_s26 + $0xd8] sm:$0xff] %v478_v38 }
  0xdf PF: > { %s13_s16 = sadd.s32 1, %s725_s16   ;;  %s860_s12 = smov %s713_s13 }
  0xe0   : > { %p10_p12 = scmp.ge.s32.totalorder %s13_s16, 11   ;;  %s861_s13 = smov %s787_s22 }
  0xe1   : > { %s862_s14 = smov %s721_s15  ;;  %s863_s15 = smov %s865_s17 }
  0xe2   :  { %12 = sbr.rel (!%p10_p12) target bundleno = 3 (0x3), region = 152 }

// kernel: _lambda_.13
= control target key start
LH: loop header
LB: loop body
LE: loop exit
PB: predicated region body
PF: predicated region fallthrough
CT: control target
= control target key end

     0   :  { %s314_s6 = smov 0   ;;  %s386_s0 = inlined_call_operand.vmem [shape: f32[2,64,128], index: 0, kind: input, shape index: {}]   ;;  %s387_s1 = inlined_call_operand.vmem [shape: f32[2,64,128], index: 1, kind: output, shape index: {}]  }
   0x1 LB: > { %s269_s7 = sadd.s32 4294967295, %s301_s6   ;;  %p273_p0 = scmp.ge.s32.totalorder %s301_s6, 1  ;;  %s301_s6 = sphi %s314_s6, %s11_s6  }
   0x2   : > { %p87_p1 = scmp.lt.s32.totalorder %s301_s6, 3 }
   0x4   : > { %p88_p2 = pnand %p273_p0, %p87_p1 }
   0x5   : > { %p107_p3 = scmp.lt.s32.totalorder (!%p88_p2), %s269_s7, 1 }
   0x6   : > { %91 = sbr.rel (%p88_p2) target bundleno = 81 (0x51), region = 24 }
   0xb   : > { %s389_s7 = smov (!%p107_p3, %s269_s7), 1  ;;  %v303_v0 = vmov 64.0  }
   0xc   : > { %s280_s8 = sshll.u32 %s389_s7, 6  ;;  %291 = vrcp.f32 %v303_v0 }
   0xd   : > { %s111_s11 = scalar_lea.vmem %s386_s0, %s280_s8  ;;  %s116_s14 = scalar_lea.vmem %s387_s1, %s280_s8 }
   0xe   : > { %v330_v1 = vld [vmem:[%s111_s11] sm:$0xff]  ;;  %v332_v2 = vld [vmem:[%s111_s11 + $0x8] sm:$0xff]  ;;  %v334_v3 = vld [vmem:[%s111_s11 + $0x10] sm:$0xff] }
   0xf   : > { %v336_v4 = vld [vmem:[%s111_s11 + $0x18] sm:$0xff]  ;;  %v125_v5 = vadd.f32 %v332_v2, %v330_v1  ;;  %v146_v6 = vmul.f32 %v330_v1, %v330_v1  ;;  %v147_v7 = vmul.f32 %v332_v2, %v332_v2  ;;  %v148_v8 = vmul.f32 %v334_v3, %v334_v3  ;;  %v346_v9 = vld [vmem:[%s111_s11 + $0x20] sm:$0xff]  ;;  %v351_v14 = vld [vmem:[%s111_s11 + $0x28] sm:$0xff] }
  0x10   : > { %v149_v11 = vmul.f32 %v336_v4, %v336_v4  ;;  %v150_v16 = vmul.f32 %v346_v9, %v346_v9  ;;  %v356_v18 = vld [vmem:[%s111_s11 + $0x30] sm:$0xff]  ;;  %v151_v21 = vmul.f32 %v351_v14, %v351_v14  ;;  %v361_v23 = vld [vmem:[%s111_s11 + $0x38] sm:$0xff] }
  0x11   : > { %v126_v10 = vadd.f32 %v125_v5, %v334_v3  ;;  %v154_v12 = vadd.f32 %v147_v7, %v146_v6  ;;  %v152_v25 = vmul.f32 %v356_v18, %v356_v18  ;;  %v153_v29 = vmul.f32 %v361_v23, %v361_v23 }
  0x12   : > { %v292_v13 = vpop.eup %291 }
  0x13   : > { %v127_v15 = vadd.f32 %v126_v10, %v336_v4  ;;  %v155_v17 = vadd.f32 %v154_v12, %v148_v8  ;;  %v139_v20 = vmul.f32 64.0, %v292_v13  ;;  %vm143_vm0 = vweird.f32 %v292_v13 }
  0x15   : > { %v128_v19 = vadd.f32 %v127_v15, %v346_v9  ;;  %v156_v22 = vadd.f32 %v155_v17, %v149_v11  ;;  %v140_v28 = vsub.f32 1.0, %v139_v20 }
  0x17   : > { %v129_v24 = vadd.f32 %v128_v19, %v351_v14  ;;  %v157_v26 = vadd.f32 %v156_v22, %v150_v16  ;;  %v141_v34 = vmul.f32 %v292_v13, %v140_v28 }
  0x19   : > { %v130_v27 = vadd.f32 %v129_v24, %v356_v18  ;;  %v158_v30 = vadd.f32 %v157_v26, %v151_v21  ;;  %v142_v39 = vadd.f32 %v292_v13, %v141_v34 }
  0x1b   : > { %v131_v31 = vadd.f32 %v130_v27, %v361_v23  ;;  %v159_v32 = vadd.f32 %v158_v30, %v152_v25  ;;  %v144_v44 = vsel %vm143_vm0, %v292_v13, %v142_v39 }
  0x1d   : > { %v132_v33 = vrot.slane %v131_v31, 4  ;;  %v160_v35 = vadd.f32 %v159_v32, %v153_v29 }
  0x1f   : > { %v133_v36 = vadd.f32 %v132_v33, %v131_v31  ;;  %v161_v37 = vrot.slane %v160_v35, 4 }
  0x21   : > { %v134_v38 = vrot.slane %v133_v36, 2  ;;  %v162_v40 = vadd.f32 %v161_v37, %v160_v35 }
  0x23   : > { %v135_v41 = vadd.f32 %v134_v38, %v133_v36  ;;  %v163_v42 = vrot.slane %v162_v40, 2 }
  0x25   : > { %v136_v43 = vrot.slane %v135_v41, 1  ;;  %v164_v45 = vadd.f32 %v163_v42, %v162_v40 }
  0x27   : > { %v137_v46 = vadd.f32 %v136_v43, %v135_v41  ;;  %v165_v47 = vrot.slane %v164_v45, 1 }
  0x29   : > { %v145_v48 = vmul.f32 %v144_v44, %v137_v46  ;;  %v166_v49 = vadd.f32 %v165_v47, %v164_v45 }
  0x2b   : > { %v168_v50 = vmul.f32 %v145_v48, %v145_v48  ;;  %v167_v51 = vmul.f32 %v166_v49, %v144_v44  ;;  %v171_v60 = vsub.f32 %v330_v1, %v145_v48  ;;  %v172_v61 = vsub.f32 %v332_v2, %v145_v48 }
  0x2c   : > { %v173_v62 = vsub.f32 %v334_v3, %v145_v48  ;;  %v174_v63 = vsub.f32 %v336_v4, %v145_v48  ;;  %v175_v5 = vsub.f32 %v346_v9, %v145_v48  ;;  %v176_v6 = vsub.f32 %v351_v14, %v145_v48 }
  0x2d   : > { %v169_v52 = vsub.f32 %v167_v51, %v168_v50  ;;  %v177_v7 = vsub.f32 %v356_v18, %v145_v48  ;;  %v178_v10 = vsub.f32 %v361_v23, %v145_v48 }
  0x2f   : > { %v170_v53 = vmax.f32 %v169_v52, 0.0 }
  0x31   : > { %v179_v54 = vadd.f32 1e-05, %v170_v53 }
  0x33   : > { %293 = vrsqrt.f32 %v179_v54  ;;  %vm186_vm1 = vweird.f32 %v179_v54 }
  0x39   : > { %v294_v55 = vpop.eup %293 }
  0x3a   : > { %v181_v56 = vmul.f32 %v294_v55, %v179_v54  ;;  %vm187_vm2 = vweird.f32 %v294_v55 }
  0x3b   : > { %vm188_vm3 = vmor %vm186_vm1, %vm187_vm2 }
  0x3c   : > { %v182_v57 = vmul.f32 %v294_v55, %v181_v56 }
  0x3e   : > { %v183_v58 = vmul.f32 0.5, %v182_v57 }
  0x40   : > { %v184_v59 = vsub.f32 1.5, %v183_v58 }
  0x42   : > { %v185_v0 = vmul.f32 %v294_v55, %v184_v59 }
  0x44   : > { %v189_v8 = vsel %vm188_vm3, %v294_v55, %v185_v0 }
  0x45   : > { %v190_v11 = vmul.f32 %v189_v8, %v171_v60  ;;  %v191_v12 = vmul.f32 %v189_v8, %v172_v61  ;;  %v192_v1 = vmul.f32 %v189_v8, %v173_v62  ;;  %v193_v13 = vmul.f32 %v189_v8, %v174_v63 }
  0x46   : > { %v194_v2 = vmul.f32 %v189_v8, %v175_v5  ;;  %v195_v3 = vmul.f32 %v189_v8, %v176_v6  ;;  %v196_v14 = vmul.f32 %v189_v8, %v177_v7  ;;  %v197_v17 = vmul.f32 %v189_v8, %v178_v10 }
  0x47   : > { %v198_v4 = vmax.f32 %v190_v11, 0.0  ;;  %v199_v9 = vmax.f32 %v191_v12, 0.0  ;;  %v200_v15 = vmax.f32 %v192_v1, 0.0  ;;  %v201_v16 = vmax.f32 %v193_v13, 0.0 }
  0x48   : > { %v202_v18 = vmax.f32 %v194_v2, 0.0  ;;  %v203_v19 = vmax.f32 %v195_v3, 0.0  ;;  %v204_v20 = vmax.f32 %v196_v14, 0.0  ;;  %v205_v21 = vmax.f32 %v197_v17, 0.0 }
  0x49   : > { %206 = vst [vmem:[%s116_s14] sm:$0xff] %v198_v4 }
  0x4a   : > { %207 = vst [vmem:[%s116_s14 + $0x8] sm:$0xff] %v199_v9 }
  0x4b   : > { %208 = vst [vmem:[%s116_s14 + $0x10] sm:$0xff] %v200_v15 }
  0x4c   : > { %209 = vst [vmem:[%s116_s14 + $0x18] sm:$0xff] %v201_v16 }
  0x4d   : > { %210 = vst [vmem:[%s116_s14 + $0x20] sm:$0xff] %v202_v18 }
  0x4e   : > { %211 = vst [vmem:[%s116_s14 + $0x28] sm:$0xff] %v203_v19 }
  0x4f   : > { %212 = vst [vmem:[%s116_s14 + $0x30] sm:$0xff] %v204_v20 }
  0x50   : > { %213 = vst [vmem:[%s116_s14 + $0x38] sm:$0xff] %v205_v21 }
  0x51 PF: > { %s11_s6 = sadd.s32 1, %s301_s6  }
  0x52   : > { %p8_p4 = scmp.ge.s32.totalorder %s11_s6, 4  }
  0x54   :  { %10 = sbr.rel (!%p8_p4) target bundleno = 1 (0x1), region = 54 }

// kernel: _lambda_.14
= control target key start
LH: loop header
LB: loop body
LE: loop exit
PB: predicated region body
PF: predicated region fallthrough
CT: control target
= control target key end

     0   :  { %s630_s12 = smov 0   ;;  %s632_s13 = smov 0   ;;  %s693_s0 = inlined_call_operand.vmem [shape: bf16[128,128], index: 0, kind: input, shape index: {}]   ;;  %s694_s1 = inlined_call_operand.vmem [shape: bf16[128,128], index: 1, kind: input, shape index: {}]   ;;  %s695_s2 = inlined_call_operand.vmem [shape: f32[1,128], index: 2, kind: input, shape index: {}]   ;;  %s696_s3 = inlined_call_operand.vmem [shape: f32[128,128], index: 3, kind: output, shape index: {}]  }
   0x1   :  { %s634_s14 = smov 0  }
   0x2 LB: > { %s25_s15 = sadd.s32 1, %s604_s13  ;;  %p470_p0 = scmp.ge.s32.totalorder %s608_s14, 1  ;;  %s608_s14 = sphi %s634_s14, %s13_s14   ;;  %s604_s13 = sphi %s632_s13, %s698_s13   ;;  %s600_s12 = sphi %s630_s12, %s697_s12  }
   0x3   : > { %p27_p1 = scmp.ge.s32.totalorder %s25_s15, 2  ;;  %p169_p2 = scmp.lt.s32.totalorder %s608_s14, 3 }
   0x5   : > { %s700_s15 = smov (%p27_p1, %s25_s15), 0  ;;  %p170_p3 = pnand %p470_p0, %p169_p2 }
   0x6   : > { %s471_s24 = sshll.u32 (!%p170_p3), %s600_s12, 3 }
   0x7   : > { %173 = sbr.rel (%p170_p3) target bundleno = 189 (0xbd), region = 32  ;;  %p204_p4 = scmp.lt.s32.totalorder (!%p170_p3), %s471_s24, 15 }
   0xc   : > { %v536_v0 = vld [vmem:[%s694_s1 + $0x38] sm:$0xff]  ;;  %v535_v1 = vld [vmem:[%s694_s1 + $0x30] sm:$0xff]  ;;  %v534_v2 = vld [vmem:[%s694_s1 + $0x28] sm:$0xff]  ;;  %s702_s24 = smov (!%p204_p4, %s471_s24), 15 }
   0xd   : > { %325 = vmatpush.bf16.msra.mxu0 %v536_v0  ;;  %537 = vmatpush.bf16.msra.mxu1 %v536_v0  ;;  %v533_v3 = vld [vmem:[%s694_s1 + $0x20] sm:$0xff]  ;;  %v532_v4 = vld [vmem:[%s694_s1 + $0x18] sm:$0xff]  ;;  %v531_v5 = vld [vmem:[%s694_s1 + $0x10] sm:$0xff]  ;;  %s472_s4 = sshll.u32 %s702_s24, 2  ;;  %s474_s10 = sshll.u32 %s702_s24, 3 }
   0xe   : > { %538 = vmatpush.bf16.msra.mxu2 %v536_v0  ;;  %539 = vmatpush.bf16.msra.mxu3 %v536_v0  ;;  %v530_v6 = vld [vmem:[%s694_s1 + $0x8] sm:$0xff]  ;;  %v529_v7 = vld [vmem:[%s694_s1] sm:$0xff]  ;;  %s207_s9 = scalar_lea.vmem %s693_s0, %s472_s4  ;;  %s223_s18 = scalar_lea.vmem %s696_s3, %s474_s10 }
   0xf   : > { %v525_v8 = vld [vmem:[%s207_s9] sm:$0xff]  ;;  %v526_v9 = vld [vmem:[%s207_s9 + $0x8] sm:$0xff]  ;;  %v527_v10 = vld [vmem:[%s207_s9 + $0x10] sm:$0xff] }
  0x10   : > { %v528_v11 = vld [vmem:[%s207_s9 + $0x18] sm:$0xff]  ;;  %v585_v12 = vld [vmem:[%s695_s2] ss:$0 sm:$0xff] }
  0x11   : > { %326 = vmatpush.bf16.msra.mxu0 %v535_v1  ;;  %540 = vmatpush.bf16.msra.mxu1 %v535_v1 }
  0x12   : > { %541 = vmatpush.bf16.msra.mxu2 %v535_v1  ;;  %542 = vmatpush.bf16.msra.mxu3 %v535_v1 }
  0x15   : > { %327 = vmatpush.bf16.msra.mxu0 %v534_v2  ;;  %543 = vmatpush.bf16.msra.mxu1 %v534_v2 }
  0x16   : > { %544 = vmatpush.bf16.msra.mxu2 %v534_v2  ;;  %545 = vmatpush.bf16.msra.mxu3 %v534_v2 }
  0x19   : > { %328 = vmatpush.bf16.msra.mxu0 %v533_v3  ;;  %546 = vmatpush.bf16.msra.mxu1 %v533_v3 }
  0x1a   : > { %547 = vmatpush.bf16.msra.mxu2 %v533_v3  ;;  %548 = vmatpush.bf16.msra.mxu3 %v533_v3 }
  0x1d   : > { %329 = vmatpush.bf16.msra.mxu0 %v532_v4  ;;  %549 = vmatpush.bf16.msra.mxu1 %v532_v4 }
  0x1e   : > { %550 = vmatpush.bf16.msra.mxu2 %v532_v4  ;;  %551 = vmatpush.bf16.msra.mxu3 %v532_v4 }
  0x21   : > { %330 = vmatpush.bf16.msra.mxu0 %v531_v5  ;;  %552 = vmatpush.bf16.msra.mxu1 %v531_v5 }
  0x22   : > { %553 = vmatpush.bf16.msra.mxu2 %v531_v5  ;;  %554 = vmatpush.bf16.msra.mxu3 %v531_v5 }
  0x25   : > { %331 = vmatpush.bf16.msra.mxu0 %v530_v6  ;;  %555 = vmatpush.bf16.msra.mxu1 %v530_v6 }
  0x26   : > { %556 = vmatpush.bf16.msra.mxu2 %v530_v6  ;;  %557 = vmatpush.bf16.msra.mxu3 %v530_v6 }
  0x29   : > { %332 = vmatpush.bf16.msra.mxu0 %v529_v7  ;;  %558 = vmatpush.bf16.msra.mxu1 %v529_v7 }
  0x2a   : > { %559 = vmatpush.bf16.msra.mxu2 %v529_v7  ;;  %560 = vmatpush.bf16.msra.mxu3 %v529_v7 }
  0x2c   : > { %333 = vmatmul.bf16.vlgmr.msra.gmra.mxu0 %v525_v8  ;;  %338 = vmatmul.bf16.vlgmr.msra.gmra.mxu1 %v526_v9 }
  0x2d   : > { %343 = vmatmul.bf16.vlgmr.msra.gmra.mxu2 %v527_v10  ;;  %348 = vmatmul.bf16.vlgmr.msra.gmra.mxu3 %v528_v11 }
  0xa9   : > { %v334_v13 = vpop.f32.mrf.mxu0  ;;  %v339_v14 = vpop.f32.mrf.mxu1 }
  0xaa   : > { %v335_v15 = vadd.f32 %v585_v12, %v334_v13  ;;  %v340_v16 = vadd.f32 %v585_v12, %v339_v14 }
  0xac   : > { %354 = vst [vmem:[%s223_s18] sm:$0xff] %v335_v15 }
  0xad   : > { %356 = vst [vmem:[%s223_s18 + $0x10] sm:$0xff] %v340_v16 }
  0xb0   : > { %v344_v17 = vpop.f32.mrf.mxu2  ;;  %v349_v18 = vpop.f32.mrf.mxu3 }
  0xb1   : > { %v345_v19 = vadd.f32 %v585_v12, %v344_v17  ;;  %v350_v20 = vadd.f32 %v585_v12, %v349_v18  ;;  %v336_v21 = vpop.f32.mrf.mxu0  ;;  %v341_v22 = vpop.f32.mrf.mxu1 }
  0xb2   : > { %v337_v23 = vadd.f32 %v585_v12, %v336_v21  ;;  %v342_v24 = vadd.f32 %v585_v12, %v341_v22 }
  0xb3   : > { %358 = vst [vmem:[%s223_s18 + $0x20] sm:$0xff] %v345_v19 }
  0xb4   : > { %360 = vst [vmem:[%s223_s18 + $0x30] sm:$0xff] %v350_v20 }
  0xb5   : > { %355 = vst [vmem:[%s223_s18 + $0x8] sm:$0xff] %v337_v23 }
  0xb6   : > { %357 = vst [vmem:[%s223_s18 + $0x18] sm:$0xff] %v342_v24 }
  0xb8   : > { %v346_v25 = vpop.f32.mrf.mxu2  ;;  %v351_v26 = vpop.f32.mrf.mxu3 }
  0xb9   : > { %v347_v27 = vadd.f32 %v585_v12, %v346_v25  ;;  %v352_v28 = vadd.f32 %v585_v12, %v351_v26 }
  0xbb   : > { %359 = vst [vmem:[%s223_s18 + $0x28] sm:$0xff] %v347_v27 }
  0xbc   : > { %361 = vst [vmem:[%s223_s18 + $0x38] sm:$0xff] %v352_v28 }
  0xbd PF: > { %s13_s14 = sadd.s32 1, %s608_s14   ;;  %s697_s12 = smov %s604_s13 }
  0xbe   : > { %p10_p5 = scmp.ge.s32.totalorder %s13_s14, 4   ;;  %s698_s13 = smov %s700_s15 }
  0xc0   :  { %12 = sbr.rel (!%p10_p5) target bundleno = 2 (0x2), region = 68 }

// kernel: _lambda_.15
= control target key start
LH: loop header
LB: loop body
LE: loop exit
PB: predicated region body
PF: predicated region fallthrough
CT: control target
= control target key end

     0   :  { %s1574_s15 = smov 0   ;;  %s1576_s16 = smov 0   ;;  %s1837_s0 = inlined_call_operand.vmem [shape: bf16[512,256], index: 0, kind: input, shape index: {}]   ;;  %s1838_s1 = inlined_call_operand.vmem [shape: bf16[256,128], index: 1, kind: input, shape index: {}]   ;;  %s1839_s2 = inlined_call_operand.vmem [shape: f32[1,128], index: 2, kind: input, shape index: {}]   ;;  %s1840_s3 = inlined_call_operand.vmem [shape: f32[512,128], index: 3, kind: input, shape index: {}]   ;;  %s1841_s4 = inlined_call_operand.vmem [shape: f32[512,128], index: 4, kind: output, shape index: {}]  }
   0x1   :  { %s1578_s17 = smov 0  }
   0x2 LB: > { %s26_s18 = sadd.s32 1, %s1543_s16  ;;  %p1137_p0 = scmp.ge.s32.totalorder %s1547_s17, 1  ;;  %s1547_s17 = sphi %s1578_s17, %s14_s17   ;;  %s1543_s16 = sphi %s1576_s16, %s1843_s16   ;;  %s1539_s15 = sphi %s1574_s15, %s1842_s15  }
   0x3   : > { %p28_p1 = scmp.ge.s32.totalorder %s26_s18, 2  ;;  %p211_p2 = scmp.lt.s32.totalorder %s1547_s17, 3 }
   0x5   : > { %s1845_s18 = smov (%p28_p1, %s26_s18), 0  ;;  %p212_p3 = pnand %p1137_p0, %p211_p2 }
   0x6   : > { %s1138_s5 = sshll.u32 (!%p212_p3), %s1539_s15, 5 }
   0x7   : > { %215 = sbr.rel (%p212_p3) target bundleno = 314 (0x13a), region = 36  ;;  %p257_p4 = scmp.lt.s32.totalorder (!%p212_p3), %s1138_s5, 63 }
   0xc   : > { %v1411_v0 = vld [vmem:[%s1838_s1 + $0x38] sm:$0xff]  ;;  %v1410_v2 = vld [vmem:[%s1838_s1 + $0x30] sm:$0xff]  ;;  %v1409_v4 = vld [vmem:[%s1838_s1 + $0x28] sm:$0xff]  ;;  %s1847_s5 = smov (!%p257_p4, %s1138_s5), 63 }
   0xd   : > { %v1419_v1 = vld [vmem:[%s1838_s1 + $0x78] sm:$0xff]  ;;  %612 = vmatpush.bf16.msra.mxu0 %v1411_v0  ;;  %1420 = vmatpush.bf16.msra.mxu2 %v1411_v0  ;;  %v1418_v3 = vld [vmem:[%s1838_s1 + $0x70] sm:$0xff]  ;;  %v1417_v5 = vld [vmem:[%s1838_s1 + $0x68] sm:$0xff]  ;;  %s1631_s21 = sshll.u32 %s1847_s5, 3 }
   0xe   : > { %701 = vmatpush.bf16.msra.mxu1 %v1419_v1  ;;  %1428 = vmatpush.bf16.msra.mxu3 %v1419_v1  ;;  %v1408_v6 = vld [vmem:[%s1838_s1 + $0x20] sm:$0xff]  ;;  %v1407_v8 = vld [vmem:[%s1838_s1 + $0x18] sm:$0xff]  ;;  %v1406_v10 = vld [vmem:[%s1838_s1 + $0x10] sm:$0xff]  ;;  %s1640_s26 = scalar_lea.vmem %s1837_s0, %s1631_s21  ;;  %s1726_s11 = scalar_lea.vmem %s1840_s3, %s1631_s21 }
   0xf   : > { %v1416_v7 = vld [vmem:[%s1838_s1 + $0x60] sm:$0xff]  ;;  %v1415_v9 = vld [vmem:[%s1838_s1 + $0x58] sm:$0xff]  ;;  %v1414_v11 = vld [vmem:[%s1838_s1 + $0x50] sm:$0xff]  ;;  %s1734_s14 = scalar_lea.vmem %s1841_s4, %s1631_s21 }
  0x10   : > { %v1405_v12 = vld [vmem:[%s1838_s1 + $0x8] sm:$0xff]  ;;  %v1404_v14 = vld [vmem:[%s1838_s1] sm:$0xff]  ;;  %v1155_v28 = vld [vmem:[%s1640_s26 + $0x10] sm:$0xf] }
  0x11   : > { %613 = vmatpush.bf16.msra.mxu0 %v1410_v2  ;;  %1421 = vmatpush.bf16.msra.mxu2 %v1410_v2  ;;  %v1413_v13 = vld [vmem:[%s1838_s1 + $0x48] sm:$0xff]  ;;  %v1412_v15 = vld [vmem:[%s1838_s1 + $0x40] sm:$0xff]  ;;  %v1375_v29 = vld [vmem:[%s1640_s26 + $0x14] sm:$0xf0] }
  0x12   : > { %702 = vmatpush.bf16.msra.mxu1 %v1418_v3  ;;  %1429 = vmatpush.bf16.msra.mxu3 %v1418_v3  ;;  %v1147_v16 = vld [vmem:[%s1640_s26] sm:$0xf]  ;;  %v1373_v17 = vld [vmem:[%s1640_s26 + $0x4] sm:$0xf0]  ;;  %v1372_v20 = vld [vmem:[%s1640_s26 + $0x4] sm:$0xf]  ;;  %v1156_v36 = vor.u32 %v1375_v29, %v1155_v28 }
  0x13   : > { %v1211_v18 = vld [vmem:[%s1640_s26 + $0x80] sm:$0xf]  ;;  %v1389_v19 = vld [vmem:[%s1640_s26 + $0x84] sm:$0xf0]  ;;  %v1149_v21 = vld [vmem:[%s1640_s26 + $0x8] sm:$0xf0]  ;;  %v1148_v24 = vor.u32 %v1373_v17, %v1147_v16 }
  0x14   : > { %v1388_v22 = vld [vmem:[%s1640_s26 + $0x84] sm:$0xf]  ;;  %v1213_v23 = vld [vmem:[%s1640_s26 + $0x88] sm:$0xf0]  ;;  %v1212_v25 = vor.u32 %v1389_v19, %v1211_v18  ;;  %v1152_v26 = vor.u32 %v1372_v20, %v1149_v21  ;;  %v1219_v30 = vld [vmem:[%s1640_s26 + $0x90] sm:$0xf] }
  0x15   : > { %614 = vmatpush.bf16.msra.mxu0 %v1409_v4  ;;  %1422 = vmatpush.bf16.msra.mxu2 %v1409_v4  ;;  %v1216_v27 = vor.u32 %v1388_v22, %v1213_v23  ;;  %v1391_v31 = vld [vmem:[%s1640_s26 + $0x94] sm:$0xf0]  ;;  %v1374_v32 = vld [vmem:[%s1640_s26 + $0x14] sm:$0xf]  ;;  %v1157_v33 = vld [vmem:[%s1640_s26 + $0x18] sm:$0xf0] }
  0x16   : > { %703 = vmatpush.bf16.msra.mxu1 %v1417_v5  ;;  %1430 = vmatpush.bf16.msra.mxu3 %v1417_v5  ;;  %v1390_v34 = vld [vmem:[%s1640_s26 + $0x94] sm:$0xf]  ;;  %v1221_v35 = vld [vmem:[%s1640_s26 + $0x98] sm:$0xf0]  ;;  %v1220_v37 = vor.u32 %v1391_v31, %v1219_v30  ;;  %v1160_v38 = vor.u32 %v1374_v32, %v1157_v33  ;;  %v1163_v40 = vld [vmem:[%s1640_s26 + $0x20] sm:$0xf] }
  0x17   : > { %v1224_v39 = vor.u32 %v1390_v34, %v1221_v35  ;;  %v1377_v41 = vld [vmem:[%s1640_s26 + $0x24] sm:$0xf0]  ;;  %v1227_v42 = vld [vmem:[%s1640_s26 + $0xa0] sm:$0xf]  ;;  %v1376_v44 = vld [vmem:[%s1640_s26 + $0x24] sm:$0xf] }
  0x18   : > { %v1393_v43 = vld [vmem:[%s1640_s26 + $0xa4] sm:$0xf0]  ;;  %v1165_v45 = vld [vmem:[%s1640_s26 + $0x28] sm:$0xf0]  ;;  %v1392_v46 = vld [vmem:[%s1640_s26 + $0xa4] sm:$0xf]  ;;  %v1164_v48 = vor.u32 %v1377_v41, %v1163_v40 }
  0x19   : > { %615 = vmatpush.bf16.msra.mxu0 %v1408_v6  ;;  %1423 = vmatpush.bf16.msra.mxu2 %v1408_v6  ;;  %v1229_v47 = vld [vmem:[%s1640_s26 + $0xa8] sm:$0xf0]  ;;  %v1228_v49 = vor.u32 %v1393_v43, %v1227_v42  ;;  %v1168_v50 = vor.u32 %v1376_v44, %v1165_v45  ;;  %v1171_v52 = vld [vmem:[%s1640_s26 + $0x30] sm:$0xf]  ;;  %v1379_v53 = vld [vmem:[%s1640_s26 + $0x34] sm:$0xf0] }
  0x1a   : > { %704 = vmatpush.bf16.msra.mxu1 %v1416_v7  ;;  %1431 = vmatpush.bf16.msra.mxu3 %v1416_v7  ;;  %v1232_v51 = vor.u32 %v1392_v46, %v1229_v47  ;;  %v1235_v54 = vld [vmem:[%s1640_s26 + $0xb0] sm:$0xf]  ;;  %v1395_v55 = vld [vmem:[%s1640_s26 + $0xb4] sm:$0xf0]  ;;  %v1378_v56 = vld [vmem:[%s1640_s26 + $0x34] sm:$0xf]  ;;  %v1172_v60 = vor.u32 %v1379_v53, %v1171_v52 }
  0x1b   : > { %v1173_v57 = vld [vmem:[%s1640_s26 + $0x38] sm:$0xf0]  ;;  %v1394_v58 = vld [vmem:[%s1640_s26 + $0xb4] sm:$0xf]  ;;  %v1236_v61 = vor.u32 %v1395_v55, %v1235_v54  ;;  %v1179_v0 = vld [vmem:[%s1640_s26 + $0x40] sm:$0xf] }
  0x1c   : > { %v1237_v59 = vld [vmem:[%s1640_s26 + $0xb8] sm:$0xf0]  ;;  %v1176_v62 = vor.u32 %v1378_v56, %v1173_v57  ;;  %v1381_v1 = vld [vmem:[%s1640_s26 + $0x44] sm:$0xf0]  ;;  %v1243_v2 = vld [vmem:[%s1640_s26 + $0xc0] sm:$0xf] }
  0x1d   : > { %616 = vmatpush.bf16.msra.mxu0 %v1407_v8  ;;  %1424 = vmatpush.bf16.msra.mxu2 %v1407_v8  ;;  %v1240_v63 = vor.u32 %v1394_v58, %v1237_v59  ;;  %v1397_v3 = vld [vmem:[%s1640_s26 + $0xc4] sm:$0xf0]  ;;  %v1380_v4 = vld [vmem:[%s1640_s26 + $0x44] sm:$0xf]  ;;  %v1181_v5 = vld [vmem:[%s1640_s26 + $0x48] sm:$0xf0]  ;;  %v1180_v8 = vor.u32 %v1381_v1, %v1179_v0 }
  0x1e   : > { %705 = vmatpush.bf16.msra.mxu1 %v1415_v9  ;;  %1432 = vmatpush.bf16.msra.mxu3 %v1415_v9  ;;  %v1396_v6 = vld [vmem:[%s1640_s26 + $0xc4] sm:$0xf]  ;;  %v1245_v7 = vld [vmem:[%s1640_s26 + $0xc8] sm:$0xf0]  ;;  %v1244_v9 = vor.u32 %v1397_v3, %v1243_v2  ;;  %v1382_v16 = vld [vmem:[%s1640_s26 + $0x54] sm:$0xf] }
  0x1f   : > { %v1189_v17 = vld [vmem:[%s1640_s26 + $0x58] sm:$0xf0]  ;;  %v1398_v18 = vld [vmem:[%s1640_s26 + $0xd4] sm:$0xf]  ;;  %v1384_v28 = vld [vmem:[%s1640_s26 + $0x64] sm:$0xf] }
  0x20   : > { %v1253_v19 = vld [vmem:[%s1640_s26 + $0xd8] sm:$0xf0]  ;;  %v1192_v22 = vor.u32 %v1382_v16, %v1189_v17  ;;  %v1197_v29 = vld [vmem:[%s1640_s26 + $0x68] sm:$0xf0]  ;;  %v1400_v30 = vld [vmem:[%s1640_s26 + $0xe4] sm:$0xf] }
  0x21   : > { %617 = vmatpush.bf16.msra.mxu0 %v1406_v10  ;;  %1425 = vmatpush.bf16.msra.mxu2 %v1406_v10  ;;  %v1184_v10 = vor.u32 %v1380_v4, %v1181_v5  ;;  %v1256_v23 = vor.u32 %v1398_v18, %v1253_v19  ;;  %v1261_v31 = vld [vmem:[%s1640_s26 + $0xe8] sm:$0xf0]  ;;  %v1200_v34 = vor.u32 %v1384_v28, %v1197_v29  ;;  %v1386_v40 = vld [vmem:[%s1640_s26 + $0x74] sm:$0xf]  ;;  %v1205_v41 = vld [vmem:[%s1640_s26 + $0x78] sm:$0xf0] }
  0x22   : > { %706 = vmatpush.bf16.msra.mxu1 %v1414_v11  ;;  %1433 = vmatpush.bf16.msra.mxu3 %v1414_v11  ;;  %v1248_v11 = vor.u32 %v1396_v6, %v1245_v7  ;;  %v1264_v35 = vor.u32 %v1400_v30, %v1261_v31  ;;  %v1402_v42 = vld [vmem:[%s1640_s26 + $0xf4] sm:$0xf]  ;;  %v1269_v43 = vld [vmem:[%s1640_s26 + $0xf8] sm:$0xf0]  ;;  %v1208_v46 = vor.u32 %v1386_v40, %v1205_v41  ;;  %v870_v7 = vld [vmem:[%s1726_s11 + $0x80] sm:$0xff] }
  0x23   : > { %v1272_v47 = vor.u32 %v1402_v42, %v1269_v43  ;;  %v856_v31 = vld [vmem:[%s1726_s11 + $0x10] sm:$0xff] }
  0x24   : > { %v872_v43 = vld [vmem:[%s1726_s11 + $0x90] sm:$0xff] }
  0x25   : > { %618 = vmatpush.bf16.msra.mxu0 %v1405_v12  ;;  %1426 = vmatpush.bf16.msra.mxu2 %v1405_v12  ;;  %v1187_v12 = vld [vmem:[%s1640_s26 + $0x50] sm:$0xf] }
  0x26   : > { %707 = vmatpush.bf16.msra.mxu1 %v1413_v13  ;;  %1434 = vmatpush.bf16.msra.mxu3 %v1413_v13  ;;  %v1383_v13 = vld [vmem:[%s1640_s26 + $0x54] sm:$0xf0] }
  0x27   : > { %v1188_v20 = vor.u32 %v1383_v13, %v1187_v12  ;;  %v855_v13 = vld [vmem:[%s1726_s11 + $0x8] sm:$0xff] }
  0x29   : > { %619 = vmatpush.bf16.msra.mxu0 %v1404_v14  ;;  %1427 = vmatpush.bf16.msra.mxu2 %v1404_v14  ;;  %v1251_v14 = vld [vmem:[%s1640_s26 + $0xd0] sm:$0xf] }
  0x2a   : > { %708 = vmatpush.bf16.msra.mxu1 %v1412_v15  ;;  %1435 = vmatpush.bf16.msra.mxu3 %v1412_v15  ;;  %v1399_v15 = vld [vmem:[%s1640_s26 + $0xd4] sm:$0xf0] }
  0x2b   : > { %v1252_v21 = vor.u32 %v1399_v15, %v1251_v14 }
  0x2c   : > { %620 = vmatmul.bf16.vlgmr.msra.gmra.mxu0 %v1148_v24  ;;  %660 = vmatmul.bf16.vlgmr.msra.gmra.mxu2 %v1212_v25  ;;  %v1195_v24 = vld [vmem:[%s1640_s26 + $0x60] sm:$0xf]  ;;  %v1385_v25 = vld [vmem:[%s1640_s26 + $0x64] sm:$0xf0] }
  0x2d   : > { %709 = vmatmul.bf16.vlgmr.msra.gmra.mxu1 %v1152_v26  ;;  %749 = vmatmul.bf16.vlgmr.msra.gmra.mxu3 %v1216_v27  ;;  %v1259_v26 = vld [vmem:[%s1640_s26 + $0xe0] sm:$0xf]  ;;  %v1401_v27 = vld [vmem:[%s1640_s26 + $0xe4] sm:$0xf0]  ;;  %v1196_v32 = vor.u32 %v1385_v25, %v1195_v24 }
  0x2e   : > { %v1260_v33 = vor.u32 %v1401_v27, %v1259_v26  ;;  %v871_v25 = vld [vmem:[%s1726_s11 + $0x88] sm:$0xff] }
  0x3c   : > { %625 = vmatmul.bf16.gmra.mxu0 %v1156_v36  ;;  %665 = vmatmul.bf16.gmra.mxu2 %v1220_v37  ;;  %v1203_v36 = vld [vmem:[%s1640_s26 + $0x70] sm:$0xf]  ;;  %v1387_v37 = vld [vmem:[%s1640_s26 + $0x74] sm:$0xf0] }
  0x3d   : > { %714 = vmatmul.bf16.gmra.mxu1 %v1160_v38  ;;  %754 = vmatmul.bf16.gmra.mxu3 %v1224_v39  ;;  %v1267_v38 = vld [vmem:[%s1640_s26 + $0xf0] sm:$0xf]  ;;  %v1403_v39 = vld [vmem:[%s1640_s26 + $0xf4] sm:$0xf0]  ;;  %v1204_v44 = vor.u32 %v1387_v37, %v1203_v36 }
  0x3e   : > { %v1268_v45 = vor.u32 %v1403_v39, %v1267_v38 }
  0x4c   : > { %630 = vmatmul.bf16.gmra.mxu0 %v1164_v48  ;;  %670 = vmatmul.bf16.gmra.mxu2 %v1228_v49  ;;  %v1718_v48 = vld [vmem:[%s1839_s2] ss:$0 sm:$0xff] }
  0x4d   : > { %719 = vmatmul.bf16.gmra.mxu1 %v1168_v50  ;;  %759 = vmatmul.bf16.gmra.mxu3 %v1232_v51 }
  0x5c   : > { %635 = vmatmul.bf16.gmra.mxu0 %v1172_v60  ;;  %675 = vmatmul.bf16.gmra.mxu2 %v1236_v61  ;;  %v854_v61 = vld [vmem:[%s1726_s11] sm:$0xff] }
  0x5d   : > { %724 = vmatmul.bf16.gmra.mxu1 %v1176_v62  ;;  %764 = vmatmul.bf16.gmra.mxu3 %v1240_v63 }
  0x6c   : > { %640 = vmatmul.bf16.gmra.mxu0 %v1180_v8  ;;  %680 = vmatmul.bf16.gmra.mxu2 %v1244_v9 }
  0x6d   : > { %729 = vmatmul.bf16.gmra.mxu1 %v1184_v10  ;;  %769 = vmatmul.bf16.gmra.mxu3 %v1248_v11 }
  0x7c   : > { %645 = vmatmul.bf16.gmra.mxu0 %v1188_v20  ;;  %685 = vmatmul.bf16.gmra.mxu2 %v1252_v21 }
  0x7d   : > { %734 = vmatmul.bf16.gmra.mxu1 %v1192_v22  ;;  %774 = vmatmul.bf16.gmra.mxu3 %v1256_v23 }
  0x8c   : > { %650 = vmatmul.bf16.gmra.mxu0 %v1196_v32  ;;  %690 = vmatmul.bf16.gmra.mxu2 %v1260_v33 }
  0x8d   : > { %739 = vmatmul.bf16.gmra.mxu1 %v1200_v34  ;;  %779 = vmatmul.bf16.gmra.mxu3 %v1264_v35 }
  0x9c   : > { %655 = vmatmul.bf16.gmra.mxu0 %v1204_v44  ;;  %695 = vmatmul.bf16.gmra.mxu2 %v1268_v45 }
  0x9d   : > { %744 = vmatmul.bf16.gmra.mxu1 %v1208_v46  ;;  %784 = vmatmul.bf16.gmra.mxu3 %v1272_v47 }
  0xa9   : > { %v621_v49 = vpop.f32.mrf.mxu0 }
  0xaa   : > { %v622_v50 = vadd.f32 %v1718_v48, %v621_v49  ;;  %v710_v51 = vpop.f32.mrf.mxu1 }
  0xac   : > { %v711_v52 = vadd.f32 %v710_v51, %v622_v50  ;;  %v857_v50 = vld [vmem:[%s1726_s11 + $0x18] sm:$0xff] }
  0xae   : > { %1461 = vtanh.f32 %v711_v52 }
  0xaf   : > { %v661_v53 = vpop.f32.mrf.mxu2 }
  0xb0   : > { %v662_v54 = vadd.f32 %v1718_v48, %v661_v53  ;;  %v750_v55 = vpop.f32.mrf.mxu3 }
  0xb1   : > { %v623_v56 = vpop.f32.mrf.mxu0 }
  0xb2   : > { %v751_v57 = vadd.f32 %v750_v55, %v662_v54  ;;  %v624_v58 = vadd.f32 %v1718_v48, %v623_v56  ;;  %v712_v59 = vpop.f32.mrf.mxu1 }
  0xb4   : > { %v1462_v60 = vpop.eup %1461  ;;  %1463 = vtanh.f32 %v751_v57  ;;  %v713_v62 = vadd.f32 %v712_v59, %v624_v58 }
  0xb5   : > { %v822_v63 = vmul.f32 2.0, %v1462_v60 }
  0xb6   : > { %1465 = vtanh.f32 %v713_v62  ;;  %v873_v62 = vld [vmem:[%s1726_s11 + $0x98] sm:$0xff] }
  0xb7   : > { %v886_v0 = vadd.f32 %v854_v61, %v822_v63  ;;  %v663_v1 = vpop.f32.mrf.mxu2 }
  0xb8   : > { %v664_v2 = vadd.f32 %v1718_v48, %v663_v1  ;;  %v752_v3 = vpop.f32.mrf.mxu3 }
  0xb9   : > { %v1337_v4 = vclamps-f32 %v886_v0, 1.0  ;;  %v626_v5 = vpop.f32.mrf.mxu0 }
  0xba   : > { %v1464_v6 = vpop.eup %1463  ;;  %v753_v8 = vadd.f32 %v752_v3, %v664_v2  ;;  %v627_v9 = vadd.f32 %v1718_v48, %v626_v5  ;;  %v715_v10 = vpop.f32.mrf.mxu1 }
  0xbb   : > { %982 = vst [vmem:[%s1734_s14] sm:$0xff] %v1337_v4  ;;  %v838_v11 = vmul.f32 2.0, %v1464_v6  ;;  %v858_v4 = vld [vmem:[%s1726_s11 + $0x20] sm:$0xff] }
  0xbc   : > { %v1466_v12 = vpop.eup %1465  ;;  %1467 = vtanh.f32 %v753_v8  ;;  %v716_v14 = vadd.f32 %v715_v10, %v627_v9 }
  0xbd   : > { %v902_v15 = vadd.f32 %v870_v7, %v838_v11  ;;  %v823_v16 = vmul.f32 2.0, %v1466_v12 }
  0xbe   : > { %1469 = vtanh.f32 %v716_v14 }
  0xbf   : > { %v1353_v17 = vclamps-f32 %v902_v15, 1.0  ;;  %v887_v18 = vadd.f32 %v855_v13, %v823_v16  ;;  %v666_v19 = vpop.f32.mrf.mxu2  ;;  %v874_v16 = vld [vmem:[%s1726_s11 + $0xa0] sm:$0xff] }
  0xc0   : > { %v667_v20 = vadd.f32 %v1718_v48, %v666_v19  ;;  %v755_v21 = vpop.f32.mrf.mxu3 }
  0xc1   : > { %998 = vst [vmem:[%s1734_s14 + $0x80] sm:$0xff] %v1353_v17  ;;  %v1338_v22 = vclamps-f32 %v887_v18, 1.0  ;;  %v628_v23 = vpop.f32.mrf.mxu0 }
  0xc2   : > { %v1468_v24 = vpop.eup %1467  ;;  %v756_v26 = vadd.f32 %v755_v21, %v667_v20  ;;  %v629_v27 = vadd.f32 %v1718_v48, %v628_v23  ;;  %v717_v28 = vpop.f32.mrf.mxu1 }
  0xc3   : > { %983 = vst [vmem:[%s1734_s14 + $0x8] sm:$0xff] %v1338_v22  ;;  %v839_v29 = vmul.f32 2.0, %v1468_v24  ;;  %v859_v22 = vld [vmem:[%s1726_s11 + $0x28] sm:$0xff] }
  0xc4   : > { %v1470_v30 = vpop.eup %1469  ;;  %1471 = vtanh.f32 %v756_v26  ;;  %v718_v32 = vadd.f32 %v717_v28, %v629_v27 }
  0xc5   : > { %v903_v33 = vadd.f32 %v871_v25, %v839_v29  ;;  %v824_v34 = vmul.f32 2.0, %v1470_v30 }
  0xc6   : > { %1473 = vtanh.f32 %v718_v32 }
  0xc7   : > { %v1354_v35 = vclamps-f32 %v903_v33, 1.0  ;;  %v888_v36 = vadd.f32 %v856_v31, %v824_v34  ;;  %v668_v37 = vpop.f32.mrf.mxu2  ;;  %v875_v34 = vld [vmem:[%s1726_s11 + $0xa8] sm:$0xff] }
  0xc8   : > { %v669_v38 = vadd.f32 %v1718_v48, %v668_v37  ;;  %v757_v39 = vpop.f32.mrf.mxu3 }
  0xc9   : > { %999 = vst [vmem:[%s1734_s14 + $0x88] sm:$0xff] %v1354_v35  ;;  %v1339_v40 = vclamps-f32 %v888_v36, 1.0  ;;  %v631_v41 = vpop.f32.mrf.mxu0 }
  0xca   : > { %v1472_v42 = vpop.eup %1471  ;;  %v758_v44 = vadd.f32 %v757_v39, %v669_v38  ;;  %v632_v45 = vadd.f32 %v1718_v48, %v631_v41  ;;  %v720_v46 = vpop.f32.mrf.mxu1 }
  0xcb   : > { %984 = vst [vmem:[%s1734_s14 + $0x10] sm:$0xff] %v1339_v40  ;;  %v840_v47 = vmul.f32 2.0, %v1472_v42  ;;  %v860_v40 = vld [vmem:[%s1726_s11 + $0x30] sm:$0xff] }
  0xcc   : > { %v1474_v49 = vpop.eup %1473  ;;  %1475 = vtanh.f32 %v758_v44  ;;  %v721_v51 = vadd.f32 %v720_v46, %v632_v45 }
  0xcd   : > { %v904_v52 = vadd.f32 %v872_v43, %v840_v47  ;;  %v825_v53 = vmul.f32 2.0, %v1474_v49 }
  0xce   : > { %1477 = vtanh.f32 %v721_v51 }
  0xcf   : > { %v1355_v54 = vclamps-f32 %v904_v52, 1.0  ;;  %v889_v55 = vadd.f32 %v857_v50, %v825_v53  ;;  %v671_v56 = vpop.f32.mrf.mxu2  ;;  %v876_v53 = vld [vmem:[%s1726_s11 + $0xb0] sm:$0xff] }
  0xd0   : > { %v672_v57 = vadd.f32 %v1718_v48, %v671_v56  ;;  %v760_v58 = vpop.f32.mrf.mxu3 }
  0xd1   : > { %1000 = vst [vmem:[%s1734_s14 + $0x90] sm:$0xff] %v1355_v54  ;;  %v1340_v59 = vclamps-f32 %v889_v55, 1.0  ;;  %v633_v60 = vpop.f32.mrf.mxu0 }
  0xd2   : > { %v1476_v61 = vpop.eup %1475  ;;  %v761_v63 = vadd.f32 %v760_v58, %v672_v57  ;;  %v634_v0 = vadd.f32 %v1718_v48, %v633_v60  ;;  %v722_v1 = vpop.f32.mrf.mxu1 }
  0xd3   : > { %985 = vst [vmem:[%s1734_s14 + $0x18] sm:$0xff] %v1340_v59  ;;  %v841_v2 = vmul.f32 2.0, %v1476_v61  ;;  %v861_v59 = vld [vmem:[%s1726_s11 + $0x38] sm:$0xff] }
  0xd4   : > { %v1478_v3 = vpop.eup %1477  ;;  %1479 = vtanh.f32 %v761_v63  ;;  %v723_v5 = vadd.f32 %v722_v1, %v634_v0 }
  0xd5   : > { %v905_v6 = vadd.f32 %v873_v62, %v841_v2  ;;  %v826_v7 = vmul.f32 2.0, %v1478_v3 }
  0xd6   : > { %1481 = vtanh.f32 %v723_v5 }
  0xd7   : > { %v1356_v8 = vclamps-f32 %v905_v6, 1.0  ;;  %v890_v9 = vadd.f32 %v858_v4, %v826_v7  ;;  %v673_v10 = vpop.f32.mrf.mxu2  ;;  %v877_v7 = vld [vmem:[%s1726_s11 + $0xb8] sm:$0xff] }
  0xd8   : > { %v674_v11 = vadd.f32 %v1718_v48, %v673_v10  ;;  %v762_v12 = vpop.f32.mrf.mxu3 }
  0xd9   : > { %1001 = vst [vmem:[%s1734_s14 + $0x98] sm:$0xff] %v1356_v8  ;;  %v1341_v13 = vclamps-f32 %v890_v9, 1.0  ;;  %v636_v14 = vpop.f32.mrf.mxu0 }
  0xda   : > { %v1480_v15 = vpop.eup %1479  ;;  %v763_v17 = vadd.f32 %v762_v12, %v674_v11  ;;  %v637_v18 = vadd.f32 %v1718_v48, %v636_v14  ;;  %v725_v19 = vpop.f32.mrf.mxu1 }
  0xdb   : > { %986 = vst [vmem:[%s1734_s14 + $0x20] sm:$0xff] %v1341_v13  ;;  %v842_v20 = vmul.f32 2.0, %v1480_v15  ;;  %v862_v13 = vld [vmem:[%s1726_s11 + $0x40] sm:$0xff] }
  0xdc   : > { %v1482_v21 = vpop.eup %1481  ;;  %1483 = vtanh.f32 %v763_v17  ;;  %v726_v23 = vadd.f32 %v725_v19, %v637_v18 }
  0xdd   : > { %v906_v24 = vadd.f32 %v874_v16, %v842_v20  ;;  %v827_v25 = vmul.f32 2.0, %v1482_v21 }
  0xde   : > { %1485 = vtanh.f32 %v726_v23 }
  0xdf   : > { %v1357_v26 = vclamps-f32 %v906_v24, 1.0  ;;  %v891_v27 = vadd.f32 %v859_v22, %v827_v25  ;;  %v676_v28 = vpop.f32.mrf.mxu2  ;;  %v878_v25 = vld [vmem:[%s1726_s11 + $0xc0] sm:$0xff] }
  0xe0   : > { %v677_v29 = vadd.f32 %v1718_v48, %v676_v28  ;;  %v765_v30 = vpop.f32.mrf.mxu3 }
  0xe1   : > { %1002 = vst [vmem:[%s1734_s14 + $0xa0] sm:$0xff] %v1357_v26  ;;  %v1342_v31 = vclamps-f32 %v891_v27, 1.0  ;;  %v638_v32 = vpop.f32.mrf.mxu0 }
  0xe2   : > { %v1484_v33 = vpop.eup %1483  ;;  %v766_v35 = vadd.f32 %v765_v30, %v677_v29  ;;  %v639_v36 = vadd.f32 %v1718_v48, %v638_v32  ;;  %v727_v37 = vpop.f32.mrf.mxu1 }
  0xe3   : > { %987 = vst [vmem:[%s1734_s14 + $0x28] sm:$0xff] %v1342_v31  ;;  %v843_v38 = vmul.f32 2.0, %v1484_v33  ;;  %v863_v31 = vld [vmem:[%s1726_s11 + $0x48] sm:$0xff] }
  0xe4   : > { %v1486_v39 = vpop.eup %1485  ;;  %1487 = vtanh.f32 %v766_v35  ;;  %v728_v41 = vadd.f32 %v727_v37, %v639_v36 }
  0xe5   : > { %v907_v42 = vadd.f32 %v875_v34, %v843_v38  ;;  %v828_v43 = vmul.f32 2.0, %v1486_v39 }
  0xe6   : > { %1489 = vtanh.f32 %v728_v41 }
  0xe7   : > { %v1358_v44 = vclamps-f32 %v907_v42, 1.0  ;;  %v892_v45 = vadd.f32 %v860_v40, %v828_v43  ;;  %v678_v46 = vpop.f32.mrf.mxu2  ;;  %v879_v43 = vld [vmem:[%s1726_s11 + $0xc8] sm:$0xff] }
  0xe8   : > { %v679_v47 = vadd.f32 %v1718_v48, %v678_v46  ;;  %v767_v49 = vpop.f32.mrf.mxu3 }
  0xe9   : > { %1003 = vst [vmem:[%s1734_s14 + $0xa8] sm:$0xff] %v1358_v44  ;;  %v1343_v50 = vclamps-f32 %v892_v45, 1.0  ;;  %v641_v51 = vpop.f32.mrf.mxu0 }
  0xea   : > { %v1488_v52 = vpop.eup %1487  ;;  %v768_v54 = vadd.f32 %v767_v49, %v679_v47  ;;  %v642_v55 = vadd.f32 %v1718_v48, %v641_v51  ;;  %v730_v56 = vpop.f32.mrf.mxu1 }
  0xeb   : > { %988 = vst [vmem:[%s1734_s14 + $0x30] sm:$0xff] %v1343_v50  ;;  %v844_v57 = vmul.f32 2.0, %v1488_v52  ;;  %v864_v50 = vld [vmem:[%s1726_s11 + $0x50] sm:$0xff] }
  0xec   : > { %v1490_v58 = vpop.eup %1489  ;;  %1491 = vtanh.f32 %v768_v54  ;;  %v731_v60 = vadd.f32 %v730_v56, %v642_v55 }
  0xed   : > { %v908_v61 = vadd.f32 %v876_v53, %v844_v57  ;;  %v829_v62 = vmul.f32 2.0, %v1490_v58 }
  0xee   : > { %1493 = vtanh.f32 %v731_v60 }
  0xef   : > { %v1359_v63 = vclamps-f32 %v908_v61, 1.0  ;;  %v893_v0 = vadd.f32 %v861_v59, %v829_v62  ;;  %v681_v1 = vpop.f32.mrf.mxu2  ;;  %v880_v62 = vld [vmem:[%s1726_s11 + $0xd0] sm:$0xff] }
  0xf0   : > { %v682_v2 = vadd.f32 %v1718_v48, %v681_v1  ;;  %v770_v3 = vpop.f32.mrf.mxu3 }
  0xf1   : > { %1004 = vst [vmem:[%s1734_s14 + $0xb0] sm:$0xff] %v1359_v63  ;;  %v1344_v4 = vclamps-f32 %v893_v0, 1.0  ;;  %v643_v5 = vpop.f32.mrf.mxu0 }
  0xf2   : > { %v1492_v6 = vpop.eup %1491  ;;  %v771_v8 = vadd.f32 %v770_v3, %v682_v2  ;;  %v644_v9 = vadd.f32 %v1718_v48, %v643_v5  ;;  %v732_v10 = vpop.f32.mrf.mxu1 }
  0xf3   : > { %989 = vst [vmem:[%s1734_s14 + $0x38] sm:$0xff] %v1344_v4  ;;  %v845_v11 = vmul.f32 2.0, %v1492_v6  ;;  %v865_v4 = vld [vmem:[%s1726_s11 + $0x58] sm:$0xff] }
  0xf4   : > { %v1494_v12 = vpop.eup %1493  ;;  %1495 = vtanh.f32 %v771_v8  ;;  %v733_v14 = vadd.f32 %v732_v10, %v644_v9 }
  0xf5   : > { %v909_v15 = vadd.f32 %v877_v7, %v845_v11  ;;  %v830_v16 = vmul.f32 2.0, %v1494_v12 }
  0xf6   : > { %1497 = vtanh.f32 %v733_v14 }
  0xf7   : > { %v1360_v17 = vclamps-f32 %v909_v15, 1.0  ;;  %v894_v18 = vadd.f32 %v862_v13, %v830_v16  ;;  %v683_v19 = vpop.f32.mrf.mxu2  ;;  %v881_v16 = vld [vmem:[%s1726_s11 + $0xd8] sm:$0xff] }
  0xf8   : > { %v684_v20 = vadd.f32 %v1718_v48, %v683_v19  ;;  %v772_v21 = vpop.f32.mrf.mxu3 }
  0xf9   : > { %1005 = vst [vmem:[%s1734_s14 + $0xb8] sm:$0xff] %v1360_v17  ;;  %v1345_v22 = vclamps-f32 %v894_v18, 1.0  ;;  %v646_v23 = vpop.f32.mrf.mxu0 }
  0xfa   : > { %v1496_v24 = vpop.eup %1495  ;;  %v773_v26 = vadd.f32 %v772_v21, %v684_v20  ;;  %v647_v27 = vadd.f32 %v1718_v48, %v646_v23  ;;  %v735_v28 = vpop.f32.mrf.mxu1 }
  0xfb   : > { %990 = vst [vmem:[%s1734_s14 + $0x40] sm:$0xff] %v1345_v22  ;;  %v846_v29 = vmul.f32 2.0, %v1496_v24  ;;  %v866_v22 = vld [vmem:[%s1726_s11 + $0x60] sm:$0xff] }
  0xfc   : > { %v1498_v30 = vpop.eup %1497  ;;  %1499 = vtanh.f32 %v773_v26  ;;  %v736_v32 = vadd.f32 %v735_v28, %v647_v27 }
  0xfd   : > { %v910_v33 = vadd.f32 %v878_v25, %v846_v29  ;;  %v831_v34 = vmul.f32 2.0, %v1498_v30 }
  0xfe   : > { %1501 = vtanh.f32 %v736_v32 }
  0xff   : > { %v1361_v35 = vclamps-f32 %v910_v33, 1.0  ;;  %v895_v36 = vadd.f32 %v863_v31, %v831_v34  ;;  %v686_v37 = vpop.f32.mrf.mxu2  ;;  %v882_v34 = vld [vmem:[%s1726_s11 + $0xe0] sm:$0xff] }
 0x100   : > { %v687_v38 = vadd.f32 %v1718_v48, %v686_v37  ;;  %v775_v39 = vpop.f32.mrf.mxu3 }
 0x101   : > { %1006 = vst [vmem:[%s1734_s14 + $0xc0] sm:$0xff] %v1361_v35  ;;  %v1346_v40 = vclamps-f32 %v895_v36, 1.0  ;;  %v648_v41 = vpop.f32.mrf.mxu0 }
 0x102   : > { %v1500_v42 = vpop.eup %1499  ;;  %v776_v44 = vadd.f32 %v775_v39, %v687_v38  ;;  %v649_v45 = vadd.f32 %v1718_v48, %v648_v41  ;;  %v737_v46 = vpop.f32.mrf.mxu1 }
 0x103   : > { %991 = vst [vmem:[%s1734_s14 + $0x48] sm:$0xff] %v1346_v40  ;;  %v847_v47 = vmul.f32 2.0, %v1500_v42  ;;  %v867_v40 = vld [vmem:[%s1726_s11 + $0x68] sm:$0xff] }
 0x104   : > { %v1502_v49 = vpop.eup %1501  ;;  %1503 = vtanh.f32 %v776_v44  ;;  %v738_v51 = vadd.f32 %v737_v46, %v649_v45 }
 0x105   : > { %v911_v52 = vadd.f32 %v879_v43, %v847_v47  ;;  %v832_v53 = vmul.f32 2.0, %v1502_v49 }
 0x106   : > { %1505 = vtanh.f32 %v738_v51 }
 0x107   : > { %v1362_v54 = vclamps-f32 %v911_v52, 1.0  ;;  %v896_v55 = vadd.f32 %v864_v50, %v832_v53  ;;  %v688_v56 = vpop.f32.mrf.mxu2  ;;  %v883_v53 = vld [vmem:[%s1726_s11 + $0xe8] sm:$0xff] }
 0x108   : > { %v689_v57 = vadd.f32 %v1718_v48, %v688_v56  ;;  %v777_v58 = vpop.f32.mrf.mxu3 }
 0x109   : > { %1007 = vst [vmem:[%s1734_s14 + $0xc8] sm:$0xff] %v1362_v54  ;;  %v1347_v59 = vclamps-f32 %v896_v55, 1.0  ;;  %v651_v60 = vpop.f32.mrf.mxu0 }
 0x10a   : > { %v1504_v61 = vpop.eup %1503  ;;  %v778_v63 = vadd.f32 %v777_v58, %v689_v57  ;;  %v652_v0 = vadd.f32 %v1718_v48, %v651_v60  ;;  %v740_v1 = vpop.f32.mrf.mxu1 }
 0x10b   : > { %992 = vst [vmem:[%s1734_s14 + $0x50] sm:$0xff] %v1347_v59  ;;  %v848_v2 = vmul.f32 2.0, %v1504_v61  ;;  %v868_v59 = vld [vmem:[%s1726_s11 + $0x70] sm:$0xff] }
 0x10c   : > { %v1506_v3 = vpop.eup %1505  ;;  %1507 = vtanh.f32 %v778_v63  ;;  %v741_v5 = vadd.f32 %v740_v1, %v652_v0 }
 0x10d   : > { %v912_v6 = vadd.f32 %v880_v62, %v848_v2  ;;  %v833_v7 = vmul.f32 2.0, %v1506_v3 }
 0x10e   : > { %1509 = vtanh.f32 %v741_v5 }
 0x10f   : > { %v1363_v8 = vclamps-f32 %v912_v6, 1.0  ;;  %v897_v9 = vadd.f32 %v865_v4, %v833_v7  ;;  %v691_v10 = vpop.f32.mrf.mxu2  ;;  %v884_v6 = vld [vmem:[%s1726_s11 + $0xf0] sm:$0xff] }
 0x110   : > { %v692_v11 = vadd.f32 %v1718_v48, %v691_v10  ;;  %v780_v12 = vpop.f32.mrf.mxu3  ;;  %v869_v10 = vld [vmem:[%s1726_s11 + $0x78] sm:$0xff] }
 0x111   : > { %1008 = vst [vmem:[%s1734_s14 + $0xd0] sm:$0xff] %v1363_v8  ;;  %v1348_v13 = vclamps-f32 %v897_v9, 1.0  ;;  %v653_v14 = vpop.f32.mrf.mxu0 }
 0x112   : > { %v1508_v15 = vpop.eup %1507  ;;  %v781_v17 = vadd.f32 %v780_v12, %v692_v11  ;;  %v654_v18 = vadd.f32 %v1718_v48, %v653_v14  ;;  %v742_v19 = vpop.f32.mrf.mxu1 }
 0x113   : > { %993 = vst [vmem:[%s1734_s14 + $0x58] sm:$0xff] %v1348_v13  ;;  %v849_v20 = vmul.f32 2.0, %v1508_v15 }
 0x114   : > { %v1510_v21 = vpop.eup %1509  ;;  %1511 = vtanh.f32 %v781_v17  ;;  %v743_v23 = vadd.f32 %v742_v19, %v654_v18 }
 0x115   : > { %v913_v24 = vadd.f32 %v881_v16, %v849_v20  ;;  %v834_v25 = vmul.f32 2.0, %v1510_v21  ;;  %v885_v16 = vld [vmem:[%s1726_s11 + $0xf8] sm:$0xff] }
 0x116   : > { %1513 = vtanh.f32 %v743_v23 }
 0x117   : > { %v1364_v26 = vclamps-f32 %v913_v24, 1.0  ;;  %v898_v27 = vadd.f32 %v866_v22, %v834_v25  ;;  %v693_v28 = vpop.f32.mrf.mxu2 }
 0x118   : > { %v694_v29 = vadd.f32 %v1718_v48, %v693_v28  ;;  %v782_v30 = vpop.f32.mrf.mxu3 }
 0x119   : > { %1009 = vst [vmem:[%s1734_s14 + $0xd8] sm:$0xff] %v1364_v26  ;;  %v1349_v31 = vclamps-f32 %v898_v27, 1.0  ;;  %v656_v32 = vpop.f32.mrf.mxu0 }
 0x11a   : > { %v1512_v33 = vpop.eup %1511  ;;  %v783_v35 = vadd.f32 %v782_v30, %v694_v29  ;;  %v657_v36 = vadd.f32 %v1718_v48, %v656_v32  ;;  %v745_v37 = vpop.f32.mrf.mxu1 }
 0x11b   : > { %994 = vst [vmem:[%s1734_s14 + $0x60] sm:$0xff] %v1349_v31  ;;  %v850_v38 = vmul.f32 2.0, %v1512_v33 }
 0x11c   : > { %v1514_v39 = vpop.eup %1513  ;;  %1515 = vtanh.f32 %v783_v35  ;;  %v746_v41 = vadd.f32 %v745_v37, %v657_v36 }
 0x11d   : > { %v914_v42 = vadd.f32 %v882_v34, %v850_v38  ;;  %v835_v43 = vmul.f32 2.0, %v1514_v39 }
 0x11e   : > { %1517 = vtanh.f32 %v746_v41 }
 0x11f   : > { %v1365_v44 = vclamps-f32 %v914_v42, 1.0  ;;  %v899_v45 = vadd.f32 %v867_v40, %v835_v43  ;;  %v696_v46 = vpop.f32.mrf.mxu2 }
 0x120   : > { %v697_v47 = vadd.f32 %v1718_v48, %v696_v46  ;;  %v785_v49 = vpop.f32.mrf.mxu3 }
 0x121   : > { %1010 = vst [vmem:[%s1734_s14 + $0xe0] sm:$0xff] %v1365_v44  ;;  %v1350_v50 = vclamps-f32 %v899_v45, 1.0  ;;  %v658_v51 = vpop.f32.mrf.mxu0 }
 0x122   : > { %v1516_v52 = vpop.eup %1515  ;;  %v786_v54 = vadd.f32 %v785_v49, %v697_v47  ;;  %v659_v55 = vadd.f32 %v1718_v48, %v658_v51  ;;  %v747_v57 = vpop.f32.mrf.mxu1 }
 0x123   : > { %995 = vst [vmem:[%s1734_s14 + $0x68] sm:$0xff] %v1350_v50  ;;  %v851_v56 = vmul.f32 2.0, %v1516_v52 }
 0x124   : > { %v1518_v58 = vpop.eup %1517  ;;  %1519 = vtanh.f32 %v786_v54  ;;  %v748_v60 = vadd.f32 %v747_v57, %v659_v55 }
 0x125   : > { %v915_v61 = vadd.f32 %v883_v53, %v851_v56  ;;  %v836_v62 = vmul.f32 2.0, %v1518_v58 }
 0x126   : > { %1521 = vtanh.f32 %v748_v60 }
 0x127   : > { %v1366_v63 = vclamps-f32 %v915_v61, 1.0  ;;  %v900_v0 = vadd.f32 %v868_v59, %v836_v62  ;;  %v698_v1 = vpop.f32.mrf.mxu2 }
 0x128   : > { %v699_v2 = vadd.f32 %v1718_v48, %v698_v1  ;;  %v787_v4 = vpop.f32.mrf.mxu3 }
 0x129   : > { %1011 = vst [vmem:[%s1734_s14 + $0xe8] sm:$0xff] %v1366_v63  ;;  %v1351_v3 = vclamps-f32 %v900_v0, 1.0 }
 0x12a   : > { %v1520_v5 = vpop.eup %1519  ;;  %v788_v7 = vadd.f32 %v787_v4, %v699_v2 }
 0x12b   : > { %996 = vst [vmem:[%s1734_s14 + $0x70] sm:$0xff] %v1351_v3  ;;  %v852_v8 = vmul.f32 2.0, %v1520_v5 }
 0x12c   : > { %v1522_v9 = vpop.eup %1521  ;;  %1523 = vtanh.f32 %v788_v7 }
 0x12d   : > { %v916_v11 = vadd.f32 %v884_v6, %v852_v8  ;;  %v837_v12 = vmul.f32 2.0, %v1522_v9 }
 0x12f   : > { %v1367_v13 = vclamps-f32 %v916_v11, 1.0  ;;  %v901_v14 = vadd.f32 %v869_v10, %v837_v12 }
 0x131   : > { %1012 = vst [vmem:[%s1734_s14 + $0xf0] sm:$0xff] %v1367_v13  ;;  %v1352_v48 = vclamps-f32 %v901_v14, 1.0 }
 0x132   : > { %v1524_v15 = vpop.eup %1523 }
 0x133   : > { %997 = vst [vmem:[%s1734_s14 + $0x78] sm:$0xff] %v1352_v48  ;;  %v853_v17 = vmul.f32 2.0, %v1524_v15 }
 0x135   : > { %v917_v18 = vadd.f32 %v885_v16, %v853_v17 }
 0x137   : > { %v1368_v19 = vclamps-f32 %v917_v18, 1.0 }
 0x139   : > { %1013 = vst [vmem:[%s1734_s14 + $0xf8] sm:$0xff] %v1368_v19 }
 0x13a PF: > { %s14_s17 = sadd.s32 1, %s1547_s17   ;;  %s1842_s15 = smov %s1543_s16 }
 0x13b   : > { %p11_p5 = scmp.ge.s32.totalorder %s14_s17, 4   ;;  %s1843_s16 = smov %s1845_s18 }
 0x13d   :  { %13 = sbr.rel (!%p11_p5) target bundleno = 2 (0x2), region = 75 }

</bundles_post_ra>
